<compile_context>
chip_gen: v6e
topology: v6e:2x2x1
jax: 0.10.0
libtpu: 0.0.40
codegen_flags: <defaults>
</compile_context>

<pallas_src>
import functools

import jax
import jax.numpy as jnp
import numpy as np
from jax.experimental import pallas as pl
from jax.experimental.pallas import tpu as pltpu


# ----------------------------------------------------------------------------
# Pallas kernels
# ----------------------------------------------------------------------------
def durendal_conv_kernel(
    x_full_ref,   # [N, Fin]        all source nodes (resident across tiles)
    x_tile_ref,   # [TILE_N, Fin]   destination-node tile (root transform)
    adj_ref,      # [R, TILE_N, N]  mean-normalized adjacency block (dst x src)
    past_ref,     # [TILE_N, R*H]   past per-relation embeddings, lane-packed
    wl_ref,       # [R, Fin, H]     per-relation neighbor transform
    wr_ref,       # [Fin, R*H]      root transform, lane-packed over relations
    b_ref,        # [1, R*H]
    wih_ref,      # [R*H, 3*R*H]    GRUCell W_ih, gate-major & relation-tiled
    whh_ref,      # [R*H, 3*R*H]    GRUCell W_hh
    bih_ref,      # [1, 3*R*H]
    bhh_ref,      # [1, 3*R*H]
    kw_ref,       # [R*H, R*H]      semantic-attention k_lin, block-diagonal
    kb_ref,       # [1, R*H]
    cur_ref,      # out: [TILE_N, R*H]  updated per-relation embeddings (packed)
    ksum_ref,     # out: [1, 8, R*H]    per-tile partial sum of tanh(k_lin(cur))
    *,
    num_rel,
    hidden,
    tile_n,
    use_gru,
):
    R, H = num_rel, hidden
    RH = R * H
    x_full = x_full_ref[...]                                        # [N, Fin]

    # ---- DurendalConv:  Z_r = (A_r X) W_l_r + X W_r_r + b_r  (lane-packed) ---
    adj2d = adj_ref[...].reshape(R * tile_n, x_full.shape[0])       # [R*T, N]
    nbr = jnp.dot(adj2d, x_full, preferred_element_type=jnp.float32)  # [R*T, Fin]
    pieces = []
    for r in range(R):                                              # unrolled, R small
        nbr_r = nbr[r * tile_n:(r + 1) * tile_n, :]                 # [T, Fin]
        pieces.append(jnp.dot(nbr_r, wl_ref[r],
                              preferred_element_type=jnp.float32))  # [T, H]
    conv = jnp.concatenate(pieces, axis=-1)                         # [T, R*H]
    conv = conv + jnp.dot(x_tile_ref[...], wr_ref[...],
                          preferred_element_type=jnp.float32) + b_ref[...]

    # ---- SemanticUpdateGRU (shared GRUCell, PyTorch gate order r, z, n) ------
    if use_gru:
        h_past = past_ref[...]                                      # [T, R*H]
        gi = jnp.dot(conv, wih_ref[...],
                     preferred_element_type=jnp.float32) + bih_ref[...]   # [T, 3RH]
        gh = jnp.dot(h_past, whh_ref[...],
                     preferred_element_type=jnp.float32) + bhh_ref[...]   # [T, 3RH]
        r_g = jax.nn.sigmoid(gi[:, :RH] + gh[:, :RH])
        z_g = jax.nn.sigmoid(gi[:, RH:2 * RH] + gh[:, RH:2 * RH])
        n_g = jnp.tanh(gi[:, 2 * RH:] + r_g * gh[:, 2 * RH:])
        cur = (1.0 - z_g) * n_g + z_g * h_past
    else:
        cur = conv
    cur_ref[...] = cur

    # ---- SemanticAttention phase 1: partial node-sum of tanh(k_lin(cur)) -----
    k = jnp.tanh(jnp.dot(cur, kw_ref[...],
                         preferred_element_type=jnp.float32) + kb_ref[...])  # [T, RH]
    psum = jnp.sum(k, axis=0, keepdims=True)                                  # [1, RH]
    ksum_ref[...] = jnp.broadcast_to(psum[None, :, :], (1, 8, RH))


def semantic_agg_kernel(cur_ref, attn_ref, agg_ref, *, num_rel, hidden):
    # SemanticAttention phase 2: attn-weighted sum over relations.
    w = cur_ref[...] * attn_ref[...]                       # [T, R*H]
    acc = w[:, :hidden]
    for r in range(1, num_rel):
        acc = acc + w[:, r * hidden:(r + 1) * hidden]
    agg_ref[...] = acc                                     # [T, H]


def post_kernel(h_src_ref, h_dst_ref, w_ref, b_ref, out_ref):
    # hadamard -> sum over the 2 logits of Linear(H2, 2), reduced algebraically
    # to one VPU dot against w_sum = W[:, 0] + W[:, 1].
    had = h_src_ref[...] * h_dst_ref[...]                  # [E, H2]
    out_ref[...] = jnp.sum(had * w_ref[...], axis=-1, keepdims=True) + b_ref[...]


# ----------------------------------------------------------------------------
# Wrappers
# ----------------------------------------------------------------------------
def durendal_layer(x, adj, lp, past_pack, *, snap, tile_n):
    N, Fin = x.shape
    R = adj.shape[0]
    RH = lp["b_flat"].shape[1]
    H = RH // R
    assert N % tile_n == 0
    num_tiles = N // tile_n

    kernel = functools.partial(
        durendal_conv_kernel, num_rel=R, hidden=H, tile_n=tile_n,
        use_gru=(snap > 0))

    cparams = pltpu.CompilerParams(
        dimension_semantics=("parallel",),
        vmem_limit_bytes=64 * 1024 * 1024,
    )

    cur_pack, ksum = pl.pallas_call(
        kernel,
        grid=(num_tiles,),
        in_specs=[
            pl.BlockSpec((N, Fin), lambda i: (0, 0)),            # x (full, resident)
            pl.BlockSpec((tile_n, Fin), lambda i: (i, 0)),       # x (dst tile)
            pl.BlockSpec((R, tile_n, N), lambda i: (0, i, 0)),   # adj (streamed)
            pl.BlockSpec((tile_n, RH), lambda i: (i, 0)),        # past (packed)
            pl.BlockSpec((R, Fin, H), lambda i: (0, 0, 0)),      # wl
            pl.BlockSpec((Fin, RH), lambda i: (0, 0)),           # wr_flat
            pl.BlockSpec((1, RH), lambda i: (0, 0)),             # b_flat
            pl.BlockSpec((RH, 3 * RH), lambda i: (0, 0)),        # wih_big
            pl.BlockSpec((RH, 3 * RH), lambda i: (0, 0)),        # whh_big
            pl.BlockSpec((1, 3 * RH), lambda i: (0, 0)),         # bih_big
            pl.BlockSpec((1, 3 * RH), lambda i: (0, 0)),         # bhh_big
            pl.BlockSpec((RH, RH), lambda i: (0, 0)),            # kw_big
            pl.BlockSpec((1, RH), lambda i: (0, 0)),             # kb_big
        ],
        out_specs=(
            pl.BlockSpec((tile_n, RH), lambda i: (i, 0)),
            pl.BlockSpec((1, 8, RH), lambda i: (i, 0, 0)),
        ),
        out_shape=(
            jax.ShapeDtypeStruct((N, RH), jnp.float32),
            jax.ShapeDtypeStruct((num_tiles, 8, RH), jnp.float32),
        ),
        compiler_params=cparams,
    )(x, x, adj, past_pack,
      lp["wl"], lp["wr_flat"], lp["b_flat"],
      lp["wih_big"], lp["whh_big"], lp["bih_big"], lp["bhh_big"],
      lp["kw_big"], lp["kb_big"])

    # Tiny [R]-sized relation-softmax glue (scores from the per-tile partial sums).
    km = jnp.sum(ksum[:, 0, :], axis=0).reshape(R, H) / float(N)   # mean over nodes
    score = jnp.sum(lp["q"] * km, axis=-1)                         # [R]
    attn = jax.nn.softmax(score)                                   # [R]
    attn_pack = jnp.repeat(attn, H).reshape(1, RH)                 # lane-packed

    agg_kernel = functools.partial(semantic_agg_kernel, num_rel=R, hidden=H)
    agg = pl.pallas_call(
        agg_kernel,
        grid=(num_tiles,),
        in_specs=[
            pl.BlockSpec((tile_n, RH), lambda i: (i, 0)),
            pl.BlockSpec((1, RH), lambda i: (0, 0)),
        ],
        out_specs=pl.BlockSpec((tile_n, H), lambda i: (i, 0)),
        out_shape=jax.ShapeDtypeStruct((N, H), jnp.float32),
        compiler_params=cparams,
    )(cur_pack, attn_pack)

    return cur_pack, agg


def post_head(h_src, h_dst, w_sum, b_sum):
    E = h_src.shape[0]
    vmem = pl.BlockSpec(memory_space=pltpu.MemorySpace.VMEM)
    out = pl.pallas_call(
        post_kernel,
        out_shape=jax.ShapeDtypeStruct((E, 1), jnp.float32),
        in_specs=[vmem, vmem, vmem, vmem],
        out_specs=vmem,
    )(h_src, h_dst, w_sum, b_sum)
    return out[:, 0]


def _pack_rel(a):       # [R, N, H] -> [N, R*H]
    R, N, H = a.shape
    return jnp.transpose(a, (1, 0, 2)).reshape(N, R * H)


def _unpack_rel(a, R):  # [N, R*H] -> [R, N, H]
    N, RH = a.shape
    H = RH // R
    return jnp.transpose(a.reshape(N, R, H), (1, 0, 2))


def icews_durendal_forward(x, adj, edge_label_index, snap, prep, past1, past2):
    R = adj.shape[0]
    N = x.shape[0]
    tile_n = 128 if N % 128 == 0 else N

    cur1_pack, out1 = durendal_layer(x, adj, prep["l1"], _pack_rel(past1),
                                     snap=snap, tile_n=tile_n)
    cur2_pack, out2 = durendal_layer(out1, adj, prep["l2"], _pack_rel(past2),
                                     snap=snap, tile_n=tile_n)

    # glue: endpoint gather (data-dependent indexing).
    # TODO(synk): at realistic edge counts, fuse this gather into the post kernel
    # via PrefetchScalarGridSpec + pl.Element row gathers.
    h_src = out2[edge_label_index[0]]
    h_dst = out2[edge_label_index[1]]
    pred = post_head(h_src, h_dst, prep["post_w_sum"], prep["post_b_sum"])
    return pred, _unpack_rel(cur1_pack, R), _unpack_rel(cur2_pack, R)


# ----------------------------------------------------------------------------
# One-time parameter packing (layout plumbing, outside the hot path)
# ----------------------------------------------------------------------------
def _block_diag(blocks):
    R = len(blocks)
    a, b = blocks[0].shape
    out = jnp.zeros((R * a, R * b), jnp.float32)
    for r, blk in enumerate(blocks):
        out = out.at[r * a:(r + 1) * a, r * b:(r + 1) * b].set(blk)
    return out


def _gru_big_weight(w, R, H):
    """PyTorch GRUCell weight [3H, H] -> [R*H, 3*R*H], gate-major, relation-tiled.

    (z_pack @ big)[n, g*R*H + r*H + k] == sum_j z_pack[n, r*H + j] * w[g*H + k, j]
    """
    wT = w.T                                            # [H, 3H]
    big = jnp.zeros((R * H, 3 * R * H), jnp.float32)
    for g in range(3):
        blk = wT[:, g * H:(g + 1) * H]                  # [H, H]
        for r in range(R):
            big = big.at[r * H:(r + 1) * H,
                         g * R * H + r * H: g * R * H + (r + 1) * H].set(blk)
    return big


def _gru_big_bias(b, R, H):
    # [1, 3H] -> [1, 3*R*H], gate-major, tiled over relations
    b3 = b.reshape(3, H)
    return jnp.tile(b3[:, None, :], (1, R, 1)).reshape(1, 3 * R * H)


def prepare_params(p, R):
    def layer(prefix):
        wl = p[f"{prefix}_wl"]                          # [R, Fin, H]
        wr = p[f"{prefix}_wr"]
        fin, H = wl.shape[1], wl.shape[2]
        return {
            "wl": wl,
            "wr_flat": jnp.transpose(wr, (1, 0, 2)).reshape(fin, R * H),
            "b_flat": p[f"{prefix}_b"].reshape(1, R * H),
            "wih_big": _gru_big_weight(p[f"{prefix}_gru_wih"], R, H),
            "whh_big": _gru_big_weight(p[f"{prefix}_gru_whh"], R, H),
            "bih_big": _gru_big_bias(p[f"{prefix}_gru_bih"], R, H),
            "bhh_big": _gru_big_bias(p[f"{prefix}_gru_bhh"], R, H),
            "kw_big": _block_diag([p[f"{prefix}_att_kw"].T] * R),
            "kb_big": jnp.tile(p[f"{prefix}_att_kb"].reshape(1, H), (1, R)),
            "q": p[f"{prefix}_att_q"],
        }

    return {
        "l1": layer("l1"),
        "l2": layer("l2"),
        "post_w_sum": jnp.sum(p["post_w_t"], axis=1, keepdims=True).T,  # [1, H2]
        "post_b_sum": jnp.sum(p["post_b"], axis=-1, keepdims=True),     # [1, 1]
    }


# ----------------------------------------------------------------------------
# Pure-JAX reference (original per-relation layout) for a numeric cross-check
# ----------------------------------------------------------------------------
def _ref_layer(x, adj, wl, wr, b, w_ih, w_hh, b_ih, b_hh, past, kw, kb, q, snap):
    H = wl.shape[-1]
    nbr = jnp.einsum("rij,jf->rif", adj, x)
    z = jnp.einsum("rif,rfh->rih", nbr, wl) + jnp.einsum("if,rfh->rih", x, wr) + b
    if snap > 0:
        gi = jnp.einsum("rnh,gh->rng", z, w_ih) + b_ih
        gh = jnp.einsum("rnh,gh->rng", past, w_hh) + b_hh
        r_g = jax.nn.sigmoid(gi[..., :H] + gh[..., :H])
        z_g = jax.nn.sigmoid(gi[..., H:2 * H] + gh[..., H:2 * H])
        n_g = jnp.tanh(gi[..., 2 * H:] + r_g * gh[..., 2 * H:])
        z = (1.0 - z_g) * n_g + z_g * past
    k = jnp.tanh(jnp.einsum("rnh,oh->rno", z, kw) + kb)
    score = jnp.sum(q * jnp.mean(k, axis=1), axis=-1, keepdims=True)
    attn = jax.nn.softmax(score, axis=0)
    return z, jnp.sum(attn[:, :, None] * z, axis=0)


def _ref_forward(x, adj, eli, snap, p, past1, past2):
    cur1, o1 = _ref_layer(x, adj, p["l1_wl"], p["l1_wr"], p["l1_b"],
                          p["l1_gru_wih"], p["l1_gru_whh"], p["l1_gru_bih"], p["l1_gru_bhh"],
                          past1, p["l1_att_kw"], p["l1_att_kb"], p["l1_att_q"], snap)
    cur2, o2 = _ref_layer(o1, adj, p["l2_wl"], p["l2_wr"], p["l2_b"],
                          p["l2_gru_wih"], p["l2_gru_whh"], p["l2_gru_bih"], p["l2_gru_bhh"],
                          past2, p["l2_att_kw"], p["l2_att_kb"], p["l2_att_q"], snap)
    had = o2[eli[0]] * o2[eli[1]]
    logits = had @ p["post_w_t"] + p["post_b"]
    return jnp.sum(logits, axis=-1), cur1, cur2


# ----------------------------------------------------------------------------
# Deterministic parameter init (PyTorch-style layouts)
# ----------------------------------------------------------------------------
def init_params(key, in_ch, H1, H2, R):
    ks = jax.random.split(key, 24)

    def unif(k, shape, a):
        return jax.random.uniform(k, shape, jnp.float32, -a, a)

    def glorot(k, shape):
        a = float(np.sqrt(6.0 / (shape[-2] + shape[-1])))
        return unif(k, shape, a)

    p = {}
    p["l1_wl"] = glorot(ks[0], (R, in_ch, H1))
    p["l1_wr"] = glorot(ks[1], (R, in_ch, H1))
    p["l1_b"] = unif(ks[2], (R, 1, H1), 0.1)
    g1 = float(1.0 / np.sqrt(H1))
    p["l1_gru_wih"] = unif(ks[3], (3 * H1, H1), g1)
    p["l1_gru_whh"] = unif(ks[4], (3 * H1, H1), g1)
    p["l1_gru_bih"] = unif(ks[5], (1, 3 * H1), g1)
    p["l1_gru_bhh"] = unif(ks[6], (1, 3 * H1), g1)
    p["l1_att_kw"] = glorot(ks[7], (H1, H1))
    p["l1_att_kb"] = jnp.zeros((1, H1), jnp.float32)
    p["l1_att_q"] = glorot(ks[8], (1, H1))

    p["l2_wl"] = glorot(ks[9], (R, H1, H2))
    p["l2_wr"] = glorot(ks[10], (R, H1, H2))
    p["l2_b"] = unif(ks[11], (R, 1, H2), 0.1)
    g2 = float(1.0 / np.sqrt(H2))
    p["l2_gru_wih"] = unif(ks[12], (3 * H2, H2), g2)
    p["l2_gru_whh"] = unif(ks[13], (3 * H2, H2), g2)
    p["l2_gru_bih"] = unif(ks[14], (1, 3 * H2), g2)
    p["l2_gru_bhh"] = unif(ks[15], (1, 3 * H2), g2)
    p["l2_att_kw"] = glorot(ks[16], (H2, H2))
    p["l2_att_kb"] = jnp.zeros((1, H2), jnp.float32)
    p["l2_att_q"] = glorot(ks[17], (1, H2))

    p["post_w_t"] = glorot(ks[18], (H2, 2))      # Linear(H2, 2) stored transposed
    p["post_b"] = jnp.zeros((1, 2), jnp.float32)
    return p


# ----------------------------------------------------------------------------
# Main
# ----------------------------------------------------------------------------
if __name__ == "__main__":
    N, F_IN, H1, H2, R = 256, 16, 32, 32, 4      # R*H = 128 -> lane-dense packing
    EDGES_PER_REL = 1024
    E = 64
    SNAP = 1  # exercise the GRU temporal-update path (static, baked into kernel)

    key = jax.random.PRNGKey(0)
    k_x, k_e, k_lbl, k_p1, k_p2, k_par = jax.random.split(key, 6)

    x = jax.random.normal(k_x, (N, F_IN), jnp.float32)

    # Build per-relation mean-normalized dense adjacency [R, N, N] (dst x src).
    adj_list = []
    ek = jax.random.split(k_e, R)
    for r in range(R):
        src = jax.random.randint(ek[r], (EDGES_PER_REL,), 0, N)
        dst = jax.random.randint(jax.random.fold_in(ek[r], 1), (EDGES_PER_REL,), 0, N)
        a = jnp.zeros((N, N), jnp.float32).at[dst, src].add(1.0)
        deg = jnp.clip(jnp.sum(a, axis=1, keepdims=True), 1.0, None)
        adj_list.append(a / deg)
    adj = jnp.stack(adj_list)

    edge_label_index = jax.random.randint(k_lbl, (2, E), 0, N)
    past1 = 0.1 * jax.random.normal(k_p1, (R, N, H1), jnp.float32)
    past2 = 0.1 * jax.random.normal(k_p2, (R, N, H2), jnp.float32)

    params = init_params(k_par, F_IN, H1, H2, R)
    prep = prepare_params(params, R)

    pred, cur1, cur2 = icews_durendal_forward(
        x, adj, edge_label_index, SNAP, prep, past1, past2)
    jax.block_until_ready((pred, cur1, cur2))

    # Cross-check against a pure-JAX reference of the same math.
    pred_ref, cur1_ref, cur2_ref = _ref_forward(
        x, adj, edge_label_index, SNAP, params, past1, past2)
    np.testing.assert_allclose(np.asarray(pred), np.asarray(pred_ref), atol=1e-2, rtol=1e-2)
    np.testing.assert_allclose(np.asarray(cur1), np.asarray(cur1_ref), atol=1e-2, rtol=1e-2)
    np.testing.assert_allclose(np.asarray(cur2), np.asarray(cur2_ref), atol=1e-2, rtol=1e-2)

    assert pred.shape == (E,)
    assert cur1.shape == (R, N, H1) and cur2.shape == (R, N, H2)
    print("KERNEL_OK")
</pallas_src>

<mosaic_0001>
module attributes {stable_mosaic.version = 11 : i64} {
  func.func @durendal_conv_kernel(%arg0: i32, %arg1: memref<256x16xf32, #tpu.memory_space<vmem>>, %arg2: memref<128x16xf32, #tpu.memory_space<vmem>>, %arg3: memref<4x128x256xf32, #tpu.memory_space<vmem>>, %arg4: memref<128x128xf32, #tpu.memory_space<vmem>>, %arg5: memref<4x16x32xf32, #tpu.memory_space<vmem>>, %arg6: memref<16x128xf32, #tpu.memory_space<vmem>>, %arg7: memref<1x128xf32, #tpu.memory_space<vmem>>, %arg8: memref<128x384xf32, #tpu.memory_space<vmem>>, %arg9: memref<128x384xf32, #tpu.memory_space<vmem>>, %arg10: memref<1x384xf32, #tpu.memory_space<vmem>>, %arg11: memref<1x384xf32, #tpu.memory_space<vmem>>, %arg12: memref<128x128xf32, #tpu.memory_space<vmem>>, %arg13: memref<1x128xf32, #tpu.memory_space<vmem>>, %arg14: memref<128x128xf32, #tpu.memory_space<vmem>>, %arg15: memref<1x8x128xf32, #tpu.memory_space<vmem>>) attributes {dimension_semantics = [#tpu.dimension_semantics<parallel>], iteration_bounds = array<i64: 2>, scalar_prefetch = 0 : i64, scratch_operands = 0 : i64, tpu.core_type = #tpu.core_type<tc>, window_params = [{pipeline_mode = #tpu.pipeline_mode<synchronous>, transform_indices = @transform_0, window_bounds = array<i64: 256, 16>}, {transform_indices = @transform_1, window_bounds = array<i64: 128, 16>}, {transform_indices = @transform_2, window_bounds = array<i64: 4, 128, 256>}, {transform_indices = @transform_3, window_bounds = array<i64: 128, 128>}, {pipeline_mode = #tpu.pipeline_mode<synchronous>, transform_indices = @transform_4, window_bounds = array<i64: 4, 16, 32>}, {pipeline_mode = #tpu.pipeline_mode<synchronous>, transform_indices = @transform_5, window_bounds = array<i64: 16, 128>}, {pipeline_mode = #tpu.pipeline_mode<synchronous>, transform_indices = @transform_6, window_bounds = array<i64: 1, 128>}, {pipeline_mode = #tpu.pipeline_mode<synchronous>, transform_indices = @transform_7, window_bounds = array<i64: 128, 384>}, {pipeline_mode = #tpu.pipeline_mode<synchronous>, transform_indices = @transform_8, window_bounds = array<i64: 128, 384>}, {pipeline_mode = #tpu.pipeline_mode<synchronous>, transform_indices = @transform_9, window_bounds = array<i64: 1, 384>}, {pipeline_mode = #tpu.pipeline_mode<synchronous>, transform_indices = @transform_10, window_bounds = array<i64: 1, 384>}, {pipeline_mode = #tpu.pipeline_mode<synchronous>, transform_indices = @transform_11, window_bounds = array<i64: 128, 128>}, {pipeline_mode = #tpu.pipeline_mode<synchronous>, transform_indices = @transform_12, window_bounds = array<i64: 1, 128>}, {transform_indices = @transform_13, window_bounds = array<i64: 128, 128>}, {transform_indices = @transform_14, window_bounds = array<i64: 1, 8, 128>}]} {
    %c0 = arith.constant 0 : index
    %c0_0 = arith.constant 0 : index
    %0 = vector.load %arg1[%c0, %c0_0] : memref<256x16xf32, #tpu.memory_space<vmem>>, vector<256x16xf32>
    %c0_1 = arith.constant 0 : index
    %c0_2 = arith.constant 0 : index
    %c0_3 = arith.constant 0 : index
    %1 = vector.load %arg3[%c0_1, %c0_2, %c0_3] : memref<4x128x256xf32, #tpu.memory_space<vmem>>, vector<4x128x256xf32>
    %2 = vector.shape_cast %1 : vector<4x128x256xf32> to vector<512x256xf32>
    %cst = arith.constant dense<0.000000e+00> : vector<512x16xf32>
    %3 = tpu.matmul %2, %0, %cst {dimension_numbers = #tpu.dot_dimension_numbers<[1], [0], [0], [1], [0, 0, 1, 1], [], []>} : vector<512x256xf32>, vector<256x16xf32>, vector<512x16xf32> -> vector<512x16xf32>
    %4 = vector.extract_strided_slice %3 {offsets = [0, 0], sizes = [128, 16], strides = [1, 1]} : vector<512x16xf32> to vector<128x16xf32>
    %c0_4 = arith.constant 0 : index
    %c0_5 = arith.constant 0 : index
    %c0_6 = arith.constant 0 : index
    %5 = vector.load %arg5[%c0_4, %c0_5, %c0_6] : memref<4x16x32xf32, #tpu.memory_space<vmem>>, vector<1x16x32xf32>
    %6 = vector.shape_cast %5 : vector<1x16x32xf32> to vector<16x32xf32>
    %cst_7 = arith.constant dense<0.000000e+00> : vector<128x32xf32>
    %7 = tpu.matmul %4, %6, %cst_7 {dimension_numbers = #tpu.dot_dimension_numbers<[1], [0], [0], [1], [0, 0, 1, 1], [], []>} : vector<128x16xf32>, vector<16x32xf32>, vector<128x32xf32> -> vector<128x32xf32>
    %8 = vector.extract_strided_slice %3 {offsets = [128, 0], sizes = [128, 16], strides = [1, 1]} : vector<512x16xf32> to vector<128x16xf32>
    %c1 = arith.constant 1 : index
    %c0_8 = arith.constant 0 : index
    %c0_9 = arith.constant 0 : index
    %9 = vector.load %arg5[%c1, %c0_8, %c0_9] : memref<4x16x32xf32, #tpu.memory_space<vmem>>, vector<1x16x32xf32>
    %10 = vector.shape_cast %9 : vector<1x16x32xf32> to vector<16x32xf32>
    %cst_10 = arith.constant dense<0.000000e+00> : vector<128x32xf32>
    %11 = tpu.matmul %8, %10, %cst_10 {dimension_numbers = #tpu.dot_dimension_numbers<[1], [0], [0], [1], [0, 0, 1, 1], [], []>} : vector<128x16xf32>, vector<16x32xf32>, vector<128x32xf32> -> vector<128x32xf32>
    %12 = vector.extract_strided_slice %3 {offsets = [256, 0], sizes = [128, 16], strides = [1, 1]} : vector<512x16xf32> to vector<128x16xf32>
    %c2 = arith.constant 2 : index
    %c0_11 = arith.constant 0 : index
    %c0_12 = arith.constant 0 : index
    %13 = vector.load %arg5[%c2, %c0_11, %c0_12] : memref<4x16x32xf32, #tpu.memory_space<vmem>>, vector<1x16x32xf32>
    %14 = vector.shape_cast %13 : vector<1x16x32xf32> to vector<16x32xf32>
    %cst_13 = arith.constant dense<0.000000e+00> : vector<128x32xf32>
    %15 = tpu.matmul %12, %14, %cst_13 {dimension_numbers = #tpu.dot_dimension_numbers<[1], [0], [0], [1], [0, 0, 1, 1], [], []>} : vector<128x16xf32>, vector<16x32xf32>, vector<128x32xf32> -> vector<128x32xf32>
    %16 = vector.extract_strided_slice %3 {offsets = [384, 0], sizes = [128, 16], strides = [1, 1]} : vector<512x16xf32> to vector<128x16xf32>
    %c3 = arith.constant 3 : index
    %c0_14 = arith.constant 0 : index
    %c0_15 = arith.constant 0 : index
    %17 = vector.load %arg5[%c3, %c0_14, %c0_15] : memref<4x16x32xf32, #tpu.memory_space<vmem>>, vector<1x16x32xf32>
    %18 = vector.shape_cast %17 : vector<1x16x32xf32> to vector<16x32xf32>
    %cst_16 = arith.constant dense<0.000000e+00> : vector<128x32xf32>
    %19 = tpu.matmul %16, %18, %cst_16 {dimension_numbers = #tpu.dot_dimension_numbers<[1], [0], [0], [1], [0, 0, 1, 1], [], []>} : vector<128x16xf32>, vector<16x32xf32>, vector<128x32xf32> -> vector<128x32xf32>
    %20 = tpu.concatenate %7, %11, %15, %19 in 1 : vector<128x32xf32>, vector<128x32xf32>, vector<128x32xf32>, vector<128x32xf32> -> vector<128x128xf32>
    %c0_17 = arith.constant 0 : index
    %c0_18 = arith.constant 0 : index
    %21 = vector.load %arg2[%c0_17, %c0_18] : memref<128x16xf32, #tpu.memory_space<vmem>>, vector<128x16xf32>
    %c0_19 = arith.constant 0 : index
    %c0_20 = arith.constant 0 : index
    %22 = vector.load %arg6[%c0_19, %c0_20] : memref<16x128xf32, #tpu.memory_space<vmem>>, vector<16x128xf32>
    %cst_21 = arith.constant dense<0.000000e+00> : vector<128x128xf32>
    %23 = tpu.matmul %21, %22, %cst_21 {dimension_numbers = #tpu.dot_dimension_numbers<[1], [0], [0], [1], [0, 0, 1, 1], [], []>} : vector<128x16xf32>, vector<16x128xf32>, vector<128x128xf32> -> vector<128x128xf32>
    %24 = arith.addf %20, %23 : vector<128x128xf32>
    %c0_22 = arith.constant 0 : index
    %c0_23 = arith.constant 0 : index
    %25 = vector.load %arg7[%c0_22, %c0_23] : memref<1x128xf32, #tpu.memory_space<vmem>>, vector<1x128xf32>
    %26 = vector.broadcast %25 : vector<1x128xf32> to vector<128x128xf32>
    %27 = arith.addf %24, %26 : vector<128x128xf32>
    %c0_24 = arith.constant 0 : index
    %c0_25 = arith.constant 0 : index
    %28 = vector.load %arg4[%c0_24, %c0_25] : memref<128x128xf32, #tpu.memory_space<vmem>>, vector<128x128xf32>
    %c0_26 = arith.constant 0 : index
    %c0_27 = arith.constant 0 : index
    %29 = vector.load %arg8[%c0_26, %c0_27] : memref<128x384xf32, #tpu.memory_space<vmem>>, vector<128x384xf32>
    %cst_28 = arith.constant dense<0.000000e+00> : vector<128x384xf32>
    %30 = tpu.matmul %27, %29, %cst_28 {dimension_numbers = #tpu.dot_dimension_numbers<[1], [0], [0], [1], [0, 0, 1, 1], [], []>} : vector<128x128xf32>, vector<128x384xf32>, vector<128x384xf32> -> vector<128x384xf32>
    %c0_29 = arith.constant 0 : index
    %c0_30 = arith.constant 0 : index
    %31 = vector.load %arg10[%c0_29, %c0_30] : memref<1x384xf32, #tpu.memory_space<vmem>>, vector<1x384xf32>
    %32 = vector.broadcast %31 : vector<1x384xf32> to vector<128x384xf32>
    %33 = arith.addf %30, %32 : vector<128x384xf32>
    %c0_31 = arith.constant 0 : index
    %c0_32 = arith.constant 0 : index
    %34 = vector.load %arg9[%c0_31, %c0_32] : memref<128x384xf32, #tpu.memory_space<vmem>>, vector<128x384xf32>
    %cst_33 = arith.constant dense<0.000000e+00> : vector<128x384xf32>
    %35 = tpu.matmul %28, %34, %cst_33 {dimension_numbers = #tpu.dot_dimension_numbers<[1], [0], [0], [1], [0, 0, 1, 1], [], []>} : vector<128x128xf32>, vector<128x384xf32>, vector<128x384xf32> -> vector<128x384xf32>
    %c0_34 = arith.constant 0 : index
    %c0_35 = arith.constant 0 : index
    %36 = vector.load %arg11[%c0_34, %c0_35] : memref<1x384xf32, #tpu.memory_space<vmem>>, vector<1x384xf32>
    %37 = vector.broadcast %36 : vector<1x384xf32> to vector<128x384xf32>
    %38 = arith.addf %35, %37 : vector<128x384xf32>
    %39 = vector.extract_strided_slice %33 {offsets = [0, 0], sizes = [128, 128], strides = [1, 1]} : vector<128x384xf32> to vector<128x128xf32>
    %40 = vector.extract_strided_slice %38 {offsets = [0, 0], sizes = [128, 128], strides = [1, 1]} : vector<128x384xf32> to vector<128x128xf32>
    %41 = arith.addf %39, %40 : vector<128x128xf32>
    %42 = arith.negf %41 : vector<128x128xf32>
    %43 = math.exp %42 : vector<128x128xf32>
    %cst_36 = arith.constant 1.000000e+00 : f32
    %44 = vector.broadcast %cst_36 : f32 to vector<128x128xf32>
    %45 = arith.addf %44, %43 : vector<128x128xf32>
    %46 = arith.divf %44, %45 : vector<128x128xf32>
    %47 = vector.extract_strided_slice %33 {offsets = [0, 128], sizes = [128, 128], strides = [1, 1]} : vector<128x384xf32> to vector<128x128xf32>
    %48 = vector.extract_strided_slice %38 {offsets = [0, 128], sizes = [128, 128], strides = [1, 1]} : vector<128x384xf32> to vector<128x128xf32>
    %49 = arith.addf %47, %48 : vector<128x128xf32>
    %50 = arith.negf %49 : vector<128x128xf32>
    %51 = math.exp %50 : vector<128x128xf32>
    %cst_37 = arith.constant 1.000000e+00 : f32
    %52 = vector.broadcast %cst_37 : f32 to vector<128x128xf32>
    %53 = arith.addf %52, %51 : vector<128x128xf32>
    %54 = arith.divf %52, %53 : vector<128x128xf32>
    %55 = vector.extract_strided_slice %33 {offsets = [0, 256], sizes = [128, 128], strides = [1, 1]} : vector<128x384xf32> to vector<128x128xf32>
    %56 = vector.extract_strided_slice %38 {offsets = [0, 256], sizes = [128, 128], strides = [1, 1]} : vector<128x384xf32> to vector<128x128xf32>
    %57 = arith.mulf %46, %56 : vector<128x128xf32>
    %58 = arith.addf %55, %57 : vector<128x128xf32>
    %59 = math.tanh %58 : vector<128x128xf32>
    %cst_38 = arith.constant 1.000000e+00 : f32
    %60 = vector.broadcast %cst_38 : f32 to vector<128x128xf32>
    %61 = arith.subf %60, %54 : vector<128x128xf32>
    %62 = arith.mulf %61, %59 : vector<128x128xf32>
    %63 = arith.mulf %54, %28 : vector<128x128xf32>
    %64 = arith.addf %62, %63 : vector<128x128xf32>
    %c0_39 = arith.constant 0 : index
    %c0_40 = arith.constant 0 : index
    %65 = vector.load %arg14[%c0_39, %c0_40] : memref<128x128xf32, #tpu.memory_space<vmem>>, vector<128x128xf32>
    tpu.vector_store %arg14[%c0_39, %c0_40], %64 {strides = array<i32>} : memref<128x128xf32, #tpu.memory_space<vmem>>, vector<128x128xf32>,
    %c0_41 = arith.constant 0 : index
    %c0_42 = arith.constant 0 : index
    %66 = vector.load %arg12[%c0_41, %c0_42] : memref<128x128xf32, #tpu.memory_space<vmem>>, vector<128x128xf32>
    %cst_43 = arith.constant dense<0.000000e+00> : vector<128x128xf32>
    %67 = tpu.matmul %64, %66, %cst_43 {dimension_numbers = #tpu.dot_dimension_numbers<[1], [0], [0], [1], [0, 0, 1, 1], [], []>} : vector<128x128xf32>, vector<128x128xf32>, vector<128x128xf32> -> vector<128x128xf32>
    %c0_44 = arith.constant 0 : index
    %c0_45 = arith.constant 0 : index
    %68 = vector.load %arg13[%c0_44, %c0_45] : memref<1x128xf32, #tpu.memory_space<vmem>>, vector<1x128xf32>
    %69 = vector.broadcast %68 : vector<1x128xf32> to vector<128x128xf32>
    %70 = arith.addf %67, %69 : vector<128x128xf32>
    %71 = math.tanh %70 : vector<128x128xf32>
    %cst_46 = arith.constant dense<0.000000e+00> : vector<128xf32>
    %72 = vector.multi_reduction <add>, %71, %cst_46 [0] : vector<128x128xf32> to vector<128xf32>
    %73 = vector.shape_cast %72 : vector<128xf32> to vector<1x128xf32>
    %74 = vector.shape_cast %73 : vector<1x128xf32> to vector<1x1x128xf32>
    %75 = vector.shape_cast %74 : vector<1x1x128xf32> to vector<1x1x128xf32>
    %76 = vector.broadcast %75 : vector<1x1x128xf32> to vector<1x8x128xf32>
    %c0_47 = arith.constant 0 : index
    %c0_48 = arith.constant 0 : index
    %c0_49 = arith.constant 0 : index
    %77 = vector.load %arg15[%c0_47, %c0_48, %c0_49] : memref<1x8x128xf32, #tpu.memory_space<vmem>>, vector<1x8x128xf32>
    tpu.vector_store %arg15[%c0_47, %c0_48, %c0_49], %76 {strides = array<i32>} : memref<1x8x128xf32, #tpu.memory_space<vmem>>, vector<1x8x128xf32>,
    return
  }
  func.func @transform_0(%arg0: i32) -> (i32, i32) {
    %c0_i32 = arith.constant 0 : i32
    %c0_i32_0 = arith.constant 0 : i32
    %c0_i32_1 = arith.constant 0 : i32
    return %c0_i32, %c0_i32_0 : i32, i32
  }
  func.func @transform_1(%arg0: i32) -> (i32, i32) {
    %c0_i32 = arith.constant 0 : i32
    %c0_i32_0 = arith.constant 0 : i32
    return %arg0, %c0_i32 : i32, i32
  }
  func.func @transform_2(%arg0: i32) -> (i32, i32, i32) {
    %c0_i32 = arith.constant 0 : i32
    %c0_i32_0 = arith.constant 0 : i32
    %c0_i32_1 = arith.constant 0 : i32
    return %c0_i32, %arg0, %c0_i32_0 : i32, i32, i32
  }
  func.func @transform_3(%arg0: i32) -> (i32, i32) {
    %c0_i32 = arith.constant 0 : i32
    %c0_i32_0 = arith.constant 0 : i32
    return %arg0, %c0_i32 : i32, i32
  }
  func.func @transform_4(%arg0: i32) -> (i32, i32, i32) {
    %c0_i32 = arith.constant 0 : i32
    %c0_i32_0 = arith.constant 0 : i32
    %c0_i32_1 = arith.constant 0 : i32
    %c0_i32_2 = arith.constant 0 : i32
    return %c0_i32, %c0_i32_0, %c0_i32_1 : i32, i32, i32
  }
  func.func @transform_5(%arg0: i32) -> (i32, i32) {
    %c0_i32 = arith.constant 0 : i32
    %c0_i32_0 = arith.constant 0 : i32
    %c0_i32_1 = arith.constant 0 : i32
    return %c0_i32, %c0_i32_0 : i32, i32
  }
  func.func @transform_6(%arg0: i32) -> (i32, i32) {
    %c0_i32 = arith.constant 0 : i32
    %c0_i32_0 = arith.constant 0 : i32
    %c0_i32_1 = arith.constant 0 : i32
    return %c0_i32, %c0_i32_0 : i32, i32
  }
  func.func @transform_7(%arg0: i32) -> (i32, i32) {
    %c0_i32 = arith.constant 0 : i32
    %c0_i32_0 = arith.constant 0 : i32
    %c0_i32_1 = arith.constant 0 : i32
    return %c0_i32, %c0_i32_0 : i32, i32
  }
  func.func @transform_8(%arg0: i32) -> (i32, i32) {
    %c0_i32 = arith.constant 0 : i32
    %c0_i32_0 = arith.constant 0 : i32
    %c0_i32_1 = arith.constant 0 : i32
    return %c0_i32, %c0_i32_0 : i32, i32
  }
  func.func @transform_9(%arg0: i32) -> (i32, i32) {
    %c0_i32 = arith.constant 0 : i32
    %c0_i32_0 = arith.constant 0 : i32
    %c0_i32_1 = arith.constant 0 : i32
    return %c0_i32, %c0_i32_0 : i32, i32
  }
  func.func @transform_10(%arg0: i32) -> (i32, i32) {
    %c0_i32 = arith.constant 0 : i32
    %c0_i32_0 = arith.constant 0 : i32
    %c0_i32_1 = arith.constant 0 : i32
    return %c0_i32, %c0_i32_0 : i32, i32
  }
  func.func @transform_11(%arg0: i32) -> (i32, i32) {
    %c0_i32 = arith.constant 0 : i32
    %c0_i32_0 = arith.constant 0 : i32
    %c0_i32_1 = arith.constant 0 : i32
    return %c0_i32, %c0_i32_0 : i32, i32
  }
  func.func @transform_12(%arg0: i32) -> (i32, i32) {
    %c0_i32 = arith.constant 0 : i32
    %c0_i32_0 = arith.constant 0 : i32
    %c0_i32_1 = arith.constant 0 : i32
    return %c0_i32, %c0_i32_0 : i32, i32
  }
  func.func @transform_13(%arg0: i32) -> (i32, i32) {
    %c0_i32 = arith.constant 0 : i32
    %c0_i32_0 = arith.constant 0 : i32
    return %arg0, %c0_i32 : i32, i32
  }
  func.func @transform_14(%arg0: i32) -> (i32, i32, i32) {
    %c0_i32 = arith.constant 0 : i32
    %c0_i32_0 = arith.constant 0 : i32
    %c0_i32_1 = arith.constant 0 : i32
    return %arg0, %c0_i32, %c0_i32_0 : i32, i32, i32
  }
}

</mosaic_0001>

<bundles_post_ra>
// kernel: tpu_custom_call.1
= control target key start
LH: loop header
LB: loop body
LE: loop exit
PB: predicated region body
PF: predicated region fallthrough
CT: control target
= control target key end

     0   :  { %s6825_s0 = inlined_call_operand.vmem [shape: f32[256,16], index: 0, kind: input, shape index: {}]   ;;  %s6826_s1 = inlined_call_operand.vmem [shape: f32[256,16], index: 1, kind: input, shape index: {}]   ;;  %s6827_s2 = inlined_call_operand.hbm [shape: f32[4,256,256], index: 2, kind: input, shape index: {}]   ;;  %s6828_s3 = inlined_call_operand.hbm [shape: f32[256,128], index: 3, kind: input, shape index: {}]   ;;  %s6829_s4 = inlined_call_operand.vmem [shape: f32[4,16,32], index: 4, kind: input, shape index: {}]   ;;  %s6830_s5 = inlined_call_operand.hbm [shape: f32[16,128], index: 5, kind: input, shape index: {}]   ;;  %s6831_s6 = inlined_call_operand.vmem [shape: f32[1,128], index: 6, kind: input, shape index: {}]   ;;  %s6832_s7 = inlined_call_operand.vmem [shape: f32[128,384], index: 7, kind: input, shape index: {}]   ;;  %s6833_s8 = inlined_call_operand.hbm [shape: f32[128,384], index: 8, kind: input, shape index: {}]   ;;  %s6834_s9 = inlined_call_operand.vmem [shape: f32[1,384], index: 9, kind: input, shape index: {}]   ;;  %s6835_s10 = inlined_call_operand.vmem [shape: f32[1,384], index: 10, kind: input, shape index: {}]   ;;  %s6836_s11 = inlined_call_operand.vmem [shape: f32[128,128], index: 11, kind: input, shape index: {}]   ;;  %s6837_s12 = inlined_call_operand.vmem [shape: f32[1,128], index: 12, kind: input, shape index: {}]   ;;  %s6838_s13 = inlined_call_operand.hbm [shape: f32[256,128], index: 13, kind: output, shape index: {0}]   ;;  %s6839_s14 = inlined_call_operand.hbm [shape: f32[2,8,128], index: 14, kind: output, shape index: {1}]  }
   0x1   :  { %6854 = sst [smem:[#allocation33_spill]] %s6827_s2 }
   0x2   :  { %6855 = sst [smem:[#allocation34_spill]] %s6830_s5 }
   0x3   :  { %6856 = sst [smem:[#allocation35_spill]] %s6833_s8 }
   0x4   :  { %6857 = sst [smem:[#allocation36_spill]] %s6835_s10 }
   0x5   :  { %6858 = sst [smem:[#allocation37_spill]] %s6837_s12 }
   0x6   :  { %6859 = sst [smem:[#allocation38_spill]] %s6838_s13 }
   0x7   :  { %6860 = sst [smem:[#allocation39_spill]] %s6839_s14 }
   0x8   :  { %20 = vsyncpa [#allocation3], 0 }
   0x9   :  { %22 = vsyncpa [#allocation3 + $0x1], 0 }
   0xa   :  { %23 = vsyncpa [#allocation6], 0 }
   0xb   :  { %25 = vsyncpa [#allocation6 + $0x1], 0 }
   0xc   :  { %26 = vsyncpa [#allocation9], 0 }
   0xd   :  { %27 = vsyncpa [#allocation4], 0 }
   0xe   :  { %29 = vsyncpa [#allocation4 + $0x1], 0 }
   0xf   :  { %30 = vsyncpa [#allocation12], 0 }
  0x10   :  { %32 = vsyncpa [#allocation12 + $0x1], 0  ;;  %s5178_s29 = smov 0   ;;  %s5180_s30 = smov 0  }
  0x11   :  { %s5182_s15 = smov 0   ;;  %s5184_s16 = smov 0  }
  0x12 LB: > { %6861 = sst [smem:[#allocation22_spill]] %s5067_s29  ;;  %s5199_s17 = sadd.s32 4294967295, %s5079_s16   ;;  %s5079_s16 = sphi %s5184_s16, %s6902_s16   ;;  %s5075_s15 = sphi %s5182_s15, %s6904_s15   ;;  %s5071_s30 = sphi %s5180_s30, %s6906_s30   ;;  %s5067_s29 = sphi %s5178_s29, %s6905_s29  }
  0x13   : > { %6862 = sst [smem:[#allocation23_spill]] %s5075_s15  ;;  %s3946_s18 = sadd.s32 4294967294, %s5079_s16  }
  0x14   : > { %s5203_s19 = sadd.s32 1, %s5079_s16   ;;  %s92_s20 = sadd.s32 1, %s5075_s15 }
  0x15   : > { %6863 = sst [smem:[#allocation24_spill]] %s5203_s19  ;;  %s89_s21 = ssub.s32 %s5079_s16, %s5203_s19 }
  0x16   : > { %p99_p0 = scmp.ne.s32.totalorder %s5075_s15, %s5071_s30  ;;  %p90_p1 = scmp.eq.s32.totalorder %s89_s21, 0 }
  0x17   : > { %p100_p2 = scmp.eq.s32.totalorder %s5079_s16, 0  ;;  %p105_p3 = scmp.ne.s32.totalorder %s5071_s30, %s5067_s29 }
  0x18   : > { %p6845_p4 = scmp.eq.s32.totalorder %s5199_s17, 0  ;;  %p344_p7 = scmp.eq.s32.totalorder %s5199_s17, 1 }
  0x19   : > { %s5215_s22 = scalar_select %p90_p1, %s5075_s15, %s92_s20  }
  0x1a   : > { %p5217_p5 = por %p100_p2, %p99_p0  ;;  %p5223_p6 = por %p6845_p4, %p105_p3 }
  0x1b   : > { %6864 = sst [smem:[#allocation25_spill]] %s5215_s22  ;;  %p350_p8 = scmp.eq.s32.totalorder %s3946_s18, 1 }
  0x1c   : > { %s6866_s24 = scalar_select %p5223_p6, 1, 0 }
  0x1d   : > { %p3947_p9 = scmp.ge.s32.totalorder %s5079_s16, 1  ;;  %p383_p10 = scmp.lt.s32.totalorder %s5079_s16, 3 }
  0x1e   : > { %p5230_p11 = por %p344_p7, %p99_p0  ;;  %p5234_p12 = por %p350_p8, %p105_p3 }
  0x1f   : > { %p5238_p13 = pnand %p3947_p9, %p383_p10  ;;  %s5081_s28 = smov [#allocation7]  }
  0x20   : > { %s6867_s25 = scalar_select %p5230_p11, 1, 0 }
  0x21   : > { %s6869_s26 = scalar_select %p5234_p12, 1, 0 }
  0x22   : > { %6868 = sst [smem:[#allocation26_spill]] %s6867_s25  ;;  %p4617_p1 = pneg %p5238_p13 }
  0x23   : > { %6870 = sst [smem:[#allocation27_spill]] %s6869_s26  ;;  %s401_s20 = sshll.u32 %s5081_s28, 4  ;;  %s402_s20 = int_to_ptr.vmem [resolvable:$true] %s401_s20 }
  0x24   : > { %p5246_p2 = pnand %p4617_p1, %p6845_p4  ;;  %s5082_s21 = smov [#allocation8]  }
  0x25   : > { %s420_s22 = sshll.u32 %s5082_s21, 4  ;;  %s4906_s19 = scalar_lea.vmem %s402_s20, 256  ;;  %s421_s22 = int_to_ptr.vmem [resolvable:$true] %s420_s22 }
  0x26   : > { %p4897_p0 = pneg %p5246_p2  ;;  %p4907_p3 = scmp.ne.s32.totalorder %s402_s20, %s4906_s19 }
  0x27   : > { %p4914_p9 = scmp.lt.s32.totalorder %s402_s20, %s402_s20  ;;  %p4915_p10 = scmp.lt.s32.totalorder %s4906_s19, %s4906_s19 }
  0x28   : > { %p4909_p7 = pnand %p4907_p3, %p4897_p0 }
  0x29   : > { %p4916_p12 = por %p4915_p10, %p4914_p9 }
  0x2a   : > { %p4910_p8 = pneg %p4909_p7 }
  0x2c   : > { %p4917_p1 = pnand %p4916_p12, %p4910_p8 }
  0x2e   : > { %4920 = shalt.err (!%p4917_p1)
}
  0x2f   : > { %s5083_s28 = smov 128   ;;  %s5084_s26 = smov 8  }
  0x30   : > { %s6873_s5 = sld [smem:[#allocation34_spill]]  ;;  %s4932_s14 = scalar_lea.vmem %s421_s22, 6144 }
  0x31   : > { %p4933_p4 = scmp.ne.s32.totalorder %s421_s22, %s4932_s14  ;;  %p4940_p11 = scmp.lt.s32.totalorder %s421_s22, %s421_s22 }
  0x32   : > { %p4941_p6 = scmp.lt.s32.totalorder %s4932_s14, %s4932_s14 }
  0x33   : > { %p4935_p3 = pnand %p4933_p4, %p4897_p0 }
  0x34   : > { %p4942_p9 = por %p4941_p6, %p4940_p11 }
  0x35   : > { %p4936_p7 = pneg %p4935_p3 }
  0x36   : > { %4620 = dma.hbm_to_vmem [thread:$0]  (!%p5246_p2), %s6873_s5, 256, %s402_s20, [#allocation6], %s5083_s28, %s5083_s28, %s5084_s26  }
  0x37   : > { %p4943_p12 = pnand %p4942_p9, %p4936_p7 }
  0x39   : > { %4946 = shalt.err (!%p4943_p12)
}
  0x3a   : > { %s5085_s19 = smov 384   ;;  %s5086_s12 = smov 24  }
  0x3b   : > { %s6874_s8 = sld [smem:[#allocation35_spill]]  ;;  %p6852_p8 = scmp.ge.s32.totalorder %s5079_s16, 2 }
  0x3d   : > { %442 = sbr.rel (%p6852_p8) target bundleno = 104 (0x68), region = 56 }
  0x41   : > { %4623 = dma.hbm_to_vmem [thread:$0]  (!%p5246_p2), %s6874_s8, 6144, %s421_s22, [#allocation9], %s5085_s19, %s5085_s19, %s5086_s12  }
  0x42   : > { %s455_s14 = sand.u32 1, %s5075_s15   ;;  %s4097_s26 = sshll.u32 %s5079_s16, 12 }
  0x43   : > { %s3951_s29 = sshll.u32 %s455_s14, 10  ;;  %s6875_s2 = sld [smem:[#allocation33_spill]] }
  0x44   : > { %s4598_s20 = scalar_select %p5217_p5, [#allocation0], [#allocation15] }
  0x45   : > { %s459_s18 = scalar_lea.vmem [#allocation2], %s3951_s29  ;;  %s5087_s21 = smov 8192  }
  0x46   : > { %s471_s25 = sld [smem:[%s4598_s20]]   ;;  %s479_s28 = sshll.u32 %s459_s18, 4  ;;  %s480_s28 = int_to_ptr.vmem [resolvable:$true] %s479_s28 }
  0x47   : > { %4599 = sst [smem:[#allocation14]] (%p5217_p5), %s5087_s21  ;;  %s5088_s19 = smov 4096  }
  0x48   : > { %4600 = sst [smem:[#allocation14 + $0x1]] (%p5217_p5), %s5088_s19  ;;  %s5089_s5 = smov 16  }
  0x49   : > { %s466_s22 = scalar_lea.hbm %s6875_s2, %s4097_s26  ;;  %4601 = sst [smem:[#allocation14 + $0x2]] (%p5217_p5), %s5089_s5 }
  0x4a   : > { %s5090_s8 = smov 256   ;;  %4604 = sst [smem:[#allocation14 + $0x5]] (%p5217_p5), %s5089_s5 }
  0x4b   : > { %4602 = sst [smem:[#allocation14 + $0x3]] (%p5217_p5), %s5090_s8  ;;  %s456_s20 = scalar_lea.sflag [#allocation3], %s455_s14 }
  0x4c   : > { %4603 = sst [smem:[#allocation14 + $0x4]] (%p5217_p5), %s5090_s8  ;;  %s3955_s26 = sshll.u32 %s471_s25, 26 }
  0x4d   : > { %s3956_s29 = sadd.s32 134217728, %s3955_s26  ;;  %s5091_s13 = smov 131072  }
  0x4e   : > { %4605 = dma.general (%p5217_p5), %s466_s22, 16384, %s480_s28, %s456_s20, %s5091_s13, [#allocation14], %s3956_s29, 0  }
  0x4f   : > { %s502_s12 = sand.u32 1, %s5079_s16   ;;  %s3957_s18 = sshll.u32 %s455_s14, 7 }
  0x50   : > { %s4098_s21 = sshll.u32 %s5079_s16, 11  ;;  %s506_s19 = scalar_lea.vmem [#allocation5], %s3957_s18 }
  0x51   : > { %s513_s2 = sshll.u32 %s506_s19, 4  ;;  %s5297_s8 = scalar_lea.hbm %s6828_s3, %s4098_s21  ;;  %s5299_s2 = int_to_ptr.vmem [resolvable:$true] %s513_s2 }
  0x52   : > { %s5301_s5 = scalar_lea.sflag [#allocation6], %s502_s12  ;;  %s4947_s22 = scalar_lea.hbm %s5297_s8, 2048 }
  0x53   : > { %p4948_p4 = scmp.ne.s32.totalorder %s5297_s8, %s4947_s22  ;;  %s4951_s28 = scalar_lea.hbm %s6828_s3, 4096 }
  0x54   : > { %p4952_p2 = scmp.lt.s32.totalorder %s5297_s8, %s6828_s3  ;;  %p4953_p0 = scmp.lt.s32.totalorder %s4951_s28, %s4947_s22 }
  0x55   : > { %p4949_p6 = pnand %p4948_p4, %p5217_p5 }
  0x56   : > { %p4954_p10 = por %p4953_p0, %p4952_p2 }
  0x57   : > { %p4950_p11 = pneg %p4949_p6 }
  0x59   : > { %p4955_p1 = pnand %p4954_p10, %p4950_p11 }
  0x5b   : > { %4958 = shalt.err (!%p4955_p1)
}
  0x5c   : > { %s4959_s15 = scalar_lea.vmem %s5299_s2, 2048  ;;  %s5092_s29 = smov [#allocation5]  }
  0x5d   : > { %p4960_p3 = scmp.ne.s32.totalorder %s5299_s2, %s4959_s15  ;;  %s4963_s20 = sshll.u32 %s5092_s29, 4  ;;  %s4964_s20 = int_to_ptr.vmem [resolvable:$false] %s4963_s20 }
  0x5e   : > { %s4965_s13 = scalar_lea.vmem %s4964_s20, 4096  ;;  %p4966_p12 = scmp.lt.s32.totalorder %s5299_s2, %s4964_s20 }
  0x5f   : > { %p4961_p7 = pnand %p4960_p3, %p5217_p5  ;;  %p4967_p4 = scmp.lt.s32.totalorder %s4965_s13, %s4959_s15 }
  0x61   : > { %p4962_p9 = pneg %p4961_p7  ;;  %p4968_p6 = por %p4967_p4, %p4966_p12 }
  0x63   : > { %p4969_p8 = pnand %p4968_p6, %p4962_p9 }
  0x65   : > { %4972 = shalt.err (!%p4969_p8)
}
  0x66   : > { %s5093_s12 = smov 128   ;;  %s5094_s18 = smov 8  }
  0x67   : > { %4606 = dma.hbm_to_vmem [thread:$0]  (%p5217_p5), %s5297_s8, 2048, %s5299_s2, %s5301_s5, %s5093_s12, %s5093_s12, %s5094_s18  }
  0x68 PF: > { %525 = sbr.rel (%p5238_p13) target bundleno = 1552 (0x610), region = 72 }
  0x6d   : > { %s5327_s21 = sand.u32 1, %s5071_s30   ;;  %p6876_p8 = scmp.ne.s32.totalorder %s6866_s24, 0 }
  0x6e   : > { %s3961_s19 = sshll.u32 %s5327_s21, 10  ;;  %s528_s22 = scalar_lea.sflag [#allocation3], %s5327_s21 }
  0x6f   : > { %s5331_s14 = scalar_lea.vmem [#allocation2], %s3961_s19 }
  0x70   : > { %5042 = dma.done.wait (%p6876_p8), %s528_s22, 16384  }
  0x71   : > { %5044 = vsyncadd (%p6876_p8), %s528_s22, 4294950912  ;;  %s536_s2 = sand.u32 1, %s5199_s17   ;;  %s3962_s23 = sshll.u32 %s5327_s21, 7 }
  0x72   : > { %s537_s27 = scalar_lea.sflag [#allocation6], %s536_s2  ;;  %s5341_s8 = scalar_lea.vmem [#allocation5], %s3962_s23 }
  0x73   : > { %5046 = dma.done.wait (%p6876_p8), %s537_s27, 2048  }
  0x74   : > { %5048 = vsyncadd (%p6876_p8), %s537_s27, 4294965248  ;;  %p6877_p5 = scmp.eq.s32.totalorder %s5199_s17, 0 }
  0x76   : > { %5050 = dma.done.wait (%p6877_p5), [#allocation6], 256   ;;  %p6878_p13 = pmov %p6877_p5 }
  0x77   : > { %p6879_p11 = pmov %p6877_p5 }
  0x78   : > { %5052 = vsyncadd (%p6878_p13), [#allocation6], 4294967040 }
  0x79   : > { %5054 = dma.done.wait (%p6879_p11), [#allocation9], 6144   ;;  %p6880_p2 = pmov %p6877_p5 }
  0x7a   : > { %v5095_v0 = vmov 0.0   ;;  %v632_v1 = vld [vmem:[%s6825_s0 + $0x78] sm:$0xff]  ;;  %v631_v2 = vld [vmem:[%s6825_s0 + $0x70] sm:$0xff]  ;;  %v630_v3 = vld [vmem:[%s6825_s0 + $0x68] sm:$0xff]  ;;  %vm1164_vm0 = vcmask 130048   ;;  %s3967_s27 = sshll.u32 %s5199_s17, 4 }
  0x7b   : > { %5056 = vsyncadd (%p6880_p2), [#allocation9], 4294961152  ;;  %777 = vmatprep.subr.mxu0 %v5095_v0  ;;  %v629_v4 = vld [vmem:[%s6825_s0 + $0x60] sm:$0xff]  ;;  %v628_v5 = vld [vmem:[%s6825_s0 + $0x58] sm:$0xff]  ;;  %p609_p0 = scmp.lt.s32.totalorder %s3967_s27, 31  ;;  %s5096_s26 = smov 32  }
  0x7c   : > { %778 = vmatpush1.msra.mxu0 %v632_v1  ;;  %v627_v6 = vld [vmem:[%s6825_s0 + $0x50] sm:$0xff]  ;;  %v626_v7 = vld [vmem:[%s6825_s0 + $0x48] sm:$0xff]  ;;  %v625_v9 = vld [vmem:[%s6825_s0 + $0x40] sm:$0xff]  ;;  %s5097_s10 = smov 64   ;;  %vm2138_vm1 = vcmask 261120   ;;  %vm2155_vm2 = vcmask 523264  }
  0x7d   : > { %779 = vmatprep.subr.mxu0 %v5095_v0  ;;  %v650_v8 = vld [vmem:[%s5331_s14 + $0x8] sm:$0xff]  ;;  %v624_v10 = vld [vmem:[%s6825_s0 + $0x38] sm:$0xff]  ;;  %v623_v11 = vld [vmem:[%s6825_s0 + $0x30] sm:$0xff]  ;;  %s6908_s27 = smov (!%p609_p0, %s3967_s27), 31  ;;  %vm2172_vm3 = vcmask 785408   ;;  %s4099_s19 = sshll.u32 %s5199_s17, 11 }
  0x7e   : > { %780 = vmatpush1.msra.mxu0 %v631_v2  ;;  %841 = vmatprep.mubr.f32.mxu0 %v650_v8  ;;  %v622_v12 = vld [vmem:[%s6825_s0 + $0x28] sm:$0xff]  ;;  %v621_v13 = vld [vmem:[%s6825_s0 + $0x20] sm:$0xff]  ;;  %v620_v14 = vld [vmem:[%s6825_s0 + $0x18] sm:$0xff]  ;;  %s3968_s5 = sshll.u32 %s6908_s27, 3  ;;  %s6894_s27 = sld [smem:[#allocation38_spill]] }
  0x7f   : > { %781 = vmatprep.subr.mxu0 %v5095_v0  ;;  %v619_v15 = vld [vmem:[%s6825_s0 + $0x10] sm:$0xff]  ;;  %v618_v16 = vld [vmem:[%s6825_s0 + $0x8] sm:$0xff]  ;;  %v617_v17 = vld [vmem:[%s6825_s0] sm:$0xff]  ;;  %s5733_s28 = scalar_lea.vmem %s6826_s1, %s3968_s5  ;;  %s3756_s24 = scalar_lea.sflag [#allocation4], %s5327_s21 }
  0x80   : > { %782 = vmatpush1.msra.mxu0 %v630_v3  ;;  %v648_v18 = vld [vmem:[%s6825_s0 + $0xf8] sm:$0xff]  ;;  %v647_v19 = vld [vmem:[%s6825_s0 + $0xf0] sm:$0xff]  ;;  %v646_v20 = vld [vmem:[%s6825_s0 + $0xe8] sm:$0xff] }
  0x81   : > { %783 = vmatprep.subr.mxu0 %v5095_v0  ;;  %v645_v21 = vld [vmem:[%s6825_s0 + $0xe0] sm:$0xff]  ;;  %v644_v22 = vld [vmem:[%s6825_s0 + $0xd8] sm:$0xff]  ;;  %v643_v23 = vld [vmem:[%s6825_s0 + $0xd0] sm:$0xff] }
  0x82   : > { %784 = vmatpush1.msra.mxu0 %v629_v4  ;;  %v642_v24 = vld [vmem:[%s6825_s0 + $0xc8] sm:$0xff]  ;;  %v641_v25 = vld [vmem:[%s6825_s0 + $0xc0] sm:$0xff]  ;;  %v640_v26 = vld [vmem:[%s6825_s0 + $0xb8] sm:$0xff] }
  0x83   : > { %785 = vmatprep.subr.mxu0 %v5095_v0  ;;  %v639_v27 = vld [vmem:[%s6825_s0 + $0xb0] sm:$0xff]  ;;  %v638_v28 = vld [vmem:[%s6825_s0 + $0xa8] sm:$0xff]  ;;  %v637_v29 = vld [vmem:[%s6825_s0 + $0xa0] sm:$0xff] }
  0x84   : > { %786 = vmatpush1.msra.mxu0 %v628_v5  ;;  %v636_v30 = vld [vmem:[%s6825_s0 + $0x98] sm:$0xff]  ;;  %v635_v31 = vld [vmem:[%s6825_s0 + $0x90] sm:$0xff]  ;;  %v634_v32 = vld [vmem:[%s6825_s0 + $0x88] sm:$0xff]  ;;  %s6758_s5 = scalar_lea.hbm %s6894_s27, %s4099_s19 }
  0x85   : > { %787 = vmatprep.subr.mxu0 %v5095_v0  ;;  %v633_v33 = vld [vmem:[%s6825_s0 + $0x80] sm:$0xff]  ;;  %v652_v35 = vld [vmem:[%s5331_s14 + $0x18] sm:$0xff]  ;;  %v651_v36 = vld [vmem:[%s5331_s14 + $0x10] sm:$0xff] }
  0x86   : > { %788 = vmatpush1.msra.mxu0 %v627_v6  ;;  %v649_v34 = vld [vmem:[%s5331_s14] sm:$0xff]  ;;  %v654_v37 = vld [vmem:[%s5331_s14 + $0x28] sm:$0xff]  ;;  %v656_v39 = vld [vmem:[%s5331_s14 + $0x38] sm:$0xff] }
  0x87   : > { %789 = vmatprep.subr.mxu0 %v5095_v0  ;;  %v653_v38 = vld [vmem:[%s5331_s14 + $0x20] sm:$0xff]  ;;  %v655_v40 = vld [vmem:[%s5331_s14 + $0x30] sm:$0xff]  ;;  %v658_v41 = vld [vmem:[%s5331_s14 + $0x48] sm:$0xff] }
  0x88   : > { %790 = vmatpush1.msra.mxu0 %v626_v7  ;;  %v657_v42 = vld [vmem:[%s5331_s14 + $0x40] sm:$0xff]  ;;  %v660_v43 = vld [vmem:[%s5331_s14 + $0x58] sm:$0xff]  ;;  %v659_v44 = vld [vmem:[%s5331_s14 + $0x50] sm:$0xff] }
  0x89   : > { %791 = vmatprep.subr.mxu0 %v5095_v0  ;;  %v662_v45 = vld [vmem:[%s5331_s14 + $0x68] sm:$0xff]  ;;  %v661_v46 = vld [vmem:[%s5331_s14 + $0x60] sm:$0xff]  ;;  %v664_v47 = vld [vmem:[%s5331_s14 + $0x78] sm:$0xff] }
  0x8a   : > { %792 = vmatpush1.msra.mxu0 %v625_v9  ;;  %v663_v48 = vld [vmem:[%s5331_s14 + $0x70] sm:$0xff]  ;;  %v666_v49 = vld [vmem:[%s5331_s14 + $0x88] sm:$0xff]  ;;  %v665_v50 = vld [vmem:[%s5331_s14 + $0x80] sm:$0xff] }
  0x8b   : > { %793 = vmatprep.subr.mxu0 %v5095_v0  ;;  %v668_v51 = vld [vmem:[%s5331_s14 + $0x98] sm:$0xff]  ;;  %v667_v52 = vld [vmem:[%s5331_s14 + $0x90] sm:$0xff]  ;;  %v670_v53 = vld [vmem:[%s5331_s14 + $0xa8] sm:$0xff] }
  0x8c   : > { %794 = vmatpush1.msra.mxu0 %v624_v10  ;;  %v669_v54 = vld [vmem:[%s5331_s14 + $0xa0] sm:$0xff]  ;;  %v672_v55 = vld [vmem:[%s5331_s14 + $0xb8] sm:$0xff]  ;;  %v671_v56 = vld [vmem:[%s5331_s14 + $0xb0] sm:$0xff] }
  0x8d   : > { %795 = vmatprep.subr.mxu0 %v5095_v0  ;;  %v674_v57 = vld [vmem:[%s5331_s14 + $0xc8] sm:$0xff]  ;;  %v673_v58 = vld [vmem:[%s5331_s14 + $0xc0] sm:$0xff]  ;;  %v676_v59 = vld [vmem:[%s5331_s14 + $0xd8] sm:$0xff] }
  0x8e   : > { %796 = vmatpush1.msra.mxu0 %v623_v11  ;;  %v675_v60 = vld [vmem:[%s5331_s14 + $0xd0] sm:$0xff]  ;;  %v678_v61 = vld [vmem:[%s5331_s14 + $0xe8] sm:$0xff]  ;;  %v677_v62 = vld [vmem:[%s5331_s14 + $0xe0] sm:$0xff] }
  0x8f   : > { %797 = vmatprep.subr.mxu0 %v5095_v0  ;;  %v680_v63 = vld [vmem:[%s5331_s14 + $0xf8] sm:$0xff]  ;;  %v679_v1 = vld [vmem:[%s5331_s14 + $0xf0] sm:$0xff]  ;;  %v682_v2 = vld [vmem:[%s5331_s14 + $0x108] sm:$0xff] }
  0x90   : > { %798 = vmatpush1.msra.mxu0 %v622_v12  ;;  %v681_v3 = vld [vmem:[%s5331_s14 + $0x100] sm:$0xff]  ;;  %v684_v4 = vld [vmem:[%s5331_s14 + $0x118] sm:$0xff]  ;;  %v1163_v5 = vld [vmem:[%s6829_s4 + $0x8] sm:$0xff] }
  0x91   : > { %799 = vmatprep.subr.mxu0 %v5095_v0  ;;  %v683_v6 = vld [vmem:[%s5331_s14 + $0x110] sm:$0xff]  ;;  %4286 = vmatprep.subr.mxu1 %v1163_v5  ;;  %v686_v7 = vld [vmem:[%s5331_s14 + $0x128] sm:$0xff]  ;;  %v1162_v8 = vld [vmem:[%s6829_s4] sm:$0xff] }
  0x92   : > { %800 = vmatpush1.msra.mxu0 %v621_v13  ;;  %4287 = vmatpush3.msra.mxu1 %v1163_v5  ;;  %v685_v9 = vld [vmem:[%s5331_s14 + $0x120] sm:$0xff]  ;;  %v688_v10 = vld [vmem:[%s5331_s14 + $0x138] sm:$0xff]  ;;  %v687_v11 = vld [vmem:[%s5331_s14 + $0x130] sm:$0xff] }
  0x93   : > { %801 = vmatprep.subr.mxu0 %v5095_v0  ;;  %4288 = vmatprep.subr.mxu1 %v1162_v8  ;;  %v690_v12 = vld [vmem:[%s5331_s14 + $0x148] sm:$0xff]  ;;  %v689_v13 = vld [vmem:[%s5331_s14 + $0x140] sm:$0xff]  ;;  %v743_v5 = vld [vmem:[%s5331_s14 + $0x2f0] sm:$0xff] }
  0x94   : > { %802 = vmatpush1.msra.mxu0 %v620_v14  ;;  %4289 = vmatpush3.msra.mxu1 %v1162_v8  ;;  %v692_v14 = vld [vmem:[%s5331_s14 + $0x158] sm:$0xff] }
  0x95   : > { %803 = vmatprep.subr.mxu0 %v5095_v0  ;;  %v748_v8 = vld [vmem:[%s5331_s14 + $0x318] sm:$0xff] }
  0x96   : > { %804 = vmatpush1.msra.mxu0 %v619_v15  ;;  %v691_v15 = vld [vmem:[%s5331_s14 + $0x150] sm:$0xff] }
  0x97   : > { %805 = vmatprep.subr.mxu0 %v5095_v0 }
  0x98   : > { %806 = vmatpush1.msra.mxu0 %v618_v16  ;;  %v694_v16 = vld [vmem:[%s5331_s14 + $0x168] sm:$0xff] }
  0x99   : > { %807 = vmatprep.subr.mxu0 %v5095_v0 }
  0x9a   : > { %808 = vmatpush1.msra.mxu0 %v617_v17  ;;  %v693_v17 = vld [vmem:[%s5331_s14 + $0x160] sm:$0xff] }
  0x9b   : > { %809 = vmatprep.subr.mxu0 %v5095_v0 }
  0x9c   : > { %810 = vmatpush2.msra.mxu0 %v648_v18  ;;  %v696_v18 = vld [vmem:[%s5331_s14 + $0x178] sm:$0xff] }
  0x9d   : > { %811 = vmatprep.subr.mxu0 %v5095_v0 }
  0x9e   : > { %812 = vmatpush2.msra.mxu0 %v647_v19  ;;  %v695_v19 = vld [vmem:[%s5331_s14 + $0x170] sm:$0xff] }
  0x9f   : > { %813 = vmatprep.subr.mxu0 %v5095_v0 }
  0xa0   : > { %814 = vmatpush2.msra.mxu0 %v646_v20  ;;  %v698_v20 = vld [vmem:[%s5331_s14 + $0x188] sm:$0xff] }
  0xa1   : > { %815 = vmatprep.subr.mxu0 %v5095_v0 }
  0xa2   : > { %816 = vmatpush2.msra.mxu0 %v645_v21  ;;  %v697_v21 = vld [vmem:[%s5331_s14 + $0x180] sm:$0xff] }
  0xa3   : > { %817 = vmatprep.subr.mxu0 %v5095_v0 }
  0xa4   : > { %818 = vmatpush2.msra.mxu0 %v644_v22  ;;  %v700_v22 = vld [vmem:[%s5331_s14 + $0x198] sm:$0xff] }
  0xa5   : > { %819 = vmatprep.subr.mxu0 %v5095_v0 }
  0xa6   : > { %820 = vmatpush2.msra.mxu0 %v643_v23  ;;  %v699_v23 = vld [vmem:[%s5331_s14 + $0x190] sm:$0xff] }
  0xa7   : > { %821 = vmatprep.subr.mxu0 %v5095_v0 }
  0xa8   : > { %822 = vmatpush2.msra.mxu0 %v642_v24  ;;  %v702_v24 = vld [vmem:[%s5331_s14 + $0x1a8] sm:$0xff] }
  0xa9   : > { %823 = vmatprep.subr.mxu0 %v5095_v0 }
  0xaa   : > { %824 = vmatpush2.msra.mxu0 %v641_v25  ;;  %v701_v25 = vld [vmem:[%s5331_s14 + $0x1a0] sm:$0xff] }
  0xab   : > { %825 = vmatprep.subr.mxu0 %v5095_v0 }
  0xac   : > { %826 = vmatpush2.msra.mxu0 %v640_v26  ;;  %v704_v26 = vld [vmem:[%s5331_s14 + $0x1b8] sm:$0xff] }
  0xad   : > { %827 = vmatprep.subr.mxu0 %v5095_v0 }
  0xae   : > { %828 = vmatpush2.msra.mxu0 %v639_v27  ;;  %v703_v27 = vld [vmem:[%s5331_s14 + $0x1b0] sm:$0xff] }
  0xaf   : > { %829 = vmatprep.subr.mxu0 %v5095_v0 }
  0xb0   : > { %830 = vmatpush2.msra.mxu0 %v638_v28  ;;  %v706_v28 = vld [vmem:[%s5331_s14 + $0x1c8] sm:$0xff] }
  0xb1   : > { %831 = vmatprep.subr.mxu0 %v5095_v0 }
  0xb2   : > { %832 = vmatpush2.msra.mxu0 %v637_v29  ;;  %v705_v29 = vld [vmem:[%s5331_s14 + $0x1c0] sm:$0xff] }
  0xb3   : > { %833 = vmatprep.subr.mxu0 %v5095_v0 }
  0xb4   : > { %834 = vmatpush2.msra.mxu0 %v636_v30  ;;  %v708_v30 = vld [vmem:[%s5331_s14 + $0x1d8] sm:$0xff] }
  0xb5   : > { %835 = vmatprep.subr.mxu0 %v5095_v0 }
  0xb6   : > { %836 = vmatpush2.msra.mxu0 %v635_v31  ;;  %v707_v31 = vld [vmem:[%s5331_s14 + $0x1d0] sm:$0xff] }
  0xb7   : > { %837 = vmatprep.subr.mxu0 %v5095_v0 }
  0xb8   : > { %838 = vmatpush2.msra.mxu0 %v634_v32  ;;  %v710_v32 = vld [vmem:[%s5331_s14 + $0x1e8] sm:$0xff] }
  0xb9   : > { %839 = vmatprep.subr.mxu0 %v5095_v0 }
  0xba   : > { %840 = vmatpush2.msra.mxu0 %v633_v33  ;;  %v709_v33 = vld [vmem:[%s5331_s14 + $0x1e0] sm:$0xff] }
  0xbb   : > { %842 = vmatmul.mubr.f32.vlgmr.msra.gmra.mxu0 %v649_v34  ;;  %v712_v34 = vld [vmem:[%s5331_s14 + $0x1f8] sm:$0xff] }
  0xbc   : > { %846 = vmatprep.mubr.f32.mxu0 %v652_v35  ;;  %v711_v35 = vld [vmem:[%s5331_s14 + $0x1f0] sm:$0xff] }
  0xbf   : > { %847 = vmatmul.mubr.f32.gmra.mxu0 %v651_v36  ;;  %v714_v36 = vld [vmem:[%s5331_s14 + $0x208] sm:$0xff] }
  0xc0   : > { %851 = vmatprep.mubr.f32.mxu0 %v654_v37  ;;  %v713_v37 = vld [vmem:[%s5331_s14 + $0x200] sm:$0xff] }
  0xc3   : > { %852 = vmatmul.mubr.f32.gmra.mxu0 %v653_v38  ;;  %v716_v38 = vld [vmem:[%s5331_s14 + $0x218] sm:$0xff] }
  0xc4   : > { %856 = vmatprep.mubr.f32.mxu0 %v656_v39  ;;  %v5559_v39 = vld [vmem:[%s6829_s4 + $0x18] sm:$0xff] }
  0xc5   : > { %4314 = vmatprep.subr.mxu1 %v5559_v39 }
  0xc7   : > { %857 = vmatmul.mubr.f32.gmra.mxu0 %v655_v40  ;;  %v715_v40 = vld [vmem:[%s5331_s14 + $0x210] sm:$0xff] }
  0xc8   : > { %861 = vmatprep.mubr.f32.mxu0 %v658_v41  ;;  %v718_v41 = vld [vmem:[%s5331_s14 + $0x228] sm:$0xff] }
  0xcb   : > { %862 = vmatmul.mubr.f32.gmra.mxu0 %v657_v42  ;;  %v717_v42 = vld [vmem:[%s5331_s14 + $0x220] sm:$0xff] }
  0xcc   : > { %866 = vmatprep.mubr.f32.mxu0 %v660_v43  ;;  %v720_v43 = vld [vmem:[%s5331_s14 + $0x238] sm:$0xff] }
  0xcf   : > { %867 = vmatmul.mubr.f32.gmra.mxu0 %v659_v44  ;;  %v719_v44 = vld [vmem:[%s5331_s14 + $0x230] sm:$0xff] }
  0xd0   : > { %871 = vmatprep.mubr.f32.mxu0 %v662_v45  ;;  %v722_v45 = vld [vmem:[%s5331_s14 + $0x248] sm:$0xff] }
  0xd3   : > { %872 = vmatmul.mubr.f32.gmra.mxu0 %v661_v46  ;;  %v721_v46 = vld [vmem:[%s5331_s14 + $0x240] sm:$0xff] }
  0xd4   : > { %876 = vmatprep.mubr.f32.mxu0 %v664_v47  ;;  %v724_v47 = vld [vmem:[%s5331_s14 + $0x258] sm:$0xff] }
  0xd7   : > { %877 = vmatmul.mubr.f32.gmra.mxu0 %v663_v48  ;;  %v723_v48 = vld [vmem:[%s5331_s14 + $0x250] sm:$0xff] }
  0xd8   : > { %881 = vmatprep.mubr.f32.mxu0 %v666_v49  ;;  %v726_v49 = vld [vmem:[%s5331_s14 + $0x268] sm:$0xff] }
  0xdb   : > { %882 = vmatmul.mubr.f32.gmra.mxu0 %v665_v50  ;;  %v725_v50 = vld [vmem:[%s5331_s14 + $0x260] sm:$0xff] }
  0xdc   : > { %886 = vmatprep.mubr.f32.mxu0 %v668_v51  ;;  %v728_v51 = vld [vmem:[%s5331_s14 + $0x278] sm:$0xff] }
  0xdf   : > { %887 = vmatmul.mubr.f32.gmra.mxu0 %v667_v52  ;;  %v727_v52 = vld [vmem:[%s5331_s14 + $0x270] sm:$0xff] }
  0xe0   : > { %891 = vmatprep.mubr.f32.mxu0 %v670_v53  ;;  %v730_v53 = vld [vmem:[%s5331_s14 + $0x288] sm:$0xff] }
  0xe3   : > { %892 = vmatmul.mubr.f32.gmra.mxu0 %v669_v54  ;;  %v729_v54 = vld [vmem:[%s5331_s14 + $0x280] sm:$0xff] }
  0xe4   : > { %896 = vmatprep.mubr.f32.mxu0 %v672_v55  ;;  %v732_v55 = vld [vmem:[%s5331_s14 + $0x298] sm:$0xff] }
  0xe7   : > { %897 = vmatmul.mubr.f32.gmra.mxu0 %v671_v56  ;;  %v731_v56 = vld [vmem:[%s5331_s14 + $0x290] sm:$0xff] }
  0xe8   : > { %901 = vmatprep.mubr.f32.mxu0 %v674_v57  ;;  %v734_v57 = vld [vmem:[%s5331_s14 + $0x2a8] sm:$0xff] }
  0xeb   : > { %902 = vmatmul.mubr.f32.gmra.mxu0 %v673_v58  ;;  %v733_v58 = vld [vmem:[%s5331_s14 + $0x2a0] sm:$0xff] }
  0xec   : > { %906 = vmatprep.mubr.f32.mxu0 %v676_v59  ;;  %v736_v59 = vld [vmem:[%s5331_s14 + $0x2b8] sm:$0xff] }
  0xef   : > { %907 = vmatmul.mubr.f32.gmra.mxu0 %v675_v60  ;;  %v735_v60 = vld [vmem:[%s5331_s14 + $0x2b0] sm:$0xff] }
  0xf0   : > { %911 = vmatprep.mubr.f32.mxu0 %v678_v61  ;;  %v738_v61 = vld [vmem:[%s5331_s14 + $0x2c8] sm:$0xff] }
  0xf3   : > { %912 = vmatmul.mubr.f32.gmra.mxu0 %v677_v62  ;;  %v737_v62 = vld [vmem:[%s5331_s14 + $0x2c0] sm:$0xff] }
  0xf4   : > { %916 = vmatprep.mubr.f32.mxu0 %v680_v63  ;;  %v740_v63 = vld [vmem:[%s5331_s14 + $0x2d8] sm:$0xff] }
  0xf7   : > { %917 = vmatmul.mubr.f32.gmra.mxu0 %v679_v1  ;;  %v739_v1 = vld [vmem:[%s5331_s14 + $0x2d0] sm:$0xff] }
  0xf8   : > { %921 = vmatprep.mubr.f32.mxu0 %v682_v2  ;;  %v742_v2 = vld [vmem:[%s5331_s14 + $0x2e8] sm:$0xff] }
  0xfb   : > { %922 = vmatmul.mubr.f32.gmra.mxu0 %v681_v3  ;;  %v741_v3 = vld [vmem:[%s5331_s14 + $0x2e0] sm:$0xff] }
  0xfc   : > { %926 = vmatprep.mubr.f32.mxu0 %v684_v4  ;;  %v744_v4 = vld [vmem:[%s5331_s14 + $0x2f8] sm:$0xff] }
  0xff   : > { %927 = vmatmul.mubr.f32.gmra.mxu0 %v683_v6  ;;  %v746_v6 = vld [vmem:[%s5331_s14 + $0x308] sm:$0xff] }
 0x100   : > { %931 = vmatprep.mubr.f32.mxu0 %v686_v7  ;;  %v745_v7 = vld [vmem:[%s5331_s14 + $0x300] sm:$0xff] }
 0x103   : > { %932 = vmatmul.mubr.f32.gmra.mxu0 %v685_v9 }
 0x104   : > { %936 = vmatprep.mubr.f32.mxu0 %v688_v10  ;;  %v747_v10 = vld [vmem:[%s5331_s14 + $0x310] sm:$0xff] }
 0x107   : > { %937 = vmatmul.mubr.f32.gmra.mxu0 %v687_v11 }
 0x108   : > { %941 = vmatprep.mubr.f32.mxu0 %v690_v12  ;;  %v750_v12 = vld [vmem:[%s5331_s14 + $0x328] sm:$0xff] }
 0x10b   : > { %942 = vmatmul.mubr.f32.gmra.mxu0 %v689_v13 }
 0x10c   : > { %946 = vmatprep.mubr.f32.mxu0 %v692_v14  ;;  %v3985_v14 = vld [vmem:[%s6829_s4 + $0x10] sm:$0xff] }
 0x10f   : > { %947 = vmatmul.mubr.f32.gmra.mxu0 %v691_v15  ;;  %v749_v15 = vld [vmem:[%s5331_s14 + $0x320] sm:$0xff] }
 0x110   : > { %951 = vmatprep.mubr.f32.mxu0 %v694_v16 }
 0x113   : > { %952 = vmatmul.mubr.f32.gmra.mxu0 %v693_v17  ;;  %v752_v17 = vld [vmem:[%s5331_s14 + $0x338] sm:$0xff] }
 0x114   : > { %956 = vmatprep.mubr.f32.mxu0 %v696_v18  ;;  %v5607_v18 = vld [vmem:[%s6829_s4 + $0x28] sm:$0xff] }
 0x117   : > { %957 = vmatmul.mubr.f32.gmra.mxu0 %v695_v19 }
 0x118   : > { %961 = vmatprep.mubr.f32.mxu0 %v698_v20  ;;  %v751_v20 = vld [vmem:[%s5331_s14 + $0x330] sm:$0xff] }
 0x11b   : > { %962 = vmatmul.mubr.f32.gmra.mxu0 %v697_v21 }
 0x11c   : > { %966 = vmatprep.mubr.f32.mxu0 %v700_v22  ;;  %v754_v22 = vld [vmem:[%s5331_s14 + $0x348] sm:$0xff] }
 0x11f   : > { %967 = vmatmul.mubr.f32.gmra.mxu0 %v699_v23 }
 0x120   : > { %971 = vmatprep.mubr.f32.mxu0 %v702_v24  ;;  %v753_v24 = vld [vmem:[%s5331_s14 + $0x340] sm:$0xff] }
 0x123   : > { %972 = vmatmul.mubr.f32.gmra.mxu0 %v701_v25 }
 0x124   : > { %976 = vmatprep.mubr.f32.mxu0 %v704_v26  ;;  %v756_v26 = vld [vmem:[%s5331_s14 + $0x358] sm:$0xff] }
 0x127   : > { %977 = vmatmul.mubr.f32.gmra.mxu0 %v703_v27 }
 0x128   : > { %981 = vmatprep.mubr.f32.mxu0 %v706_v28  ;;  %v755_v28 = vld [vmem:[%s5331_s14 + $0x350] sm:$0xff] }
 0x12b   : > { %982 = vmatmul.mubr.f32.gmra.mxu0 %v705_v29 }
 0x12c   : > { %986 = vmatprep.mubr.f32.mxu0 %v708_v30  ;;  %v758_v30 = vld [vmem:[%s5331_s14 + $0x368] sm:$0xff] }
 0x12f   : > { %987 = vmatmul.mubr.f32.gmra.mxu0 %v707_v31 }
 0x130   : > { %991 = vmatprep.mubr.f32.mxu0 %v710_v32  ;;  %v757_v32 = vld [vmem:[%s5331_s14 + $0x360] sm:$0xff] }
 0x133   : > { %992 = vmatmul.mubr.f32.gmra.mxu0 %v709_v33 }
 0x134   : > { %996 = vmatprep.mubr.f32.mxu0 %v712_v34  ;;  %v760_v34 = vld [vmem:[%s5331_s14 + $0x378] sm:$0xff] }
 0x137   : > { %997 = vmatmul.mubr.f32.gmra.mxu0 %v711_v35 }
 0x138   : > { %1001 = vmatprep.mubr.f32.mxu0 %v714_v36  ;;  %v759_v36 = vld [vmem:[%s5331_s14 + $0x370] sm:$0xff] }
 0x13b   : > { %1002 = vmatmul.mubr.f32.gmra.mxu0 %v713_v37 }
 0x13c   : > { %1006 = vmatprep.mubr.f32.mxu0 %v716_v38  ;;  %v762_v38 = vld [vmem:[%s5331_s14 + $0x388] sm:$0xff] }
 0x13f   : > { %1007 = vmatmul.mubr.f32.gmra.mxu0 %v715_v40  ;;  %v761_v40 = vld [vmem:[%s5331_s14 + $0x380] sm:$0xff] }
 0x140   : > { %1011 = vmatprep.mubr.f32.mxu0 %v718_v41 }
 0x143   : > { %1012 = vmatmul.mubr.f32.gmra.mxu0 %v717_v42  ;;  %v764_v42 = vld [vmem:[%s5331_s14 + $0x398] sm:$0xff] }
 0x144   : > { %1016 = vmatprep.mubr.f32.mxu0 %v720_v43 }
 0x147   : > { %1017 = vmatmul.mubr.f32.gmra.mxu0 %v719_v44  ;;  %v763_v44 = vld [vmem:[%s5331_s14 + $0x390] sm:$0xff] }
 0x148   : > { %1021 = vmatprep.mubr.f32.mxu0 %v722_v45 }
 0x14b   : > { %1022 = vmatmul.mubr.f32.gmra.mxu0 %v721_v46  ;;  %v766_v46 = vld [vmem:[%s5331_s14 + $0x3a8] sm:$0xff] }
 0x14c   : > { %1026 = vmatprep.mubr.f32.mxu0 %v724_v47 }
 0x14f   : > { %1027 = vmatmul.mubr.f32.gmra.mxu0 %v723_v48  ;;  %v765_v48 = vld [vmem:[%s5331_s14 + $0x3a0] sm:$0xff] }
 0x150   : > { %1031 = vmatprep.mubr.f32.mxu0 %v726_v49 }
 0x153   : > { %1032 = vmatmul.mubr.f32.gmra.mxu0 %v725_v50  ;;  %v768_v50 = vld [vmem:[%s5331_s14 + $0x3b8] sm:$0xff] }
 0x154   : > { %1036 = vmatprep.mubr.f32.mxu0 %v728_v51 }
 0x157   : > { %1037 = vmatmul.mubr.f32.gmra.mxu0 %v727_v52  ;;  %v767_v52 = vld [vmem:[%s5331_s14 + $0x3b0] sm:$0xff] }
 0x158   : > { %1041 = vmatprep.mubr.f32.mxu0 %v730_v53 }
 0x15b   : > { %1042 = vmatmul.mubr.f32.gmra.mxu0 %v729_v54  ;;  %v770_v54 = vld [vmem:[%s5331_s14 + $0x3c8] sm:$0xff] }
 0x15c   : > { %1046 = vmatprep.mubr.f32.mxu0 %v732_v55 }
 0x15f   : > { %1047 = vmatmul.mubr.f32.gmra.mxu0 %v731_v56  ;;  %v769_v56 = vld [vmem:[%s5331_s14 + $0x3c0] sm:$0xff] }
 0x160   : > { %1051 = vmatprep.mubr.f32.mxu0 %v734_v57 }
 0x163   : > { %1052 = vmatmul.mubr.f32.gmra.mxu0 %v733_v58  ;;  %v772_v58 = vld [vmem:[%s5331_s14 + $0x3d8] sm:$0xff] }
 0x164   : > { %1056 = vmatprep.mubr.f32.mxu0 %v736_v59 }
 0x167   : > { %1057 = vmatmul.mubr.f32.gmra.mxu0 %v735_v60  ;;  %v771_v60 = vld [vmem:[%s5331_s14 + $0x3d0] sm:$0xff] }
 0x168   : > { %1061 = vmatprep.mubr.f32.mxu0 %v738_v61 }
 0x16b   : > { %1062 = vmatmul.mubr.f32.gmra.mxu0 %v737_v62  ;;  %v774_v62 = vld [vmem:[%s5331_s14 + $0x3e8] sm:$0xff] }
 0x16c   : > { %1066 = vmatprep.mubr.f32.mxu0 %v740_v63 }
 0x16f   : > { %1067 = vmatmul.mubr.f32.gmra.mxu0 %v739_v1  ;;  %v773_v1 = vld [vmem:[%s5331_s14 + $0x3e0] sm:$0xff] }
 0x170   : > { %1071 = vmatprep.mubr.f32.mxu0 %v742_v2 }
 0x173   : > { %1072 = vmatmul.mubr.f32.gmra.mxu0 %v741_v3  ;;  %v776_v3 = vld [vmem:[%s5331_s14 + $0x3f8] sm:$0xff] }
 0x174   : > { %1076 = vmatprep.mubr.f32.mxu0 %v744_v4 }
 0x177   : > { %1077 = vmatmul.mubr.f32.gmra.mxu0 %v743_v5  ;;  %v775_v5 = vld [vmem:[%s5331_s14 + $0x3f0] sm:$0xff]  ;;  %s5098_s14 = smov 96  }
 0x178   : > { %1081 = vmatprep.mubr.f32.mxu0 %v746_v6 }
 0x17b   : > { %v843_v9 = vpop.f32.mrf.mxu0  ;;  %1082 = vmatmul.mubr.f32.gmra.mxu0 %v745_v7 }
 0x17c   : > { %4290 = vmatprep.mubr.msk.f32.mxu1 %vm1164_vm0, %v843_v9  ;;  %1086 = vmatprep.mubr.f32.mxu0 %v748_v8 }
 0x17d   : > { %v845_v11 = vpop.f32.mrf.mxu0 }
 0x17f   : > { %v848_v13 = vpop.f32.mrf.mxu0  ;;  %1087 = vmatmul.mubr.f32.gmra.mxu0 %v747_v10 }
 0x180   : > { %4291 = vmatmul.mubr.msk.f32.vlgmr.msra.gmra.mxu1 %vm1164_vm0, %v848_v13  ;;  %1091 = vmatprep.mubr.f32.mxu0 %v750_v12  ;;  %v4003_v12 = vld [vmem:[%s6829_s4 + $0x20] sm:$0xff] }
 0x181   : > { %v850_v16 = vpop.f32.mrf.mxu0  ;;  %4315 = vmatpush3.msra.mxu1 %v5559_v39 }
 0x182   : > { %4316 = vmatprep.subr.mxu1 %v3985_v14 }
 0x183   : > { %v853_v19 = vpop.f32.mrf.mxu0  ;;  %1092 = vmatmul.mubr.f32.gmra.mxu0 %v749_v15  ;;  %4317 = vmatpush3.msra.mxu1 %v3985_v14  ;;  %v4022_v14 = vld [vmem:[%s6829_s4 + $0x38] sm:$0xff] }
 0x184   : > { %4293 = vmatprep.mubr.msk.f32.mxu1 %vm1164_vm0, %v853_v19  ;;  %1096 = vmatprep.mubr.f32.mxu0 %v752_v17 }
 0x185   : > { %v855_v21 = vpop.f32.mrf.mxu0  ;;  %4342 = vmatprep.subr.mxu1 %v5607_v18 }
 0x187   : > { %v858_v23 = vpop.f32.mrf.mxu0  ;;  %1097 = vmatmul.mubr.f32.gmra.mxu0 %v751_v20 }
 0x188   : > { %4294 = vmatmul.mubr.msk.f32.gmra.mxu1 %vm1164_vm0, %v858_v23  ;;  %1101 = vmatprep.mubr.f32.mxu0 %v754_v22 }
 0x189   : > { %v860_v25 = vpop.f32.mrf.mxu0 }
 0x18b   : > { %v863_v27 = vpop.f32.mrf.mxu0  ;;  %1102 = vmatmul.mubr.f32.gmra.mxu0 %v753_v24 }
 0x18c   : > { %4296 = vmatprep.mubr.msk.f32.mxu1 %vm1164_vm0, %v863_v27  ;;  %1106 = vmatprep.mubr.f32.mxu0 %v756_v26 }
 0x18d   : > { %v865_v29 = vpop.f32.mrf.mxu0 }
 0x18f   : > { %v868_v31 = vpop.f32.mrf.mxu0  ;;  %1107 = vmatmul.mubr.f32.gmra.mxu0 %v755_v28 }
 0x190   : > { %4297 = vmatmul.mubr.msk.f32.gmra.mxu1 %vm1164_vm0, %v868_v31  ;;  %1111 = vmatprep.mubr.f32.mxu0 %v758_v30 }
 0x191   : > { %v870_v33 = vpop.f32.mrf.mxu0 }
 0x193   : > { %v873_v35 = vpop.f32.mrf.mxu0  ;;  %1112 = vmatmul.mubr.f32.gmra.mxu0 %v757_v32 }
 0x194   : > { %4299 = vmatprep.mubr.msk.f32.mxu1 %vm1164_vm0, %v873_v35  ;;  %1116 = vmatprep.mubr.f32.mxu0 %v760_v34 }
 0x195   : > { %v875_v37 = vpop.f32.mrf.mxu0 }
 0x197   : > { %v878_v39 = vpop.f32.mrf.mxu0  ;;  %1117 = vmatmul.mubr.f32.gmra.mxu0 %v759_v36 }
 0x198   : > { %4300 = vmatmul.mubr.msk.f32.gmra.mxu1 %vm1164_vm0, %v878_v39  ;;  %1121 = vmatprep.mubr.f32.mxu0 %v762_v38 }
 0x199   : > { %v880_v41 = vpop.f32.mrf.mxu0 }
 0x19b   : > { %v883_v43 = vpop.f32.mrf.mxu0  ;;  %1122 = vmatmul.mubr.f32.gmra.mxu0 %v761_v40 }
 0x19c   : > { %4302 = vmatprep.mubr.msk.f32.mxu1 %vm1164_vm0, %v883_v43  ;;  %1126 = vmatprep.mubr.f32.mxu0 %v764_v42 }
 0x19d   : > { %v885_v45 = vpop.f32.mrf.mxu0 }
 0x19f   : > { %v888_v47 = vpop.f32.mrf.mxu0  ;;  %1127 = vmatmul.mubr.f32.gmra.mxu0 %v763_v44 }
 0x1a0   : > { %4303 = vmatmul.mubr.msk.f32.gmra.mxu1 %vm1164_vm0, %v888_v47  ;;  %1131 = vmatprep.mubr.f32.mxu0 %v766_v46  ;;  %v4021_v46 = vld [vmem:[%s6829_s4 + $0x30] sm:$0xff] }
 0x1a1   : > { %v890_v49 = vpop.f32.mrf.mxu0 }
 0x1a3   : > { %v893_v51 = vpop.f32.mrf.mxu0  ;;  %1132 = vmatmul.mubr.f32.gmra.mxu0 %v765_v48 }
 0x1a4   : > { %4305 = vmatprep.mubr.msk.f32.mxu1 %vm1164_vm0, %v893_v51  ;;  %1136 = vmatprep.mubr.f32.mxu0 %v768_v50 }
 0x1a5   : > { %v895_v53 = vpop.f32.mrf.mxu0 }
 0x1a7   : > { %v898_v55 = vpop.f32.mrf.mxu0  ;;  %1137 = vmatmul.mubr.f32.gmra.mxu0 %v767_v52 }
 0x1a8   : > { %4306 = vmatmul.mubr.msk.f32.gmra.mxu1 %vm1164_vm0, %v898_v55  ;;  %1141 = vmatprep.mubr.f32.mxu0 %v770_v54 }
 0x1a9   : > { %v900_v57 = vpop.f32.mrf.mxu0 }
 0x1aa   : > { %v2206_v57 = vld [vmem:[#allocation7 + $0x8] sm:$0xff] }
 0x1ab   : > { %v903_v59 = vpop.f32.mrf.mxu0  ;;  %1142 = vmatmul.mubr.f32.gmra.mxu0 %v769_v56 }
 0x1ac   : > { %4308 = vmatprep.mubr.msk.f32.mxu1 %vm1164_vm0, %v903_v59  ;;  %1146 = vmatprep.mubr.f32.mxu0 %v772_v58 }
 0x1ad   : > { %v905_v61 = vpop.f32.mrf.mxu0 }
 0x1af   : > { %v908_v63 = vpop.f32.mrf.mxu0  ;;  %1147 = vmatmul.mubr.f32.gmra.mxu0 %v771_v60 }
 0x1b0   : > { %4309 = vmatmul.mubr.msk.f32.gmra.mxu1 %vm1164_vm0, %v908_v63  ;;  %1151 = vmatprep.mubr.f32.mxu0 %v774_v62 }
 0x1b1   : > { %v910_v2 = vpop.f32.mrf.mxu0 }
 0x1b3   : > { %v913_v4 = vpop.f32.mrf.mxu0  ;;  %1152 = vmatmul.mubr.f32.gmra.mxu0 %v773_v1 }
 0x1b4   : > { %4311 = vmatprep.mubr.msk.f32.mxu1 %vm1164_vm0, %v913_v4  ;;  %1156 = vmatprep.mubr.f32.mxu0 %v776_v3 }
 0x1b5   : > { %v915_v6 = vpop.f32.mrf.mxu0 }
 0x1b7   : > { %v918_v7 = vpop.f32.mrf.mxu0  ;;  %1157 = vmatmul.mubr.f32.gmra.mxu0 %v775_v5 }
 0x1b8   : > { %4312 = vmatmul.mubr.msk.f32.gmra.mxu1 %vm1164_vm0, %v918_v7 }
 0x1b9   : > { %v920_v8 = vpop.f32.mrf.mxu0 }
 0x1bb   : > { %v923_v9 = vpop.f32.mrf.mxu0 }
 0x1bc   : > { %4318 = vmatprep.mubr.msk.f32.mxu1 %vm1164_vm0, %v923_v9 }
 0x1bd   : > { %v925_v10 = vpop.f32.mrf.mxu0 }
 0x1bf   : > { %v928_v11 = vpop.f32.mrf.mxu0 }
 0x1c0   : > { %4319 = vmatmul.mubr.msk.f32.vlgmr.msra.gmra.mxu1 %vm1164_vm0, %v928_v11 }
 0x1c1   : > { %v930_v13 = vpop.f32.mrf.mxu0  ;;  %4343 = vmatpush3.msra.mxu1 %v5607_v18 }
 0x1c2   : > { %4344 = vmatprep.subr.mxu1 %v4003_v12 }
 0x1c3   : > { %v933_v15 = vpop.f32.mrf.mxu0  ;;  %4345 = vmatpush3.msra.mxu1 %v4003_v12 }
 0x1c4   : > { %4321 = vmatprep.mubr.msk.f32.mxu1 %vm1164_vm0, %v933_v15  ;;  %4370 = vmatprep.subr.mxu1 %v4022_v14 }
 0x1c5   : > { %v935_v16 = vpop.f32.mrf.mxu0 }
 0x1c7   : > { %v938_v17 = vpop.f32.mrf.mxu0 }
 0x1c8   : > { %4322 = vmatmul.mubr.msk.f32.gmra.mxu1 %vm1164_vm0, %v938_v17  ;;  %v2205_v17 = vld [vmem:[#allocation7] sm:$0xff] }
 0x1c9   : > { %v940_v19 = vpop.f32.mrf.mxu0 }
 0x1cb   : > { %v943_v20 = vpop.f32.mrf.mxu0 }
 0x1cc   : > { %4324 = vmatprep.mubr.msk.f32.mxu1 %vm1164_vm0, %v943_v20 }
 0x1cd   : > { %v945_v21 = vpop.f32.mrf.mxu0 }
 0x1cf   : > { %v948_v18 = vpop.f32.mrf.mxu0 }
 0x1d0   : > { %4325 = vmatmul.mubr.msk.f32.gmra.mxu1 %vm1164_vm0, %v948_v18 }
 0x1d1   : > { %v950_v22 = vpop.f32.mrf.mxu0 }
 0x1d3   : > { %v953_v23 = vpop.f32.mrf.mxu0 }
 0x1d4   : > { %4327 = vmatprep.mubr.msk.f32.mxu1 %vm1164_vm0, %v953_v23 }
 0x1d5   : > { %v955_v24 = vpop.f32.mrf.mxu0 }
 0x1d7   : > { %v958_v25 = vpop.f32.mrf.mxu0 }
 0x1d8   : > { %4328 = vmatmul.mubr.msk.f32.gmra.mxu1 %vm1164_vm0, %v958_v25 }
 0x1d9   : > { %v960_v26 = vpop.f32.mrf.mxu0 }
 0x1db   : > { %v963_v27 = vpop.f32.mrf.mxu0 }
 0x1dc   : > { %4330 = vmatprep.mubr.msk.f32.mxu1 %vm1164_vm0, %v963_v27 }
 0x1dd   : > { %v965_v28 = vpop.f32.mrf.mxu0 }
 0x1df   : > { %v968_v29 = vpop.f32.mrf.mxu0 }
 0x1e0   : > { %4331 = vmatmul.mubr.msk.f32.gmra.mxu1 %vm1164_vm0, %v968_v29 }
 0x1e1   : > { %v970_v30 = vpop.f32.mrf.mxu0 }
 0x1e3   : > { %v973_v31 = vpop.f32.mrf.mxu0 }
 0x1e4   : > { %4333 = vmatprep.mubr.msk.f32.mxu1 %vm1164_vm0, %v973_v31 }
 0x1e5   : > { %v975_v32 = vpop.f32.mrf.mxu0 }
 0x1e7   : > { %v978_v33 = vpop.f32.mrf.mxu0 }
 0x1e8   : > { %4334 = vmatmul.mubr.msk.f32.gmra.mxu1 %vm1164_vm0, %v978_v33 }
 0x1e9   : > { %v980_v34 = vpop.f32.mrf.mxu0 }
 0x1eb   : > { %v983_v35 = vpop.f32.mrf.mxu0 }
 0x1ec   : > { %4336 = vmatprep.mubr.msk.f32.mxu1 %vm1164_vm0, %v983_v35 }
 0x1ed   : > { %v985_v36 = vpop.f32.mrf.mxu0 }
 0x1ef   : > { %v988_v37 = vpop.f32.mrf.mxu0 }
 0x1f0   : > { %4337 = vmatmul.mubr.msk.f32.gmra.mxu1 %vm1164_vm0, %v988_v37 }
 0x1f1   : > { %v990_v38 = vpop.f32.mrf.mxu0 }
 0x1f3   : > { %v993_v39 = vpop.f32.mrf.mxu0 }
 0x1f4   : > { %4339 = vmatprep.mubr.msk.f32.mxu1 %vm1164_vm0, %v993_v39 }
 0x1f5   : > { %v995_v40 = vpop.f32.mrf.mxu0 }
 0x1f7   : > { %v998_v41 = vpop.f32.mrf.mxu0 }
 0x1f8   : > { %4340 = vmatmul.mubr.msk.f32.gmra.mxu1 %vm1164_vm0, %v998_v41 }
 0x1f9   : > { %v1000_v42 = vpop.f32.mrf.mxu0 }
 0x1fb   : > { %v1003_v43 = vpop.f32.mrf.mxu0 }
 0x1fc   : > { %4346 = vmatprep.mubr.msk.f32.mxu1 %vm1164_vm0, %v1003_v43 }
 0x1fd   : > { %v1005_v44 = vpop.f32.mrf.mxu0 }
 0x1ff   : > { %v1008_v45 = vpop.f32.mrf.mxu0 }
 0x200   : > { %4347 = vmatmul.mubr.msk.f32.vlgmr.msra.gmra.mxu1 %vm1164_vm0, %v1008_v45 }
 0x201   : > { %v1010_v47 = vpop.f32.mrf.mxu0  ;;  %4371 = vmatpush3.msra.mxu1 %v4022_v14 }
 0x202   : > { %4372 = vmatprep.subr.mxu1 %v4021_v46 }
 0x203   : > { %v1013_v48 = vpop.f32.mrf.mxu0  ;;  %4373 = vmatpush3.msra.mxu1 %v4021_v46 }
 0x204   : > { %4349 = vmatprep.mubr.msk.f32.mxu1 %vm1164_vm0, %v1013_v48  ;;  %4398 = vmatprep.subr.mxu1 %v2206_v57 }
 0x205   : > { %v1015_v49 = vpop.f32.mrf.mxu0 }
 0x207   : > { %v1018_v50 = vpop.f32.mrf.mxu0 }
 0x208   : > { %4350 = vmatmul.mubr.msk.f32.gmra.mxu1 %vm1164_vm0, %v1018_v50 }
 0x209   : > { %v1020_v51 = vpop.f32.mrf.mxu0 }
 0x20b   : > { %v1023_v52 = vpop.f32.mrf.mxu0 }
 0x20c   : > { %4352 = vmatprep.mubr.msk.f32.mxu1 %vm1164_vm0, %v1023_v52 }
 0x20d   : > { %v1025_v53 = vpop.f32.mrf.mxu0 }
 0x20f   : > { %v1028_v54 = vpop.f32.mrf.mxu0 }
 0x210   : > { %4353 = vmatmul.mubr.msk.f32.gmra.mxu1 %vm1164_vm0, %v1028_v54 }
 0x211   : > { %v1030_v55 = vpop.f32.mrf.mxu0 }
 0x213   : > { %v1033_v56 = vpop.f32.mrf.mxu0 }
 0x214   : > { %4355 = vmatprep.mubr.msk.f32.mxu1 %vm1164_vm0, %v1033_v56 }
 0x215   : > { %v1035_v58 = vpop.f32.mrf.mxu0 }
 0x216   : > { %v2189_v58 = vld [vmem:[%s5733_s28] sm:$0xff] }
 0x217   : > { %v1038_v59 = vpop.f32.mrf.mxu0 }
 0x218   : > { %4356 = vmatmul.mubr.msk.f32.gmra.mxu1 %vm1164_vm0, %v1038_v59 }
 0x219   : > { %v1040_v60 = vpop.f32.mrf.mxu0 }
 0x21b   : > { %v1043_v61 = vpop.f32.mrf.mxu0 }
 0x21c   : > { %4358 = vmatprep.mubr.msk.f32.mxu1 %vm1164_vm0, %v1043_v61 }
 0x21d   : > { %v1045_v62 = vpop.f32.mrf.mxu0 }
 0x21e   : > { %v2190_v62 = vld [vmem:[%s5733_s28 + $0x8] sm:$0xff] }
 0x21f   : > { %v1048_v63 = vpop.f32.mrf.mxu0 }
 0x220   : > { %4359 = vmatmul.mubr.msk.f32.gmra.mxu1 %vm1164_vm0, %v1048_v63 }
 0x221   : > { %v1050_v1 = vpop.f32.mrf.mxu0 }
 0x222   : > { %v2191_v1 = vld [vmem:[%s5733_s28 + $0x10] sm:$0xff] }
 0x223   : > { %v1053_v2 = vpop.f32.mrf.mxu0 }
 0x224   : > { %4361 = vmatprep.mubr.msk.f32.mxu1 %vm1164_vm0, %v1053_v2  ;;  %v2192_v2 = vld [vmem:[%s5733_s28 + $0x18] sm:$0xff] }
 0x225   : > { %v1055_v3 = vpop.f32.mrf.mxu0 }
 0x227   : > { %v1058_v4 = vpop.f32.mrf.mxu0 }
 0x228   : > { %4362 = vmatmul.mubr.msk.f32.gmra.mxu1 %vm1164_vm0, %v1058_v4  ;;  %v2193_v4 = vld [vmem:[%s5733_s28 + $0x20] sm:$0xff] }
 0x229   : > { %v1060_v5 = vpop.f32.mrf.mxu0 }
 0x22b   : > { %v1063_v6 = vpop.f32.mrf.mxu0 }
 0x22c   : > { %4364 = vmatprep.mubr.msk.f32.mxu1 %vm1164_vm0, %v1063_v6  ;;  %v2194_v6 = vld [vmem:[%s5733_s28 + $0x28] sm:$0xff] }
 0x22d   : > { %v1065_v7 = vpop.f32.mrf.mxu0 }
 0x22f   : > { %v1068_v8 = vpop.f32.mrf.mxu0 }
 0x230   : > { %4365 = vmatmul.mubr.msk.f32.gmra.mxu1 %vm1164_vm0, %v1068_v8  ;;  %v2195_v8 = vld [vmem:[%s5733_s28 + $0x30] sm:$0xff] }
 0x231   : > { %v1070_v9 = vpop.f32.mrf.mxu0 }
 0x232   : > { %v2196_v9 = vld [vmem:[%s5733_s28 + $0x38] sm:$0xff] }
 0x233   : > { %v1073_v10 = vpop.f32.mrf.mxu0 }
 0x234   : > { %4367 = vmatprep.mubr.msk.f32.mxu1 %vm1164_vm0, %v1073_v10  ;;  %v2197_v10 = vld [vmem:[%s5733_s28 + $0x40] sm:$0xff] }
 0x235   : > { %v1075_v11 = vpop.f32.mrf.mxu0 }
 0x237   : > { %v1078_v12 = vpop.f32.mrf.mxu0 }
 0x238   : > { %4368 = vmatmul.mubr.msk.f32.gmra.mxu1 %vm1164_vm0, %v1078_v12  ;;  %v2198_v12 = vld [vmem:[%s5733_s28 + $0x48] sm:$0xff] }
 0x239   : > { %v1080_v13 = vpop.f32.mrf.mxu0 }
 0x23b   : > { %v1083_v14 = vpop.f32.mrf.mxu0 }
 0x23c   : > { %4374 = vmatprep.mubr.msk.f32.mxu1 %vm1164_vm0, %v1083_v14  ;;  %v2199_v14 = vld [vmem:[%s5733_s28 + $0x50] sm:$0xff] }
 0x23d   : > { %v1085_v15 = vpop.f32.mrf.mxu0 }
 0x23e   : > { %v2200_v15 = vld [vmem:[%s5733_s28 + $0x58] sm:$0xff] }
 0x23f   : > { %v1088_v16 = vpop.f32.mrf.mxu0 }
 0x240   : > { %4375 = vmatmul.mubr.msk.f32.vlgmr.msra.gmra.mxu1 %vm1164_vm0, %v1088_v16  ;;  %v5696_v26 = vpop.f32.mrf.mxu1  ;;  %v2201_v16 = vld [vmem:[%s5733_s28 + $0x60] sm:$0xff] }
 0x241   : > { %v1090_v19 = vpop.f32.mrf.mxu0  ;;  %4399 = vmatpush3.msra.mxu1 %v2206_v57 }
 0x242   : > { %4400 = vmatprep.subr.mxu1 %v2205_v17  ;;  %v5699_v29 = vpop.f32.mrf.mxu1  ;;  %v2202_v19 = vld [vmem:[%s5733_s28 + $0x68] sm:$0xff] }
 0x243   : > { %v1093_v20 = vpop.f32.mrf.mxu0  ;;  %4401 = vmatpush3.msra.mxu1 %v2205_v17 }
 0x244   : > { %4377 = vmatprep.mubr.msk.f32.mxu1 %vm1164_vm0, %v1093_v20 }
 0x245   : > { %v1095_v21 = vpop.f32.mrf.mxu0 }
 0x246   : > { %v2203_v21 = vld [vmem:[%s5733_s28 + $0x70] sm:$0xff] }
 0x247   : > { %v1098_v18 = vpop.f32.mrf.mxu0 }
 0x248   : > { %4378 = vmatmul.mubr.msk.f32.gmra.mxu1 %vm1164_vm0, %v1098_v18  ;;  %v5702_v31 = vpop.f32.mrf.mxu1  ;;  %v2204_v18 = vld [vmem:[%s5733_s28 + $0x78] sm:$0xff] }
 0x249   : > { %v1100_v22 = vpop.f32.mrf.mxu0 }
 0x24a   : > { %v5705_v34 = vpop.f32.mrf.mxu1 }
 0x24b   : > { %v1103_v23 = vpop.f32.mrf.mxu0 }
 0x24c   : > { %4380 = vmatprep.mubr.msk.f32.mxu1 %vm1164_vm0, %v1103_v23 }
 0x24d   : > { %v1105_v24 = vpop.f32.mrf.mxu0 }
 0x24e   : > { %v2873_v24 = vld [vmem:[#allocation8 + $0x178] sm:$0xff] }
 0x24f   : > { %v1108_v25 = vpop.f32.mrf.mxu0  ;;  %4482 = vmatprep.subr.mxu0 %v2873_v24 }
 0x250   : > { %4381 = vmatmul.mubr.msk.f32.gmra.mxu1 %vm1164_vm0, %v1108_v25  ;;  %v5707_v36 = vpop.f32.mrf.mxu1  ;;  %4483 = vmatpush3.msra.mxu0 %v2873_v24 }
 0x251   : > { %v1110_v27 = vpop.f32.mrf.mxu0 }
 0x252   : > { %v5710_v39 = vpop.f32.mrf.mxu1 }
 0x253   : > { %v1113_v28 = vpop.f32.mrf.mxu0 }
 0x254   : > { %4383 = vmatprep.mubr.msk.f32.mxu1 %vm1164_vm0, %v1113_v28  ;;  %v2870_v28 = vld [vmem:[#allocation8 + $0x160] sm:$0xff] }
 0x255   : > { %v1115_v30 = vpop.f32.mrf.mxu0  ;;  %4484 = vmatprep.subr.mxu0 %v2870_v28 }
 0x256   : > { %4485 = vmatpush3.msra.mxu0 %v2870_v28  ;;  %v2467_v28 = vld [vmem:[%s6832_s7 + $0x60] sm:$0xff] }
 0x257   : > { %v1118_v32 = vpop.f32.mrf.mxu0 }
 0x258   : > { %4384 = vmatmul.mubr.msk.f32.gmra.mxu1 %vm1164_vm0, %v1118_v32  ;;  %v5713_v41 = vpop.f32.mrf.mxu1 }
 0x259   : > { %v1120_v33 = vpop.f32.mrf.mxu0 }
 0x25a   : > { %v5717_v44 = vpop.f32.mrf.mxu1 }
 0x25b   : > { %v1123_v35 = vpop.f32.mrf.mxu0 }
 0x25c   : > { %4386 = vmatprep.mubr.msk.f32.mxu1 %vm1164_vm0, %v1123_v35 }
 0x25d   : > { %v1125_v37 = vpop.f32.mrf.mxu0 }
 0x25f   : > { %v1128_v38 = vpop.f32.mrf.mxu0 }
 0x260   : > { %4387 = vmatmul.mubr.msk.f32.gmra.mxu1 %vm1164_vm0, %v1128_v38  ;;  %v5719_v46 = vpop.f32.mrf.mxu1  ;;  %v2867_v38 = vld [vmem:[#allocation8 + $0x148] sm:$0xff] }
 0x261   : > { %v1130_v40 = vpop.f32.mrf.mxu0  ;;  %4486 = vmatprep.subr.mxu0 %v2867_v38 }
 0x262   : > { %v5722_v49 = vpop.f32.mrf.mxu1  ;;  %4487 = vmatpush3.msra.mxu0 %v2867_v38 }
 0x263   : > { %v1133_v42 = vpop.f32.mrf.mxu0 }
 0x264   : > { %4389 = vmatprep.mubr.msk.f32.mxu1 %vm1164_vm0, %v1133_v42 }
 0x265   : > { %v1135_v43 = vpop.f32.mrf.mxu0 }
 0x267   : > { %v1138_v45 = vpop.f32.mrf.mxu0 }
 0x268   : > { %4390 = vmatmul.mubr.msk.f32.gmra.mxu1 %vm1164_vm0, %v1138_v45  ;;  %v5725_v51 = vpop.f32.mrf.mxu1  ;;  %v2864_v45 = vld [vmem:[#allocation8 + $0x130] sm:$0xff] }
 0x269   : > { %v1140_v47 = vpop.f32.mrf.mxu0  ;;  %4488 = vmatprep.subr.mxu0 %v2864_v45 }
 0x26a   : > { %v5728_v54 = vpop.f32.mrf.mxu1  ;;  %4489 = vmatpush3.msra.mxu0 %v2864_v45  ;;  %v2462_v45 = vld [vmem:[%s6832_s7 + $0x38] sm:$0xff] }
 0x26b   : > { %v1143_v48 = vpop.f32.mrf.mxu0 }
 0x26c   : > { %4392 = vmatprep.mubr.msk.f32.mxu1 %vm1164_vm0, %v1143_v48 }
 0x26d   : > { %v1145_v50 = vpop.f32.mrf.mxu0 }
 0x26e   : > { %v2861_v50 = vld [vmem:[#allocation8 + $0x118] sm:$0xff] }
 0x26f   : > { %v1148_v52 = vpop.f32.mrf.mxu0  ;;  %4490 = vmatprep.subr.mxu0 %v2861_v50 }
 0x270   : > { %4393 = vmatmul.mubr.msk.f32.gmra.mxu1 %vm1164_vm0, %v1148_v52  ;;  %v5735_v56 = vpop.f32.mrf.mxu1  ;;  %v2501_v52 = vld [vmem:[%s6832_s7 + $0x170] sm:$0xff]  ;;  %4491 = vmatpush3.msra.mxu0 %v2861_v50  ;;  %v2459_v50 = vld [vmem:[%s6832_s7 + $0x20] sm:$0xff] }
 0x271   : > { %v1150_v53 = vpop.f32.mrf.mxu0  ;;  %2520 = vmatprep.subr.mxu1 %v2501_v52  ;;  %v2458_v52 = vld [vmem:[%s6832_s7 + $0x18] sm:$0xff] }
 0x272   : > { %v5739_v60 = vpop.f32.mrf.mxu1  ;;  %v2500_v53 = vld [vmem:[%s6832_s7 + $0x168] sm:$0xff] }
 0x273   : > { %v1153_v55 = vpop.f32.mrf.mxu0 }
 0x274   : > { %4395 = vmatprep.mubr.msk.f32.mxu1 %vm1164_vm0, %v1153_v55  ;;  %v2498_v55 = vld [vmem:[%s6832_s7 + $0x158] sm:$0xff] }
 0x275   : > { %v1155_v57 = vpop.f32.mrf.mxu0 }
 0x276   : > { %v2497_v57 = vld [vmem:[%s6832_s7 + $0x150] sm:$0xff] }
 0x277   : > { %v1158_v59 = vpop.f32.mrf.mxu0 }
 0x278   : > { %4396 = vmatmul.mubr.msk.f32.gmra.mxu1 %vm1164_vm0, %v1158_v59  ;;  %v5744_v63 = vpop.f32.mrf.mxu1  ;;  %v2495_v59 = vld [vmem:[%s6832_s7 + $0x140] sm:$0xff] }
 0x279   : > { %v1160_v61 = vpop.f32.mrf.mxu0  ;;  %4402 = vmatprep.mubr.msk.f32.mxu1 %vm1164_vm0, %v2189_v58 }
 0x27a   : > { %v5750_v3 = vpop.f32.mrf.mxu1  ;;  %v2494_v61 = vld [vmem:[%s6832_s7 + $0x138] sm:$0xff] }
 0x27c   : > { %4403 = vmatmul.mubr.msk.f32.vlgmr.msra.gmra.mxu1 %vm1164_vm0, %v2190_v62 }
 0x27d   : > { %4405 = vmatprep.mubr.msk.f32.mxu1 %vm1164_vm0, %v2191_v1  ;;  %2521 = vmatpush1.msra.mxu1 %v2500_v53  ;;  %v2492_v1 = vld [vmem:[%s6832_s7 + $0x128] sm:$0xff] }
 0x27e   : > { %2522 = vmatprep.subr.mxu1 %v2498_v55  ;;  %v2456_v55 = vld [vmem:[%s6832_s7 + $0x8] sm:$0xff] }
 0x27f   : > { %2523 = vmatpush1.msra.mxu1 %v2497_v57  ;;  %v2855_v57 = vld [vmem:[#allocation8 + $0xe8] sm:$0xff] }
 0x280   : > { %v4320_v5 = vpop.f32.mrf.mxu1  ;;  %4406 = vmatmul.mubr.msk.f32.gmra.mxu1 %vm1164_vm0, %v2192_v2  ;;  %2524 = vmatprep.subr.mxu1 %v2495_v59  ;;  %v2491_v2 = vld [vmem:[%s6832_s7 + $0x120] sm:$0xff]  ;;  %v5912_v59 = vld [vmem:[%s6832_s7 + $0x178] sm:$0xff] }
 0x281   : > { %1964 = vrot.lane.b32.xlu1 %v4320_v5, %s5096_s26  ;;  %4408 = vmatprep.mubr.msk.f32.mxu1 %vm1164_vm0, %v2193_v4  ;;  %v2858_v4 = vld [vmem:[#allocation8 + $0x100] sm:$0xff] }
 0x282   : > { %v1475_v7 = vpop.f32.mrf.mxu1  ;;  %2525 = vmatpush1.msra.mxu1 %v2494_v61  ;;  %v2489_v5 = vld [vmem:[%s6832_s7 + $0x110] sm:$0xff]  ;;  %4492 = vmatprep.subr.mxu0 %v2858_v4 }
 0x283   : > { %1962 = vrot.lane.b32.xlu0 %v1475_v7, %s5096_s26  ;;  %2526 = vmatprep.subr.mxu1 %v2492_v1  ;;  %v2486_v7 = vld [vmem:[%s6832_s7 + $0xf8] sm:$0xff] }
 0x284   : > { %4409 = vmatmul.mubr.msk.f32.gmra.mxu1 %vm1164_vm0, %v2194_v6  ;;  %v2488_v6 = vld [vmem:[%s6832_s7 + $0x108] sm:$0xff]  ;;  %4493 = vmatpush3.msra.mxu0 %v2858_v4 }
 0x285   : > { %4411 = vmatprep.mubr.msk.f32.mxu1 %vm1164_vm0, %v2195_v8  ;;  %2527 = vmatpush1.msra.mxu1 %v2491_v2  ;;  %v2485_v8 = vld [vmem:[%s6832_s7 + $0xf0] sm:$0xff] }
 0x286   : > { %2528 = vmatprep.subr.mxu1 %v2489_v5  ;;  %4494 = vmatprep.subr.mxu0 %v2855_v57  ;;  %v2852_v5 = vld [vmem:[#allocation8 + $0xd0] sm:$0xff] }
 0x287   : > { %2529 = vmatpush1.msra.mxu1 %v2488_v6  ;;  %4495 = vmatpush3.msra.mxu0 %v2855_v57 }
 0x288   : > { %v4323_v11 = vpop.f32.mrf.mxu1  ;;  %4412 = vmatmul.mubr.msk.f32.gmra.mxu1 %vm1164_vm0, %v2196_v9  ;;  %2530 = vmatprep.subr.mxu1 %v2486_v7 }
 0x289   : > { %1968 = vrot.lane.b32.xlu1 %v4323_v11, %s5096_s26  ;;  %4414 = vmatprep.mubr.msk.f32.mxu1 %vm1164_vm0, %v2197_v10  ;;  %v2483_v10 = vld [vmem:[%s6832_s7 + $0xe0] sm:$0xff]  ;;  %v2482_v11 = vld [vmem:[%s6832_s7 + $0xd8] sm:$0xff] }
 0x28a   : > { %v1485_v13 = vpop.f32.mrf.mxu1  ;;  %2531 = vmatpush1.msra.mxu1 %v2485_v8  ;;  %4496 = vmatprep.subr.mxu0 %v2852_v5 }
 0x28b   : > { %1966 = vrot.lane.b32.xlu0 %v1485_v13, %s5096_s26  ;;  %v2480_v13 = vld [vmem:[%s6832_s7 + $0xc8] sm:$0xff]  ;;  %2532 = vmatprep.subr.mxu1 %v2483_v10 }
 0x28c   : > { %4415 = vmatmul.mubr.msk.f32.gmra.mxu1 %vm1164_vm0, %v2198_v12  ;;  %4497 = vmatpush3.msra.mxu0 %v2852_v5  ;;  %v2849_v10 = vld [vmem:[#allocation8 + $0xb8] sm:$0xff] }
 0x28d   : > { %4417 = vmatprep.mubr.msk.f32.mxu1 %vm1164_vm0, %v2199_v14  ;;  %v2479_v14 = vld [vmem:[%s6832_s7 + $0xc0] sm:$0xff]  ;;  %2533 = vmatpush1.msra.mxu1 %v2482_v11 }
 0x28e   : > { %2534 = vmatprep.subr.mxu1 %v2480_v13  ;;  %4498 = vmatprep.subr.mxu0 %v2849_v10  ;;  %v2846_v13 = vld [vmem:[#allocation8 + $0xa0] sm:$0xff] }
 0x28f   : > { %2535 = vmatpush1.msra.mxu1 %v2479_v14  ;;  %4499 = vmatpush3.msra.mxu0 %v2849_v10 }
 0x290   : > { %v4326_v17 = vpop.f32.mrf.mxu1  ;;  %4418 = vmatmul.mubr.msk.f32.gmra.mxu1 %vm1164_vm0, %v2200_v15  ;;  %v2477_v15 = vld [vmem:[%s6832_s7 + $0xb0] sm:$0xff]  ;;  %4500 = vmatprep.subr.mxu0 %v2846_v13 }
 0x291   : > { %1972 = vrot.lane.b32.xlu1 %v4326_v17, %s5096_s26  ;;  %4420 = vmatprep.mubr.msk.f32.mxu1 %vm1164_vm0, %v2201_v16  ;;  %v2476_v16 = vld [vmem:[%s6832_s7 + $0xa8] sm:$0xff]  ;;  %v2474_v17 = vld [vmem:[%s6832_s7 + $0x98] sm:$0xff] }
 0x292   : > { %v1495_v20 = vpop.f32.mrf.mxu1  ;;  %2536 = vmatprep.subr.mxu1 %v2477_v15  ;;  %4501 = vmatpush3.msra.mxu0 %v2846_v13  ;;  %v6003_v13 = vld [vmem:[%s5341_s8 + $0x8] sm:$0xff] }
 0x293   : > { %1970 = vrot.lane.b32.xlu0 %v1495_v20, %s5096_s26  ;;  %2537 = vmatpush1.msra.mxu1 %v2476_v16  ;;  %v2471_v20 = vld [vmem:[%s6832_s7 + $0x80] sm:$0xff]  ;;  %v2843_v16 = vld [vmem:[#allocation8 + $0x88] sm:$0xff] }
 0x294   : > { %4421 = vmatmul.mubr.msk.f32.gmra.mxu1 %vm1164_vm0, %v2202_v19  ;;  %v2473_v19 = vld [vmem:[%s6832_s7 + $0x90] sm:$0xff]  ;;  %2538 = vmatprep.subr.mxu1 %v2474_v17 }
 0x295   : > { %4423 = vmatprep.mubr.msk.f32.mxu1 %vm1164_vm0, %v2203_v21  ;;  %v2470_v21 = vld [vmem:[%s6832_s7 + $0x78] sm:$0xff]  ;;  %2539 = vmatpush1.msra.mxu1 %v2473_v19 }
 0x296   : > { %2540 = vmatprep.subr.mxu1 %v2471_v20  ;;  %4502 = vmatprep.subr.mxu0 %v2843_v16 }
 0x297   : > { %2541 = vmatpush1.msra.mxu1 %v2470_v21  ;;  %4503 = vmatpush3.msra.mxu0 %v2843_v16 }
 0x298   : > { %v4329_v22 = vpop.f32.mrf.mxu1  ;;  %4424 = vmatmul.mubr.msk.f32.gmra.mxu1 %vm1164_vm0, %v2204_v18  ;;  %v2468_v18 = vld [vmem:[%s6832_s7 + $0x68] sm:$0xff] }
 0x299   : > { %1976 = vrot.lane.b32.xlu1 %v4329_v22, %s5096_s26  ;;  %2584 = vmatprep.mubr.f32.mxu1 %v5095_v0 }
 0x29a   : > { %v1505_v23 = vpop.f32.mrf.mxu1  ;;  %2542 = vmatprep.subr.mxu1 %v2468_v18  ;;  %v2837_v18 = vld [vmem:[#allocation8 + $0x58] sm:$0xff] }
 0x29b   : > { %1974 = vrot.lane.b32.xlu0 %v1505_v23, %s5096_s26  ;;  %2543 = vmatpush1.msra.mxu1 %v2467_v28 }
 0x2a0   : > { %v5786_v25 = vpop.f32.mrf.mxu1 }
 0x2a2   : > { %v1515_v27 = vpop.f32.mrf.mxu1 }
 0x2a3   : > { %1978 = vrot.lane.b32.xlu0 %v1515_v27, %s5096_s26 }
 0x2a8   : > { %v5789_v30 = vpop.f32.mrf.mxu1 }
 0x2aa   : > { %v5791_v32 = vpop.f32.mrf.mxu1 }
 0x2b0   : > { %v5793_v33 = vpop.f32.mrf.mxu1 }
 0x2b2   : > { %v5795_v35 = vpop.f32.mrf.mxu1 }
 0x2b8   : > { %v5797_v37 = vpop.f32.mrf.mxu1 }
 0x2ba   : > { %v5799_v40 = vpop.f32.mrf.mxu1 }
 0x2c0   : > { %v4348_v42 = vpop.f32.mrf.mxu1 }
 0x2c1   : > { %2028 = vrot.lane.b32.xlu0 %v4348_v42, %s5097_s10  ;;  %v2465_v42 = vld [vmem:[%s6832_s7 + $0x50] sm:$0xff] }
 0x2c2   : > { %v1671_v43 = vpop.f32.mrf.mxu1  ;;  %2544 = vmatprep.subr.mxu1 %v2465_v42  ;;  %v2834_v42 = vld [vmem:[#allocation8 + $0x40] sm:$0xff] }
 0x2c5   : > { %2026 = vrot.lane.b32.xlu0 %v1671_v43, %s5097_s10  ;;  %v2464_v43 = vld [vmem:[%s6832_s7 + $0x48] sm:$0xff] }
 0x2c6   : > { %2545 = vmatpush1.msra.mxu1 %v2464_v43 }
 0x2c7   : > { %2546 = vmatprep.subr.mxu1 %v2462_v45 }
 0x2c8   : > { %v4351_v47 = vpop.f32.mrf.mxu1 }
 0x2c9   : > { %2032 = vrot.lane.b32.xlu0 %v4351_v47, %s5097_s10  ;;  %v2461_v47 = vld [vmem:[%s6832_s7 + $0x30] sm:$0xff] }
 0x2ca   : > { %v1681_v48 = vpop.f32.mrf.mxu1  ;;  %2547 = vmatpush1.msra.mxu1 %v2461_v47 }
 0x2cb   : > { %2030 = vrot.lane.b32.xlu1 %v1681_v48, %s5097_s10  ;;  %2548 = vmatprep.subr.mxu1 %v2459_v50 }
 0x2cc   : > { %2549 = vmatpush1.msra.mxu1 %v2458_v52 }
 0x2cd   : > { %2550 = vmatprep.subr.mxu1 %v2456_v55 }
 0x2d0   : > { %v4354_v58 = vpop.f32.mrf.mxu1 }
 0x2d1   : > { %2036 = vrot.lane.b32.xlu0 %v4354_v58, %s5097_s10  ;;  %v2455_v58 = vld [vmem:[%s6832_s7] sm:$0xff] }
 0x2d2   : > { %v1691_v62 = vpop.f32.mrf.mxu1  ;;  %2551 = vmatpush1.msra.mxu1 %v2455_v58 }
 0x2d3   : > { %2034 = vrot.lane.b32.xlu1 %v1691_v62, %s5097_s10  ;;  %4426 = vmatprep.subr.mxu1 %v5912_v59 }
 0x2d8   : > { %v4357_v9 = vpop.f32.mrf.mxu1 }
 0x2d9   : > { %2040 = vrot.lane.b32.xlu0 %v4357_v9, %s5097_s10 }
 0x2da   : > { %v1701_v12 = vpop.f32.mrf.mxu1 }
 0x2db   : > { %2038 = vrot.lane.b32.xlu1 %v1701_v12, %s5097_s10 }
 0x2e0   : > { %v4360_v22 = vpop.f32.mrf.mxu1 }
 0x2e2   : > { %v1711_v23 = vpop.f32.mrf.mxu1 }
 0x2e8   : > { %v4363_v24 = vpop.f32.mrf.mxu1 }
 0x2ea   : > { %v1721_v27 = vpop.f32.mrf.mxu1 }
 0x2f0   : > { %v5881_v38 = vpop.f32.mrf.mxu1 }
 0x2f2   : > { %v1731_v48 = vpop.f32.mrf.mxu1 }
 0x2f3   : > { %v1965_v19 = vpop.permute.xlu1 %1964 }
 0x2f4   : > { %v2140_v55 = vsel %vm2138_vm1, %v5696_v26, %v1965_v19  ;;  %v2828_v26 = vld [vmem:[#allocation8 + $0x10] sm:$0xff] }
 0x2f8   : > { %v5901_v53 = vpop.f32.mrf.mxu1 }
 0x2fa   : > { %v1741_v61 = vpop.f32.mrf.mxu1 }
 0x2fb   : > { %v5957_v21 = vpop.permute.xlu1 %1968 }
 0x300   : > { %v4376_v62 = vpop.f32.mrf.mxu1 }
 0x301   : > { %2092 = vrot.lane.b32.xlu1 %v4376_v62, %s5098_s14 }
 0x302   : > { %v1867_v1 = vpop.f32.mrf.mxu1 }
 0x305   : > { %2090 = vrot.lane.b32.xlu1 %v1867_v1, %s5098_s14 }
 0x308   : > { %v4379_v2 = vpop.f32.mrf.mxu1 }
 0x309   : > { %2042 = vrot.lane.b32.xlu1 %v1711_v23, %s5097_s10 }
 0x30a   : > { %v1877_v4 = vpop.f32.mrf.mxu1 }
 0x30b   : > { %2094 = vrot.lane.b32.xlu0 %v1877_v4, %s5098_s14 }
 0x30d   : > { %1980 = vrot.lane.b32.xlu1 %v5786_v25, %s5096_s26 }
 0x30f   : > { %2044 = vrot.lane.b32.xlu0 %v4360_v22, %s5097_s10  ;;  %v5960_v22 = vld [vmem:[%s5341_s8] sm:$0xff] }
 0x310   : > { %v4382_v6 = vpop.f32.mrf.mxu1  ;;  %4514 = vmatprep.mubr.f32.mxu0 %v5960_v22 }
 0x311   : > { %2096 = vrot.lane.b32.xlu1 %v4379_v2, %s5098_s14 }
 0x312   : > { %v1887_v7 = vpop.f32.mrf.mxu1 }
 0x313   : > { %2098 = vrot.lane.b32.xlu0 %v1887_v7, %s5098_s14 }
 0x315   : > { %2100 = vrot.lane.b32.xlu1 %v4382_v6, %s5098_s14  ;;  %v2831_v6 = vld [vmem:[#allocation8 + $0x28] sm:$0xff] }
 0x317   : > { %1982 = vrot.lane.b32.xlu0 %v5791_v32, %s5096_s26 }
 0x318   : > { %v4385_v8 = vpop.f32.mrf.mxu1 }
 0x319   : > { %2046 = vrot.lane.b32.xlu1 %v1721_v27, %s5097_s10 }
 0x31a   : > { %v1897_v9 = vpop.f32.mrf.mxu1 }
 0x31b   : > { %2102 = vrot.lane.b32.xlu0 %v1897_v9, %s5098_s14 }
 0x31d   : > { %1984 = vrot.lane.b32.xlu1 %v5789_v30, %s5096_s26 }
 0x31f   : > { %2048 = vrot.lane.b32.xlu0 %v4363_v24, %s5097_s10 }
 0x320   : > { %v4388_v25 = vpop.f32.mrf.mxu1 }
 0x321   : > { %2104 = vrot.lane.b32.xlu1 %v4385_v8, %s5098_s14 }
 0x322   : > { %v1907_v11 = vpop.f32.mrf.mxu1 }
 0x323   : > { %2106 = vrot.lane.b32.xlu0 %v1907_v11, %s5098_s14 }
 0x325   : > { %2108 = vrot.lane.b32.xlu1 %v4388_v25, %s5098_s14 }
 0x327   : > { %1986 = vrot.lane.b32.xlu0 %v5795_v35, %s5096_s26 }
 0x328   : > { %v4391_v32 = vpop.f32.mrf.mxu1 }
 0x329   : > { %2050 = vrot.lane.b32.xlu1 %v1731_v48, %s5097_s10 }
 0x32a   : > { %v1917_v12 = vpop.f32.mrf.mxu1 }
 0x32b   : > { %2110 = vrot.lane.b32.xlu0 %v1917_v12, %s5098_s14  ;;  %v2499_v12 = vld [vmem:[%s6832_s7 + $0x160] sm:$0xff] }
 0x32d   : > { %1988 = vrot.lane.b32.xlu1 %v5793_v33, %s5096_s26  ;;  %v2840_v33 = vld [vmem:[#allocation8 + $0x70] sm:$0xff] }
 0x32e   : > { %4504 = vmatprep.subr.mxu0 %v2840_v33 }
 0x32f   : > { %2052 = vrot.lane.b32.xlu0 %v5881_v38, %s5097_s10  ;;  %4505 = vmatpush3.msra.mxu0 %v2840_v33 }
 0x330   : > { %v4394_v30 = vpop.f32.mrf.mxu1  ;;  %4506 = vmatprep.subr.mxu0 %v2837_v18 }
 0x331   : > { %2112 = vrot.lane.b32.xlu1 %v4391_v32, %s5098_s14  ;;  %4507 = vmatpush3.msra.mxu0 %v2837_v18  ;;  %v2142_v18 = vsel %vm2138_vm1, %v5702_v31, %v5957_v21 }
 0x332   : > { %v1927_v14 = vpop.f32.mrf.mxu1  ;;  %4508 = vmatprep.subr.mxu0 %v2834_v42 }
 0x333   : > { %2114 = vrot.lane.b32.xlu0 %v1927_v14, %s5098_s14  ;;  %4509 = vmatpush3.msra.mxu0 %v2834_v42 }
 0x334   : > { %4510 = vmatprep.subr.mxu0 %v2831_v6 }
 0x335   : > { %2116 = vrot.lane.b32.xlu1 %v4394_v30, %s5098_s14  ;;  %4511 = vmatpush3.msra.mxu0 %v2831_v6 }
 0x336   : > { %4512 = vmatprep.subr.mxu0 %v2828_v26 }
 0x337   : > { %1990 = vrot.lane.b32.xlu0 %v5799_v40, %s5096_s26  ;;  %v1963_v40 = vpop.permute.xlu0 %1962  ;;  %4513 = vmatpush3.msra.mxu0 %v2828_v26  ;;  %v2478_v26 = vld [vmem:[%s6832_s7 + $0xb8] sm:$0xff] }
 0x338   : > { %v4397_v35 = vpop.f32.mrf.mxu1  ;;  %v2139_v57 = vsel %vm2138_vm1, %v5699_v29, %v1963_v40  ;;  %v5990_v29 = vld [vmem:[%s6831_s6] ss:$0 sm:$0xff]  ;;  %4515 = vmatmul.mubr.f32.vlgmr.msra.gmra.mxu0 %v6003_v13 }
 0x339   : > { %2054 = vrot.lane.b32.xlu1 %v1741_v61, %s5097_s10 }
 0x33a   : > { %v1937_v15 = vpop.f32.mrf.mxu1 }
 0x33b   : > { %2118 = vrot.lane.b32.xlu0 %v1937_v15, %s5098_s14  ;;  %v1967_v17 = vpop.permute.xlu0 %1966  ;;  %v6015_v15 = vld [vmem:[%s5341_s8 + $0x10] sm:$0xff] }
 0x33c   : > { %v4404_v50 = vpop.f32.mrf.mxu1  ;;  %v2141_v11 = vsel %vm2138_vm1, %v5705_v34, %v1967_v17  ;;  %v2496_v34 = vld [vmem:[%s6832_s7 + $0x148] sm:$0xff]  ;;  %4517 = vmatprep.mubr.f32.mxu0 %v6015_v15  ;;  %v2493_v17 = vld [vmem:[%s6832_s7 + $0x130] sm:$0xff] }
 0x33d   : > { %1992 = vrot.lane.b32.xlu1 %v5797_v37, %s5096_s26  ;;  %v5965_v37 = vpop.permute.xlu1 %1972  ;;  %s6884_s26 = sld [smem:[#allocation36_spill]] }
 0x33e   : > { %v2321_v58 = vpop.f32.mrf.mxu1 }
 0x33f   : > { %2056 = vrot.lane.b32.xlu0 %v5901_v53, %s5097_s10  ;;  %v5955_v20 = vpop.permute.xlu0 %1970  ;;  %s6657_s10 = scalar_lea.vmem [#allocation10], %s3962_s23  ;;  %s6893_s23 = sld [smem:[#allocation26_spill]] }
 0x340   : > { %v4407_v5 = vpop.f32.mrf.mxu1  ;;  %v2143_v31 = vsel %vm2138_vm1, %v5710_v39, %v5955_v20  ;;  %v2144_v39 = vsel %vm2138_vm1, %v5707_v36, %v5965_v37  ;;  %v6075_v36 = vld [vmem:[%s5341_s8 + $0x30] sm:$0xff]  ;;  %s3774_s25 = sshll.u32 %s6657_s10, 4  ;;  %s6761_s25 = int_to_ptr.vmem [resolvable:$true] %s3774_s25 }
 0x341   : > { %2120 = vrot.lane.b32.xlu1 %v4397_v35, %s5098_s14  ;;  %v5969_v27 = vpop.permute.xlu1 %1976  ;;  %s4973_s28 = scalar_lea.vmem %s6761_s25, 2048 }
 0x342   : > { %v2331_v32 = vpop.f32.mrf.mxu1  ;;  %p4974_p10 = scmp.ne.s32.totalorder %s6761_s25, %s4973_s28 }
 0x343   : > { %v5962_v23 = vpop.permute.xlu0 %1974 }
 0x345   : > { %v2031_v38 = vpop.permute.xlu1 %2030  ;;  %p6895_p1 = scmp.ne.s32.totalorder %s6893_s23, 0 }
 0x346   : > { %v2158_v30 = vsel %vm2155_vm2, %v2141_v11, %v2031_v38  ;;  %v6037_v38 = vld [vmem:[%s5341_s8 + $0x18] sm:$0xff] }
 0x347   : > { %v5967_v24 = vpop.permute.xlu0 %1978  ;;  %4518 = vmatmul.mubr.f32.gmra.mxu0 %v6037_v38  ;;  %p4975_p3 = pnand %p4974_p10, %p6895_p1 }
 0x349   : > { %v5971_v45 = vpop.permute.xlu1 %2034  ;;  %p4976_p7 = pneg %p4975_p3 }
 0x34b   : > { %v2029_v28 = vpop.permute.xlu0 %2028 }
 0x34c   : > { %v2157_v61 = vsel %vm2155_vm2, %v2140_v55, %v2029_v28  ;;  %v2490_v28 = vld [vmem:[%s6832_s7 + $0x118] sm:$0xff] }
 0x34d   : > { %v5973_v47 = vpop.permute.xlu1 %2038 }
 0x34f   : > { %v2027_v43 = vpop.permute.xlu0 %2026 }
 0x350   : > { %v2156_v62 = vsel %vm2155_vm2, %v2139_v57, %v2027_v43  ;;  %v2160_v57 = vsel %vm2155_vm2, %v2143_v31, %v5971_v45  ;;  %v6067_v45 = vld [vmem:[%s5341_s8 + $0x28] sm:$0xff]  ;;  %v2469_v31 = vld [vmem:[%s6832_s7 + $0x70] sm:$0xff] }
 0x353   : > { %v2033_v48 = vpop.permute.xlu0 %2032 }
 0x354   : > { %v2159_v42 = vsel %vm2155_vm2, %v2142_v18, %v2033_v48  ;;  %v2487_v48 = vld [vmem:[%s6832_s7 + $0x100] sm:$0xff] }
 0x357   : > { %v5975_v53 = vpop.permute.xlu0 %2036 }
 0x35b   : > { %v5985_v7 = vpop.permute.xlu0 %2040 }
 0x373   : > { %v2093_v52 = vpop.permute.xlu1 %2092 }
 0x374   : > { %v2174_v2 = vsel %vm2172_vm3, %v2157_v61, %v2093_v52  ;;  %v6044_v52 = vld [vmem:[%s5341_s8 + $0x20] sm:$0xff] }
 0x375   : > { %v2401_v9 = vadd.f32 %v4404_v50, %v2174_v2  ;;  %4520 = vmatprep.mubr.f32.mxu0 %v6044_v52 }
 0x376   : > { %4521 = vmatmul.mubr.f32.gmra.mxu0 %v6067_v45 }
 0x377   : > { %v2091_v1 = vpop.permute.xlu1 %2090  ;;  %v6018_v16 = vadd.f32 %v5990_v29, %v2401_v9  ;;  %4523 = vmatprep.mubr.f32.mxu0 %v6075_v36  ;;  %v6093_v9 = vld [vmem:[%s5341_s8 + $0x38] sm:$0xff] }
 0x378   : > { %v2173_v4 = vsel %vm2172_vm3, %v2156_v62, %v2091_v1  ;;  %v2484_v62 = vld [vmem:[%s6832_s7 + $0xe8] sm:$0xff]  ;;  %v2161_v1 = vsel %vm2155_vm2, %v2144_v39, %v5975_v53  ;;  %v2481_v53 = vld [vmem:[%s6832_s7 + $0xd0] sm:$0xff] }
 0x379   : > { %v2400_v8 = vadd.f32 %v2321_v58, %v2173_v4 }
 0x37a   : > { %4524 = vmatmul.mubr.f32.gmra.mxu0 %v6093_v9 }
 0x37b   : > { %v5993_v10 = vadd.f32 %v5990_v29, %v2400_v8  ;;  %v5995_v25 = vpop.permute.xlu1 %2042 }
 0x37d   : > { %v2095_v14 = vpop.permute.xlu0 %2094  ;;  %2585 = vmatmul.mubr.f32.vlgmr.msra.gmra.mxu1 %v5993_v10 }
 0x37e   : > { %4427 = vmatpush3.msra.mxu1 %v5912_v59  ;;  %v2175_v35 = vsel %vm2172_vm3, %v2158_v30, %v2095_v14  ;;  %2590 = vmatprep.mubr.f32.mxu1 %v5095_v0  ;;  %v4410_v59 = vpop.f32.mrf.mxu1  ;;  %v6101_v30 = vld [vmem:[%s5341_s8 + $0x40] sm:$0xff]  ;;  %v2145_v14 = vsel %vm2138_vm1, %v5717_v44, %v5962_v23  ;;  %v2472_v44 = vld [vmem:[%s6832_s7 + $0x88] sm:$0xff] }
 0x37f   : > { %v2402_v33 = vadd.f32 %v2331_v32, %v2175_v35  ;;  %v6020_v40 = vpop.permute.xlu1 %1980  ;;  %4428 = vmatprep.subr.mxu1 %v2499_v12  ;;  %4526 = vmatprep.mubr.f32.mxu0 %v6101_v30  ;;  %v6120_v23 = vld [vmem:[%s5341_s8 + $0x48] sm:$0xff] }
 0x380   : > { %4429 = vmatpush3.msra.mxu1 %v2499_v12  ;;  %v2341_v55 = vpop.f32.mrf.mxu1  ;;  %4527 = vmatmul.mubr.f32.gmra.mxu0 %v6120_v23 }
 0x381   : > { %v6026_v19 = vpop.permute.xlu0 %2044  ;;  %2591 = vmatmul.mubr.f32.gmra.mxu1 %v6018_v16  ;;  %4430 = vmatprep.subr.mxu1 %v2496_v34  ;;  %v6041_v43 = vadd.f32 %v5990_v29, %v2402_v33  ;;  %v2162_v33 = vsel %vm2155_vm2, %v2145_v14, %v5973_v47 }
 0x382   : > { %2596 = vmatprep.mubr.f32.mxu1 %v5095_v0  ;;  %4431 = vmatpush3.msra.mxu1 %v2496_v34  ;;  %v6079_v6 = vpop.f32.mrf.mxu1  ;;  %v2475_v34 = vld [vmem:[%s6832_s7 + $0xa0] sm:$0xff] }
 0x383   : > { %v2097_v50 = vpop.permute.xlu1 %2096  ;;  %4432 = vmatprep.subr.mxu1 %v2493_v17 }
 0x384   : > { %v2176_v21 = vsel %vm2172_vm3, %v2159_v42, %v2097_v50  ;;  %4433 = vmatpush3.msra.mxu1 %v2493_v17  ;;  %v2351_v35 = vpop.f32.mrf.mxu1  ;;  %v6128_v42 = vld [vmem:[%s5341_s8 + $0x50] sm:$0xff] }
 0x385   : > { %v2403_v58 = vadd.f32 %v4407_v5, %v2176_v21  ;;  %v2099_v61 = vpop.permute.xlu0 %2098  ;;  %2597 = vmatmul.mubr.f32.gmra.mxu1 %v6041_v43  ;;  %4434 = vmatprep.subr.mxu1 %v2490_v28 }
 0x386   : > { %v2177_v20 = vsel %vm2172_vm3, %v2160_v57, %v2099_v61  ;;  %2602 = vmatprep.mubr.f32.mxu1 %v5095_v0  ;;  %4435 = vmatpush3.msra.mxu1 %v2490_v28  ;;  %v4416_v50 = vpop.f32.mrf.mxu1  ;;  %v6146_v57 = vld [vmem:[%s5341_s8 + $0x58] sm:$0xff] }
 0x387   : > { %v2404_v2 = vadd.f32 %v2341_v55, %v2177_v20  ;;  %v2101_v4 = vpop.permute.xlu1 %2100  ;;  %v6072_v5 = vadd.f32 %v5990_v29, %v2403_v58  ;;  %4436 = vmatprep.subr.mxu1 %v2487_v48  ;;  %4529 = vmatprep.mubr.f32.mxu0 %v6128_v42  ;;  %v2146_v55 = vsel %vm2138_vm1, %v5713_v41, %v5969_v27  ;;  %v6154_v20 = vld [vmem:[%s5341_s8 + $0x60] sm:$0xff] }
 0x388   : > { %v2178_v37 = vsel %vm2172_vm3, %v2161_v1, %v2101_v4  ;;  %4437 = vmatpush3.msra.mxu1 %v2487_v48  ;;  %v2466_v48 = vld [vmem:[%s6832_s7 + $0x58] sm:$0xff]  ;;  %v2163_v58 = vsel %vm2155_vm2, %v2146_v55, %v5985_v7  ;;  %4530 = vmatmul.mubr.f32.gmra.mxu0 %v6146_v57  ;;  %v2147_v41 = vsel %vm2138_vm1, %v5722_v49, %v5967_v24  ;;  %v2463_v1 = vld [vmem:[%s6832_s7 + $0x40] sm:$0xff]  ;;  %v6178_v4 = vld [vmem:[%s5341_s8 + $0x68] sm:$0xff] }
 0x389   : > { %v6085_v8 = vpop.permute.xlu0 %1982  ;;  %2603 = vmatmul.mubr.f32.gmra.mxu1 %v6072_v5  ;;  %4438 = vmatprep.subr.mxu1 %v2484_v62  ;;  %v6096_v11 = vadd.f32 %v5990_v29, %v2404_v2  ;;  %v2405_v32 = vadd.f32 %v4410_v59, %v2178_v37  ;;  %v2148_v27 = vsel %vm2138_vm1, %v5719_v46, %v6020_v40  ;;  %v2460_v40 = vld [vmem:[%s6832_s7 + $0x28] sm:$0xff] }
 0x38a   : > { %2608 = vmatprep.mubr.f32.mxu1 %v5095_v0  ;;  %4439 = vmatpush3.msra.mxu1 %v2484_v62  ;;  %v2361_v62 = vpop.f32.mrf.mxu1  ;;  %v2164_v2 = vsel %vm2155_vm2, %v2147_v41, %v5995_v25  ;;  %v2165_v25 = vsel %vm2155_vm2, %v2148_v27, %v6026_v19 }
 0x38b   : > { %v6098_v12 = vpop.permute.xlu1 %2046  ;;  %4440 = vmatprep.subr.mxu1 %v2481_v53  ;;  %v6125_v47 = vadd.f32 %v5990_v29, %v2405_v32  ;;  %4532 = vmatprep.mubr.f32.mxu0 %v6154_v20 }
 0x38c   : > { %4441 = vmatpush3.msra.mxu1 %v2481_v53  ;;  %4533 = vmatmul.mubr.f32.gmra.mxu0 %v6178_v4  ;;  %v4419_v14 = vpop.f32.mrf.mxu1 }
 0x38d   : > { %v2103_v59 = vpop.permute.xlu0 %2102  ;;  %2609 = vmatmul.mubr.f32.gmra.mxu1 %v6096_v11  ;;  %4442 = vmatprep.subr.mxu1 %v2478_v26 }
 0x38e   : > { %v2179_v17 = vsel %vm2172_vm3, %v2162_v33, %v2103_v59  ;;  %2614 = vmatprep.mubr.f32.mxu1 %v5095_v0  ;;  %4443 = vmatpush3.msra.mxu1 %v2478_v26  ;;  %v6186_v26 = vld [vmem:[%s5341_s8 + $0x70] sm:$0xff]  ;;  %v2872_v33 = vld [vmem:[#allocation8 + $0x170] sm:$0xff]  ;;  %v6200_v59 = vld [vmem:[%s5341_s8 + $0x78] sm:$0xff] }
 0x38f   : > { %v2406_v18 = vadd.f32 %v2351_v35, %v2179_v17  ;;  %v6122_v28 = vpop.permute.xlu1 %1984  ;;  %4444 = vmatprep.subr.mxu1 %v2475_v34  ;;  %v2457_v35 = vld [vmem:[%s6832_s7 + $0x10] sm:$0xff]  ;;  %4535 = vmatprep.mubr.f32.mxu0 %v6186_v26 }
 0x390   : > { %4445 = vmatpush3.msra.mxu1 %v2475_v34  ;;  %v2149_v34 = vsel %vm2138_vm1, %v5728_v54, %v6085_v8  ;;  %4536 = vmatmul.mubr.f32.gmra.mxu0 %v6200_v59 }
 0x391   : > { %v6135_v21 = vpop.permute.xlu0 %2048  ;;  %2615 = vmatmul.mubr.f32.gmra.mxu1 %v6125_v47  ;;  %4446 = vmatprep.subr.mxu1 %v2472_v44  ;;  %v6151_v61 = vadd.f32 %v5990_v29, %v2406_v18  ;;  %v2166_v55 = vsel %vm2155_vm2, %v2149_v34, %v6098_v12 }
 0x392   : > { %2620 = vmatprep.mubr.f32.mxu1 %v5095_v0  ;;  %4447 = vmatpush3.msra.mxu1 %v2472_v44 }
 0x393   : > { %v2105_v39 = vpop.permute.xlu1 %2104  ;;  %4448 = vmatprep.subr.mxu1 %v2469_v31 }
 0x394   : > { %v2180_v7 = vsel %vm2172_vm3, %v2163_v58, %v2105_v39  ;;  %4449 = vmatpush3.msra.mxu1 %v2469_v31  ;;  %v2371_v31 = vpop.f32.mrf.mxu1  ;;  %v2150_v39 = vsel %vm2138_vm1, %v5725_v51, %v6122_v28 }
 0x395   : > { %v2407_v49 = vadd.f32 %v6079_v6, %v2180_v7  ;;  %v2107_v24 = vpop.permute.xlu0 %2106  ;;  %2621 = vmatmul.mubr.f32.gmra.mxu1 %v6151_v61  ;;  %4450 = vmatprep.subr.mxu1 %v2466_v48  ;;  %v2167_v7 = vsel %vm2155_vm2, %v2150_v39, %v6135_v21 }
 0x396   : > { %v2181_v46 = vsel %vm2172_vm3, %v2164_v2, %v2107_v24  ;;  %2626 = vmatprep.mubr.f32.mxu1 %v5095_v0  ;;  %4451 = vmatpush3.msra.mxu1 %v2466_v48  ;;  %v4422_v41 = vpop.f32.mrf.mxu1 }
 0x397   : > { %v2408_v37 = vadd.f32 %v2361_v62, %v2181_v46  ;;  %v2109_v6 = vpop.permute.xlu1 %2108  ;;  %v6183_v53 = vadd.f32 %v5990_v29, %v2407_v49  ;;  %4452 = vmatprep.subr.mxu1 %v2463_v1 }
 0x398   : > { %v2182_v32 = vsel %vm2172_vm3, %v2165_v25, %v2109_v6  ;;  %4453 = vmatpush3.msra.mxu1 %v2463_v1  ;;  %v2381_v28 = vpop.f32.mrf.mxu1 }
 0x399   : > { %v1987_v19 = vpop.permute.xlu0 %1986  ;;  %2627 = vmatmul.mubr.f32.gmra.mxu1 %v6183_v53  ;;  %4454 = vmatprep.subr.mxu1 %v2460_v40  ;;  %v6203_v17 = vadd.f32 %v5990_v29, %v2408_v37  ;;  %v2409_v44 = vadd.f32 %v4416_v50, %v2182_v32 }
 0x39a   : > { %2632 = vmatprep.mubr.f32.mxu1 %v5095_v0  ;;  %4455 = vmatpush3.msra.mxu1 %v2460_v40  ;;  %v2151_v12 = vsel %vm2138_vm1, %v5739_v60, %v1987_v19  ;;  %v4425_v6 = vpop.f32.mrf.mxu1 }
 0x39b   : > { %v2051_v18 = vpop.permute.xlu1 %2050  ;;  %4456 = vmatprep.subr.mxu1 %v2457_v35  ;;  %v6212_v50 = vadd.f32 %v5990_v29, %v2409_v44 }
 0x39c   : > { %4457 = vmatpush3.msra.mxu1 %v2457_v35  ;;  %v2168_v49 = vsel %vm2155_vm2, %v2151_v12, %v2051_v18  ;;  %v2391_v44 = vpop.f32.mrf.mxu1 }
 0x39d   : > { %v2111_v54 = vpop.permute.xlu0 %2110  ;;  %2633 = vmatmul.mubr.f32.gmra.mxu1 %v6203_v17  ;;  %2891 = vmatprep.subr.mxu1 %v2872_v33 }
 0x39e   : > { %v2183_v8 = vsel %vm2172_vm3, %v2166_v55, %v2111_v54  ;;  %2638 = vmatprep.mubr.f32.mxu1 %v5095_v0 }
 0x39f   : > { %v2410_v48 = vadd.f32 %v2371_v31, %v2183_v8  ;;  %v1989_v58 = vpop.permute.xlu1 %1988 }
 0x3a0   : > { %v2152_v2 = vsel %vm2138_vm1, %v5735_v56, %v1989_v58 }
 0x3a1   : > { %v2053_v27 = vpop.permute.xlu0 %2052  ;;  %2639 = vmatmul.mubr.f32.gmra.mxu1 %v6212_v50  ;;  %v6224_v62 = vadd.f32 %v5990_v29, %v2410_v48 }
 0x3a2   : > { %2644 = vmatprep.mubr.f32.mxu1 %v5095_v0  ;;  %v2169_v21 = vsel %vm2155_vm2, %v2152_v2, %v2053_v27  ;;  %v2868_v2 = vld [vmem:[#allocation8 + $0x150] sm:$0xff] }
 0x3a3   : > { %v2113_v1 = vpop.permute.xlu1 %2112 }
 0x3a4   : > { %v2184_v51 = vsel %vm2172_vm3, %v2167_v7, %v2113_v1  ;;  %v2871_v7 = vld [vmem:[#allocation8 + $0x168] sm:$0xff]  ;;  %v2869_v1 = vld [vmem:[#allocation8 + $0x158] sm:$0xff] }
 0x3a5   : > { %v2411_v24 = vadd.f32 %v4419_v14, %v2184_v51  ;;  %v2115_v46 = vpop.permute.xlu0 %2114  ;;  %2645 = vmatmul.mubr.f32.gmra.mxu1 %v6224_v62  ;;  %v2866_v51 = vld [vmem:[#allocation8 + $0x140] sm:$0xff] }
 0x3a6   : > { %v2185_v60 = vsel %vm2172_vm3, %v2168_v49, %v2115_v46  ;;  %2650 = vmatprep.mubr.f32.mxu1 %v5095_v0  ;;  %v2863_v49 = vld [vmem:[#allocation8 + $0x128] sm:$0xff]  ;;  %v2854_v46 = vld [vmem:[#allocation8 + $0xe0] sm:$0xff] }
 0x3a7   : > { %v2412_v40 = vadd.f32 %v2381_v28, %v2185_v60  ;;  %v2117_v25 = vpop.permute.xlu1 %2116  ;;  %v6235_v37 = vadd.f32 %v5990_v29, %v2411_v24  ;;  %v2865_v28 = vld [vmem:[#allocation8 + $0x138] sm:$0xff]  ;;  %v2859_v24 = vld [vmem:[#allocation8 + $0x108] sm:$0xff] }
 0x3a8   : > { %v2186_v56 = vsel %vm2172_vm3, %v2169_v21, %v2117_v25  ;;  %v2853_v60 = vld [vmem:[#allocation8 + $0xd8] sm:$0xff]  ;;  %v2848_v21 = vld [vmem:[#allocation8 + $0xb0] sm:$0xff]  ;;  %v2842_v25 = vld [vmem:[#allocation8 + $0x80] sm:$0xff] }
 0x3a9   : > { %v1991_v32 = vpop.permute.xlu0 %1990  ;;  %2651 = vmatmul.mubr.f32.gmra.mxu1 %v6235_v37  ;;  %v6243_v35 = vadd.f32 %v5990_v29, %v2412_v40  ;;  %v2413_v19 = vadd.f32 %v4422_v41, %v2186_v56  ;;  %v2847_v40 = vld [vmem:[#allocation8 + $0xa8] sm:$0xff]  ;;  %v2841_v56 = vld [vmem:[#allocation8 + $0x78] sm:$0xff] }
 0x3aa   : > { %v2153_v14 = vsel %vm2138_vm1, %v5750_v3, %v1991_v32  ;;  %2656 = vmatprep.mubr.f32.mxu1 %v5095_v0  ;;  %v2835_v32 = vld [vmem:[#allocation8 + $0x48] sm:$0xff] }
 0x3ab   : > { %v2055_v34 = vpop.permute.xlu1 %2054  ;;  %v6250_v3 = vadd.f32 %v5990_v29, %v2413_v19  ;;  %v2829_v19 = vld [vmem:[#allocation8 + $0x18] sm:$0xff] }
 0x3ac   : > { %v2170_v33 = vsel %vm2155_vm2, %v2153_v14, %v2055_v34  ;;  %v2830_v14 = vld [vmem:[#allocation8 + $0x20] sm:$0xff] }
 0x3ad   : > { %v2119_v18 = vpop.permute.xlu0 %2118  ;;  %2657 = vmatmul.mubr.f32.gmra.mxu1 %v6243_v35 }
 0x3ae   : > { %v2187_v31 = vsel %vm2172_vm3, %v2170_v33, %v2119_v18  ;;  %2662 = vmatprep.mubr.f32.mxu1 %v5095_v0  ;;  %v3557_v33 = vld [vmem:[%s6836_s11 + $0x40] sm:$0xff]  ;;  %v3556_v18 = vld [vmem:[%s6836_s11 + $0x38] sm:$0xff] }
 0x3af   : > { %v2414_v55 = vadd.f32 %v2391_v44, %v2187_v31  ;;  %v1993_v54 = vpop.permute.xlu1 %1992 }
 0x3b0   : > { %v2154_v8 = vsel %vm2138_vm1, %v5744_v63, %v1993_v54 }
 0x3b1   : > { %v2057_v48 = vpop.permute.xlu0 %2056  ;;  %2663 = vmatmul.mubr.f32.gmra.mxu1 %v6250_v3  ;;  %v6258_v39 = vadd.f32 %v5990_v29, %v2414_v55  ;;  %v3555_v55 = vld [vmem:[%s6836_s11 + $0x30] sm:$0xff] }
 0x3b2   : > { %v2171_v58 = vsel %vm2155_vm2, %v2154_v8, %v2057_v48  ;;  %2668 = vmatprep.mubr.f32.mxu1 %v5095_v0  ;;  %v3553_v48 = vld [vmem:[%s6836_s11 + $0x20] sm:$0xff] }
 0x3b3   : > { %v2121_v41 = vpop.permute.xlu1 %2120 }
 0x3b4   : > { %v2188_v27 = vsel %vm2172_vm3, %v2171_v58, %v2121_v41 }
 0x3b5   : > { %v2415_v12 = vadd.f32 %v4425_v6, %v2188_v27  ;;  %2669 = vmatmul.mubr.f32.gmra.mxu1 %v6258_v39  ;;  %v2836_v6 = vld [vmem:[#allocation8 + $0x50] sm:$0xff]  ;;  %v3551_v27 = vld [vmem:[%s6836_s11 + $0x10] sm:$0xff] }
 0x3b6   : > { %2674 = vmatprep.mubr.f32.mxu1 %v5095_v0 }
 0x3b7   : > { %v6264_v63 = vadd.f32 %v5990_v29, %v2415_v12  ;;  %v2862_v29 = vld [vmem:[#allocation8 + $0x120] sm:$0xff] }
 0x3b9   : > { %2675 = vmatmul.mubr.f32.gmra.mxu1 %v6264_v63 }
 0x3ba   : > { %4458 = vmatprep.mubr.f32.mxu1 %v5993_v10  ;;  %v2860_v10 = vld [vmem:[#allocation8 + $0x110] sm:$0xff] }
 0x3bd   : > { %4459 = vmatmul.mubr.f32.vlgmr.msra.gmra.mxu1 %v6018_v16  ;;  %v2857_v16 = vld [vmem:[#allocation8 + $0xf8] sm:$0xff] }
 0x3be   : > { %2892 = vmatpush1.msra.mxu1 %v2871_v7  ;;  %4461 = vmatprep.mubr.f32.mxu1 %v6041_v43  ;;  %v2856_v43 = vld [vmem:[#allocation8 + $0xf0] sm:$0xff]  ;;  %v3550_v7 = vld [vmem:[%s6836_s11 + $0x8] sm:$0xff] }
 0x3bf   : > { %2893 = vmatprep.subr.mxu1 %v2869_v1 }
 0x3c0   : > { %2894 = vmatpush1.msra.mxu1 %v2868_v2 }
 0x3c1   : > { %2895 = vmatprep.subr.mxu1 %v2866_v51  ;;  %4462 = vmatmul.mubr.f32.gmra.mxu1 %v6072_v5  ;;  %v2851_v5 = vld [vmem:[#allocation8 + $0xc8] sm:$0xff]  ;;  %v3549_v51 = vld [vmem:[%s6836_s11] sm:$0xff] }
 0x3c2   : > { %2896 = vmatpush1.msra.mxu1 %v2865_v28  ;;  %4464 = vmatprep.mubr.f32.mxu1 %v6096_v11  ;;  %v2850_v11 = vld [vmem:[#allocation8 + $0xc0] sm:$0xff] }
 0x3c3   : > { %2897 = vmatprep.subr.mxu1 %v2863_v49 }
 0x3c4   : > { %2898 = vmatpush1.msra.mxu1 %v2862_v29 }
 0x3c5   : > { %2899 = vmatprep.subr.mxu1 %v2860_v10  ;;  %4465 = vmatmul.mubr.f32.gmra.mxu1 %v6125_v47  ;;  %v2845_v47 = vld [vmem:[#allocation8 + $0x98] sm:$0xff]  ;;  %v2505_v10 = vlaneseq }
 0x3c6   : > { %2900 = vmatpush1.msra.mxu1 %v2859_v24  ;;  %4467 = vmatprep.mubr.f32.mxu1 %v6151_v61  ;;  %v2844_v61 = vld [vmem:[#allocation8 + $0x90] sm:$0xff] }
 0x3c7   : > { %2901 = vmatprep.subr.mxu1 %v2857_v16 }
 0x3c8   : > { %2902 = vmatpush1.msra.mxu1 %v2856_v43  ;;  %v6415_v43 = vshrl.u32 %v2505_v10, 7 }
 0x3c9   : > { %2903 = vmatprep.subr.mxu1 %v2854_v46  ;;  %4468 = vmatmul.mubr.f32.gmra.mxu1 %v6183_v53  ;;  %v2839_v53 = vld [vmem:[#allocation8 + $0x68] sm:$0xff] }
 0x3ca   : > { %2904 = vmatpush1.msra.mxu1 %v2853_v60  ;;  %4470 = vmatprep.mubr.f32.mxu1 %v6203_v17  ;;  %v2838_v17 = vld [vmem:[#allocation8 + $0x60] sm:$0xff] }
 0x3cb   : > { %2905 = vmatprep.subr.mxu1 %v2851_v5  ;;  %v2507_v5 = vsub.s32 0, %v6415_v43 }
 0x3cc   : > { %2906 = vmatpush1.msra.mxu1 %v2850_v11  ;;  %v2503_v11 = vld [vmem:[%s6834_s9] sm:$0x7] }
 0x3cd   : > { %2907 = vmatprep.subr.mxu1 %v2848_v21  ;;  %4471 = vmatmul.mubr.f32.gmra.mxu1 %v6212_v50  ;;  %v2833_v50 = vld [vmem:[#allocation8 + $0x38] sm:$0xff] }
 0x3ce   : > { %2908 = vmatpush1.msra.mxu1 %v2847_v40  ;;  %4473 = vmatprep.mubr.f32.mxu1 %v6224_v62  ;;  %v2832_v62 = vld [vmem:[#allocation8 + $0x30] sm:$0xff]  ;;  %v2511_v40 = vsub.s32 1, %v6415_v43 }
 0x3cf   : > { %2909 = vmatprep.subr.mxu1 %v2845_v47 }
 0x3d0   : > { %2910 = vmatpush1.msra.mxu1 %v2844_v61  ;;  %v6430_v61 = vrot.slane %v2503_v11, %v2507_v5 }
 0x3d1   : > { %2911 = vmatprep.subr.mxu1 %v2842_v25  ;;  %4474 = vmatmul.mubr.f32.gmra.mxu1 %v6235_v37  ;;  %v2827_v37 = vld [vmem:[#allocation8 + $0x8] sm:$0xff] }
 0x3d2   : > { %2912 = vmatpush1.msra.mxu1 %v2841_v56  ;;  %4476 = vmatprep.mubr.f32.mxu1 %v6243_v35  ;;  %v2826_v35 = vld [vmem:[#allocation8] sm:$0xff]  ;;  %v6432_v56 = vrot.slane %v2503_v11, %v2511_v40 }
 0x3d3   : > { %2913 = vmatprep.subr.mxu1 %v2839_v53 }
 0x3d4   : > { %2914 = vmatpush1.msra.mxu1 %v2838_v17 }
 0x3d5   : > { %2915 = vmatprep.subr.mxu1 %v2836_v6  ;;  %4477 = vmatmul.mubr.f32.gmra.mxu1 %v6250_v3  ;;  %v3554_v3 = vld [vmem:[%s6836_s11 + $0x28] sm:$0xff] }
 0x3d6   : > { %2916 = vmatpush1.msra.mxu1 %v2835_v32  ;;  %4479 = vmatprep.mubr.f32.mxu1 %v6258_v39  ;;  %v3552_v39 = vld [vmem:[%s6836_s11 + $0x18] sm:$0xff] }
 0x3d7   : > { %2917 = vmatprep.subr.mxu1 %v2833_v50 }
 0x3d8   : > { %2918 = vmatpush1.msra.mxu1 %v2832_v62 }
 0x3d9   : > { %2919 = vmatprep.subr.mxu1 %v2830_v14  ;;  %4480 = vmatmul.mubr.f32.gmra.mxu1 %v6264_v63 }
 0x3da   : > { %2920 = vmatpush1.msra.mxu1 %v2829_v19  ;;  %2955 = vmatprep.mubr.f32.mxu1 %v5095_v0 }
 0x3db   : > { %2921 = vmatprep.subr.mxu1 %v2827_v37 }
 0x3dc   : > { %2922 = vmatpush1.msra.mxu1 %v2826_v35 }
 0x3dd   : > { %2956 = vmatmul.mubr.f32.vlgmr.msra.gmra.mxu1 %v5960_v22  ;;  %v3564_v22 = vld [vmem:[%s6836_s11 + $0x78] sm:$0xff] }
 0x3de   : > { %2961 = vmatprep.mubr.f32.mxu1 %v5095_v0  ;;  %4538 = vmatprep.subr.mxu1 %v3564_v22 }
 0x3df   : > { %4539 = vmatpush3.msra.mxu1 %v3564_v22 }
 0x3e1   : > { %2962 = vmatmul.mubr.f32.gmra.mxu1 %v6003_v13 }
 0x3e2   : > { %2967 = vmatprep.mubr.f32.mxu1 %v5095_v0 }
 0x3e5   : > { %2968 = vmatmul.mubr.f32.gmra.mxu1 %v6015_v15  ;;  %v3563_v15 = vld [vmem:[%s6836_s11 + $0x70] sm:$0xff] }
 0x3e6   : > { %2973 = vmatprep.mubr.f32.mxu1 %v5095_v0  ;;  %4540 = vmatprep.subr.mxu1 %v3563_v15 }
 0x3e7   : > { %4541 = vmatpush3.msra.mxu1 %v3563_v15 }
 0x3e9   : > { %2974 = vmatmul.mubr.f32.gmra.mxu1 %v6037_v38 }
 0x3ea   : > { %2979 = vmatprep.mubr.f32.mxu1 %v5095_v0 }
 0x3ed   : > { %2980 = vmatmul.mubr.f32.gmra.mxu1 %v6044_v52 }
 0x3ee   : > { %2985 = vmatprep.mubr.f32.mxu1 %v5095_v0 }
 0x3f1   : > { %2986 = vmatmul.mubr.f32.gmra.mxu1 %v6067_v45 }
 0x3f2   : > { %2991 = vmatprep.mubr.f32.mxu1 %v5095_v0 }
 0x3f5   : > { %2992 = vmatmul.mubr.f32.gmra.mxu1 %v6075_v36  ;;  %v3562_v36 = vld [vmem:[%s6836_s11 + $0x68] sm:$0xff] }
 0x3f6   : > { %2997 = vmatprep.mubr.f32.mxu1 %v5095_v0  ;;  %4542 = vmatprep.subr.mxu1 %v3562_v36 }
 0x3f7   : > { %4543 = vmatpush3.msra.mxu1 %v3562_v36 }
 0x3f9   : > { %2998 = vmatmul.mubr.f32.gmra.mxu1 %v6093_v9 }
 0x3fa   : > { %3003 = vmatprep.mubr.f32.mxu1 %v5095_v0 }
 0x3fd   : > { %3004 = vmatmul.mubr.f32.gmra.mxu1 %v6101_v30  ;;  %v3561_v30 = vld [vmem:[%s6836_s11 + $0x60] sm:$0xff] }
 0x3fe   : > { %3009 = vmatprep.mubr.f32.mxu1 %v5095_v0  ;;  %4544 = vmatprep.subr.mxu1 %v3561_v30 }
 0x3ff   : > { %4545 = vmatpush3.msra.mxu1 %v3561_v30 }
 0x401   : > { %3010 = vmatmul.mubr.f32.gmra.mxu1 %v6120_v23 }
 0x402   : > { %3015 = vmatprep.mubr.f32.mxu1 %v5095_v0 }
 0x405   : > { %3016 = vmatmul.mubr.f32.gmra.mxu1 %v6128_v42  ;;  %v3560_v42 = vld [vmem:[%s6836_s11 + $0x58] sm:$0xff] }
 0x406   : > { %3021 = vmatprep.mubr.f32.mxu1 %v5095_v0  ;;  %4546 = vmatprep.subr.mxu1 %v3560_v42 }
 0x407   : > { %4547 = vmatpush3.msra.mxu1 %v3560_v42 }
 0x409   : > { %3022 = vmatmul.mubr.f32.gmra.mxu1 %v6146_v57 }
 0x40a   : > { %3027 = vmatprep.mubr.f32.mxu1 %v5095_v0 }
 0x40d   : > { %3028 = vmatmul.mubr.f32.gmra.mxu1 %v6154_v20  ;;  %v3559_v20 = vld [vmem:[%s6836_s11 + $0x50] sm:$0xff] }
 0x40e   : > { %3033 = vmatprep.mubr.f32.mxu1 %v5095_v0  ;;  %4548 = vmatprep.subr.mxu1 %v3559_v20 }
 0x40f   : > { %4549 = vmatpush3.msra.mxu1 %v3559_v20  ;;  %v6853_v20 = vsub.s32 2, %v6415_v43 }
 0x411   : > { %3034 = vmatmul.mubr.f32.gmra.mxu1 %v6178_v4 }
 0x412   : > { %3039 = vmatprep.mubr.f32.mxu1 %v5095_v0 }
 0x415   : > { %3040 = vmatmul.mubr.f32.gmra.mxu1 %v6186_v26 }
 0x416   : > { %3045 = vmatprep.mubr.f32.mxu1 %v5095_v0 }
 0x419   : > { %3046 = vmatmul.mubr.f32.gmra.mxu1 %v6200_v59  ;;  %v3558_v59 = vld [vmem:[%s6836_s11 + $0x48] sm:$0xff] }
 0x41a   : > { %4550 = vmatprep.subr.mxu1 %v3558_v59 }
 0x41b   : > { %4551 = vmatpush3.msra.mxu1 %v3558_v59 }
 0x41c   : > { %4552 = vmatprep.subr.mxu1 %v3557_v33 }
 0x41d   : > { %4553 = vmatpush3.msra.mxu1 %v3557_v33 }
 0x41e   : > { %4554 = vmatprep.subr.mxu1 %v3556_v18 }
 0x41f   : > { %4555 = vmatpush3.msra.mxu1 %v3556_v18  ;;  %v6472_v18 = vld [vmem:[%s6884_s26] sm:$0x7] }
 0x420   : > { %4556 = vmatprep.subr.mxu1 %v3555_v55 }
 0x421   : > { %4557 = vmatpush3.msra.mxu1 %v3555_v55  ;;  %v6476_v55 = vrot.slane %v2503_v11, %v6853_v20 }
 0x422   : > { %4558 = vmatprep.subr.mxu1 %v3554_v3 }
 0x423   : > { %4559 = vmatpush3.msra.mxu1 %v3554_v3 }
 0x424   : > { %4560 = vmatprep.subr.mxu1 %v3553_v48 }
 0x425   : > { %4561 = vmatpush3.msra.mxu1 %v3553_v48 }
 0x426   : > { %4562 = vmatprep.subr.mxu1 %v3552_v39 }
 0x427   : > { %4563 = vmatpush3.msra.mxu1 %v3552_v39  ;;  %v6482_v39 = vrot.slane %v6472_v18, %v2507_v5 }
 0x428   : > { %4564 = vmatprep.subr.mxu1 %v3551_v27 }
 0x429   : > { %4565 = vmatpush3.msra.mxu1 %v3551_v27 }
 0x42a   : > { %4566 = vmatprep.subr.mxu1 %v3550_v7 }
 0x42b   : > { %4567 = vmatpush3.msra.mxu1 %v3550_v7  ;;  %v6487_v7 = vrot.slane %v6472_v18, %v2511_v40 }
 0x42c   : > { %4568 = vmatprep.subr.mxu1 %v3549_v51 }
 0x42d   : > { %4569 = vmatpush3.msra.mxu1 %v3549_v51 }
 0x43d   : > { %v6318_v13 = vpop.f32.mrf.mxu1 }
 0x43e   : > { %v2587_v10 = vadd.f32 %v6318_v13, %v6430_v61 }
 0x43f   : > { %v6323_v38 = vpop.f32.mrf.mxu1 }
 0x441   : > { %v6325_v52 = vpop.f32.mrf.mxu1 }
 0x443   : > { %v6327_v0 = vpop.f32.mrf.mxu1 }
 0x444   : > { %v2595_v13 = vadd.f32 %v6327_v0, %v6432_v56 }
 0x445   : > { %v6329_v45 = vpop.f32.mrf.mxu1 }
 0x447   : > { %v6334_v9 = vpop.f32.mrf.mxu1 }
 0x449   : > { %v6339_v23 = vpop.f32.mrf.mxu1 }
 0x44b   : > { %v6344_v57 = vpop.f32.mrf.mxu1 }
 0x44d   : > { %v6349_v4 = vpop.f32.mrf.mxu1 }
 0x44f   : > { %v6351_v26 = vpop.f32.mrf.mxu1 }
 0x451   : > { %v6356_v34 = vpop.f32.mrf.mxu1 }
 0x453   : > { %v6361_v44 = vpop.f32.mrf.mxu1 }
 0x455   : > { %v6366_v31 = vpop.f32.mrf.mxu1 }
 0x457   : > { %v6371_v54 = vpop.f32.mrf.mxu1 }
 0x459   : > { %v6376_v8 = vpop.f32.mrf.mxu1 }
 0x45b   : > { %v6381_v58 = vpop.f32.mrf.mxu1 }
 0x45d   : > { %v6386_v41 = vpop.f32.mrf.mxu1 }
 0x45f   : > { %v6391_v12 = vpop.f32.mrf.mxu1 }
 0x461   : > { %v6393_v63 = vpop.f32.mrf.mxu1 }
 0x463   : > { %v6398_v1 = vpop.f32.mrf.mxu1 }
 0x465   : > { %v6400_v2 = vpop.f32.mrf.mxu1 }
 0x467   : > { %v6405_v28 = vpop.f32.mrf.mxu1 }
 0x469   : > { %v6407_v49 = vpop.f32.mrf.mxu1 }
 0x46b   : > { %v6409_v29 = vpop.f32.mrf.mxu1 }
 0x46d   : > { %v6411_v24 = vpop.f32.mrf.mxu1 }
 0x46f   : > { %v6413_v16 = vpop.f32.mrf.mxu1 }
 0x471   : > { %v6417_v46 = vpop.f32.mrf.mxu1 }
 0x473   : > { %v6419_v60 = vpop.f32.mrf.mxu1 }
 0x475   : > { %v6425_v21 = vpop.f32.mrf.mxu1 }
 0x477   : > { %v6428_v47 = vpop.f32.mrf.mxu1 }
 0x479   : > { %v2676_v25 = vpop.f32.mrf.mxu1 }
 0x47a   : > { %v6435_v53 = vadd.f32 %v2676_v25, %v6430_v61 }
 0x47b   : > { %v2678_v17 = vpop.f32.mrf.mxu1 }
 0x47c   : > { %v6438_v6 = vadd.f32 %v2678_v17, %v6432_v56  ;;  %v2589_v17 = vadd.f32 %v6323_v38, %v6432_v56 }
 0x47d   : > { %v6440_v32 = vpop.f32.mrf.mxu1 }
 0x47f   : > { %v6442_v50 = vpop.f32.mrf.mxu1 }
 0x481   : > { %v6444_v62 = vpop.f32.mrf.mxu1 }
 0x483   : > { %v6446_v14 = vpop.f32.mrf.mxu1 }
 0x485   : > { %v6448_v19 = vpop.f32.mrf.mxu1 }
 0x487   : > { %v6450_v37 = vpop.f32.mrf.mxu1 }
 0x489   : > { %v6452_v35 = vpop.f32.mrf.mxu1 }
 0x48b   : > { %v6454_v22 = vpop.f32.mrf.mxu1 }
 0x48d   : > { %v6456_v15 = vpop.f32.mrf.mxu1 }
 0x48f   : > { %v6458_v36 = vpop.f32.mrf.mxu1 }
 0x491   : > { %v6460_v30 = vpop.f32.mrf.mxu1 }
 0x492   : > { %6881 = vst [vmem:[#allocation28_spill] sm:$0xff] %v6460_v30 }
 0x493   : > { %v6462_v42 = vpop.f32.mrf.mxu1 }
 0x495   : > { %v6465_v59 = vpop.f32.mrf.mxu1 }
 0x496   : > { %6882 = vst [vmem:[#allocation29_spill] sm:$0xff] %v6465_v59 }
 0x497   : > { %v6467_v33 = vpop.f32.mrf.mxu1 }
 0x498   : > { %6883 = vst [vmem:[#allocation30_spill] sm:$0xff] %v6467_v33 }
 0x499   : > { %v4481_v3 = vpop.f32.mrf.mxu1 }
 0x49a   : > { %v6479_v48 = vadd.f32 %v4481_v3, %v6476_v55 }
 0x49b   : > { %v6484_v27 = vpop.f32.mrf.mxu1 }
 0x49c   : > { %6885 = vst [vmem:[#allocation31_spill] sm:$0xff] %v6479_v48  ;;  %6886 = vst [vmem:[#allocation32_spill] sm:$0xff] %v6484_v27  ;;  %v2593_v48 = vadd.f32 %v6325_v52, %v6430_v61 }
 0x49d   : > { %v2957_v51 = vpop.f32.mrf.mxu1 }
 0x49e   : > { %v2958_v25 = vadd.f32 %v2957_v51, %v6482_v39 }
 0x49f   : > { %v2959_v11 = vpop.f32.mrf.mxu1 }
 0x4a0   : > { %v3197_v3 = vadd.f32 %v2958_v25, %v2587_v10  ;;  %v2960_v20 = vadd.f32 %v2959_v11, %v6487_v7  ;;  %v2599_v10 = vadd.f32 %v6329_v45, %v6430_v61 }
 0x4a1   : > { %v2963_v5 = vpop.f32.mrf.mxu1 }
 0x4a2   : > { %v4056_v27 = vmul.f32 -1.442695, %v3197_v3  ;;  %v3309_v40 = vadd.f32 %v2960_v20, %v2589_v17  ;;  %v2964_v59 = vadd.f32 %v2963_v5, %v6482_v39  ;;  %v2601_v3 = vadd.f32 %v6334_v9, %v6432_v56 }
 0x4a3   : > { %v2965_v33 = vpop.f32.mrf.mxu1 }
 0x4a4   : > { %4687 = vpow2.f32 %v4056_v27  ;;  %v4072_v51 = vmul.f32 -1.442695, %v3309_v40  ;;  %v3198_v30 = vadd.f32 %v2964_v59, %v2593_v48  ;;  %v2966_v38 = vadd.f32 %v2965_v33, %v6487_v7  ;;  %v6510_v40 = vpop.f32.mrf.mxu0 }
 0x4a5   : > { %v2969_v25 = vpop.f32.mrf.mxu1  ;;  %v2605_v59 = vadd.f32 %v6339_v23, %v6430_v61  ;;  %v2611_v23 = vadd.f32 %v6349_v4, %v6430_v61 }
 0x4a6   : > { %4689 = vpow2.f32 %v4072_v51  ;;  %v4057_v11 = vmul.f32 -1.442695, %v3198_v30  ;;  %v3310_v52 = vadd.f32 %v2966_v38, %v2595_v13  ;;  %v2970_v20 = vadd.f32 %v2969_v25, %v6482_v39 }
 0x4a7   : > { %v2971_v17 = vpop.f32.mrf.mxu1  ;;  %v2607_v13 = vadd.f32 %v6344_v57, %v6432_v56 }
 0x4a8   : > { %4691 = vpow2.f32 %v4057_v11  ;;  %v3199_v0 = vadd.f32 %v2970_v20, %v2599_v10  ;;  %v2972_v27 = vadd.f32 %v2971_v17, %v6487_v7  ;;  %v4073_v48 = vmul.f32 -1.442695, %v3310_v52  ;;  %v3118_v17 = vpop.f32.mrf.mxu0 }
 0x4a9   : > { %v2975_v33 = vpop.f32.mrf.mxu1 }
 0x4aa   : > { %v4058_v45 = vmul.f32 -1.442695, %v3199_v0  ;;  %v3311_v5 = vadd.f32 %v2972_v27, %v2601_v3  ;;  %v2976_v30 = vadd.f32 %v2975_v33, %v6482_v39  ;;  %v2613_v3 = vadd.f32 %v6351_v26, %v6432_v56  ;;  %v4519_v33 = vpop.f32.mrf.mxu0 }
 0x4ab   : > { %v2977_v51 = vpop.f32.mrf.mxu1 }
 0x4ac   : > { %4693 = vpow2.f32 %v4058_v45  ;;  %v4074_v9 = vmul.f32 -1.442695, %v3311_v5  ;;  %v3200_v38 = vadd.f32 %v2976_v30, %v2605_v59  ;;  %v2978_v10 = vadd.f32 %v2977_v51, %v6487_v7 }
 0x4ad   : > { %v2981_v25 = vpop.f32.mrf.mxu1  ;;  %4695 = vpow2.f32 %v4073_v48  ;;  %v2617_v51 = vadd.f32 %v6356_v34, %v6430_v61  ;;  %v2623_v34 = vadd.f32 %v6366_v31, %v6430_v61  ;;  %v2625_v31 = vadd.f32 %v6371_v54, %v6432_v56 }
 0x4ae   : > { %v4059_v11 = vmul.f32 -1.442695, %v3200_v38  ;;  %v3312_v52 = vadd.f32 %v2978_v10, %v2607_v13  ;;  %v2982_v20 = vadd.f32 %v2981_v25, %v6482_v39  ;;  %4697 = vpow2.f32 %v4074_v9 }
 0x4af   : > { %v2983_v57 = vpop.f32.mrf.mxu1  ;;  %v6887_v38 = vsub.s32 2, %v6415_v43 }
 0x4b0   : > { %4699 = vpow2.f32 %v4059_v11  ;;  %v4075_v0 = vmul.f32 -1.442695, %v3312_v52  ;;  %v3201_v27 = vadd.f32 %v2982_v20, %v2611_v23  ;;  %v2984_v59 = vadd.f32 %v2983_v57, %v6487_v7  ;;  %v3128_v52 = vpop.f32.mrf.mxu0 }
 0x4b1   : > { %v4688_v45 = vpop.eup %4687  ;;  %v2987_v4 = vpop.f32.mrf.mxu1  ;;  %v6527_v10 = vrot.slane %v6472_v18, %v6887_v38  ;;  %v2619_v23 = vadd.f32 %v6361_v44, %v6432_v56 }
 0x4b2   : > { %v3261_v5 = vadd.f32 1.0, %v4688_v45  ;;  %v4060_v48 = vmul.f32 -1.442695, %v3201_v27  ;;  %v3313_v30 = vadd.f32 %v2984_v59, %v2613_v3  ;;  %4701 = vpow2.f32 %v4075_v0  ;;  %v4522_v59 = vpop.f32.mrf.mxu0 }
 0x4b3   : > { %v4690_v13 = vpop.eup %4689  ;;  %v2988_v26 = vadd.f32 %v2987_v4, %v6482_v39  ;;  %v2989_v9 = vpop.f32.mrf.mxu1  ;;  %v3124_v54 = vadd.f32 %v6510_v40, %v6527_v10 }
 0x4b4   : > { %4703 = vrcp.f32 %v3261_v5  ;;  %v3373_v25 = vadd.f32 1.0, %v4690_v13  ;;  %v2990_v11 = vadd.f32 %v2989_v9, %v6487_v7  ;;  %v4076_v43 = vmul.f32 -1.442695, %v3313_v30 }
 0x4b5   : > { %v4692_v20 = vpop.eup %4691  ;;  %4705 = vpow2.f32 %v4060_v48  ;;  %v3202_v3 = vadd.f32 %v2988_v26, %v2617_v51  ;;  %v2993_v57 = vpop.f32.mrf.mxu1  ;;  %v3119_v13 = vadd.f32 %v3118_v17, %v6527_v10  ;;  %v2629_v48 = vadd.f32 %v6376_v8, %v6430_v61 }
 0x4b6   : > { %v3262_v0 = vadd.f32 1.0, %v4692_v20  ;;  %v3314_v27 = vadd.f32 %v2990_v11, %v2619_v23  ;;  %v2994_v18 = vadd.f32 %v2993_v57, %v6482_v39  ;;  %4707 = vrcp.f32 %v3373_v25  ;;  %v3138_v25 = vpop.f32.mrf.mxu0 }
 0x4b7   : > { %v4061_v44 = vmul.f32 -1.442695, %v3202_v3  ;;  %v2995_v45 = vpop.f32.mrf.mxu1  ;;  %v2631_v3 = vadd.f32 %v6381_v58, %v6432_v56  ;;  %v6554_v40 = vadd.f32 %v3138_v25, %v6527_v10  ;;  %v2635_v58 = vadd.f32 %v6386_v41, %v6430_v61 }
 0x4b8   : > { %4709 = vrcp.f32 %v3262_v0  ;;  %v4077_v4 = vmul.f32 -1.442695, %v3314_v27  ;;  %v3203_v5 = vadd.f32 %v2994_v18, %v2623_v34  ;;  %v2996_v30 = vadd.f32 %v2995_v45, %v6487_v7 }
 0x4b9   : > { %v4694_v9 = vpop.eup %4693  ;;  %4711 = vpow2.f32 %v4061_v44  ;;  %v2999_v51 = vpop.f32.mrf.mxu1  ;;  %v6545_v34 = vadd.f32 %v3128_v52, %v6527_v10  ;;  %v6551_v45 = vadd.f32 %v4519_v33, %v6527_v10  ;;  %v2637_v33 = vadd.f32 %v6391_v12, %v6432_v56 }
 0x4ba   : > { %v3263_v26 = vadd.f32 1.0, %v4694_v9  ;;  %4713 = vpow2.f32 %v4076_v43  ;;  %v4062_v38 = vmul.f32 -1.442695, %v3203_v5  ;;  %v3000_v23 = vadd.f32 %v2999_v51, %v6482_v39  ;;  %v4696_v11 = vpop.eup %4695  ;;  %v4525_v43 = vpop.f32.mrf.mxu0 }
 0x4bb   : > { %4715 = vpow2.f32 %v4077_v4  ;;  %v3315_v17 = vadd.f32 %v2996_v30, %v2625_v31  ;;  %v3001_v20 = vpop.f32.mrf.mxu1  ;;  %v4698_v8 = vpop.eup %4697  ;;  %v3374_v52 = vadd.f32 1.0, %v4696_v11  ;;  %v2748_v11 = vadd.f32 %v6442_v50, %v6476_v55 }
 0x4bc   : > { %4717 = vrcp.f32 %v3263_v26  ;;  %v3204_v57 = vadd.f32 %v3000_v23, %v2629_v48  ;;  %v3002_v0 = vadd.f32 %v3001_v20, %v6487_v7  ;;  %v3375_v31 = vadd.f32 1.0, %v4698_v8  ;;  %v3148_v23 = vpop.f32.mrf.mxu0 }
 0x4bd   : > { %v4700_v27 = vpop.eup %4699  ;;  %4719 = vpow2.f32 %v4062_v38  ;;  %v4078_v18 = vmul.f32 -1.442695, %v3315_v17  ;;  %v3005_v44 = vpop.f32.mrf.mxu1  ;;  %v6565_v20 = vadd.f32 %v4522_v59, %v6527_v10  ;;  %v6571_v50 = vadd.f32 %v3148_v23, %v6527_v10 }
 0x4be   : > { %v3264_v4 = vadd.f32 1.0, %v4700_v27  ;;  %v4063_v5 = vmul.f32 -1.442695, %v3204_v57  ;;  %v3316_v9 = vadd.f32 %v3002_v0, %v2631_v3  ;;  %v3006_v48 = vadd.f32 %v3005_v44, %v6482_v39  ;;  %v6568_v0 = vpop.f32.mrf.mxu0 }
 0x4bf   : > { %4721 = vpow2.f32 %v4078_v18  ;;  %v3007_v30 = vpop.f32.mrf.mxu1  ;;  %v4702_v51 = vpop.eup %4701  ;;  %v2641_v59 = vadd.f32 %v6393_v63, %v6430_v61 }
 0x4c0   : > { %4723 = vrcp.f32 %v3264_v4  ;;  %v4079_v26 = vmul.f32 -1.442695, %v3316_v9  ;;  %v3008_v38 = vadd.f32 %v3007_v30, %v6487_v7  ;;  %v3205_v41 = vadd.f32 %v3006_v48, %v2635_v58 }
 0x4c1   : > { %v4704_v25 = vpop.eup %4703  ;;  %4725 = vpow2.f32 %v4063_v5  ;;  %v3011_v17 = vpop.f32.mrf.mxu1  ;;  %v2643_v9 = vadd.f32 %v6398_v1, %v6432_v56  ;;  %v2647_v58 = vadd.f32 %v6400_v2, %v6430_v61  ;;  %v6582_v48 = vadd.f32 %v4525_v43, %v6527_v10 }
 0x4c2   : > { %v4706_v8 = vpop.eup %4705  ;;  %4727 = vrcp.f32 %v3374_v52  ;;  %v3317_v3 = vadd.f32 %v3008_v38, %v2637_v33  ;;  %v3421_v57 = vmul.f32 %v4704_v25, %v3119_v13  ;;  %v3012_v12 = vadd.f32 %v3011_v17, %v6482_v39  ;;  %v3158_v38 = vpop.f32.mrf.mxu0 }
 0x4c3   : > { %4729 = vrcp.f32 %v3375_v31  ;;  %v3265_v27 = vadd.f32 1.0, %v4706_v8  ;;  %v4064_v18 = vmul.f32 -1.442695, %v3205_v41  ;;  %v3013_v44 = vpop.f32.mrf.mxu1  ;;  %v6573_v4 = vpop.eup %4707  ;;  %v2753_v33 = vadd.f32 %v6440_v32, %v6476_v55 }
 0x4c4   : > { %4731 = vpow2.f32 %v4079_v26  ;;  %v4080_v52 = vmul.f32 -1.442695, %v3317_v3  ;;  %v3437_v5 = vadd.f32 %v3421_v57, %v2748_v11  ;;  %v3206_v26 = vadd.f32 %v3012_v12, %v2641_v59 }
 0x4c5   : > { %v4710_v13 = vpop.eup %4709  ;;  %4733 = vrcp.f32 %v3265_v27  ;;  %v3017_v31 = vpop.f32.mrf.mxu1  ;;  %v3376_v25 = vadd.f32 1.0, %v4702_v51  ;;  %v3014_v1 = vadd.f32 %v3013_v44, %v6487_v7  ;;  %v2649_v43 = vadd.f32 %v6405_v28, %v6432_v56 }
 0x4c6   : > { %v4712_v30 = vpop.eup %4711  ;;  %4735 = vpow2.f32 %v4064_v18  ;;  %v3422_v63 = vmul.f32 %v4710_v13, %v3124_v54  ;;  %v3018_v2 = vadd.f32 %v3017_v31, %v6482_v39  ;;  %v2653_v8 = vadd.f32 %v6407_v49, %v6430_v61 }
 0x4c7   : > { %v4714_v23 = vpop.eup %4713  ;;  %v3266_v11 = vadd.f32 1.0, %v4712_v30  ;;  %v3019_v41 = vpop.f32.mrf.mxu1  ;;  %4737 = vpow2.f32 %v4080_v52  ;;  %v6594_v3 = vadd.f32 %v6409_v29, %v6432_v56  ;;  %v2758_v51 = vadd.f32 %v6446_v14, %v6476_v55 }
 0x4c8   : > { %v4716_v17 = vpop.eup %4715  ;;  %v3438_v32 = vadd.f32 %v3422_v63, %v2753_v33  ;;  %v6599_v12 = vadd.f32 %v3158_v38, %v6527_v10  ;;  %v4065_v28 = vmul.f32 -1.442695, %v3206_v26  ;;  %v3207_v18 = vadd.f32 %v3018_v2, %v2647_v58 }
 0x4c9   : > { %v4718_v54 = vpop.eup %4717  ;;  %4739 = vrcp.f32 %v3266_v11  ;;  %v3023_v57 = vpop.f32.mrf.mxu1  ;;  %v3377_v44 = vadd.f32 1.0, %v4714_v23  ;;  %v3318_v52 = vadd.f32 %v3014_v1, %v2643_v9  ;;  %v3378_v31 = vadd.f32 1.0, %v4716_v17 }
 0x4ca   : > { %v4720_v27 = vpop.eup %4719  ;;  %4741 = vtanh.f32 %v3438_v32  ;;  %v3423_v49 = vmul.f32 %v4718_v54, %v6545_v34  ;;  %v3020_v14 = vadd.f32 %v3019_v41, %v6487_v7  ;;  %v2659_v63 = vadd.f32 %v6411_v24, %v6430_v61 }
 0x4cb   : > { %4743 = vrcp.f32 %v3376_v25  ;;  %v3267_v59 = vadd.f32 1.0, %v4720_v27  ;;  %v3025_v29 = vpop.f32.mrf.mxu1  ;;  %v6607_v58 = vadd.f32 %v6413_v16, %v6432_v56  ;;  %v3024_v34 = vadd.f32 %v3023_v57, %v6482_v39 }
 0x4cc   : > { %v4722_v13 = vpop.eup %4721  ;;  %4745 = vtanh.f32 %v3437_v5  ;;  %v3439_v30 = vadd.f32 %v3423_v49, %v2758_v51  ;;  %v2763_v38 = vadd.f32 %v6444_v62, %v6476_v55  ;;  %v4066_v5 = vmul.f32 -1.442695, %v3207_v18 }
 0x4cd   : > { %v4724_v33 = vpop.eup %4723  ;;  %4747 = vrcp.f32 %v3267_v59  ;;  %v3029_v26 = vpop.f32.mrf.mxu1  ;;  %v4081_v24 = vmul.f32 -1.442695, %v3318_v52  ;;  %v2665_v41 = vadd.f32 %v6417_v46, %v6430_v61  ;;  %v3319_v32 = vadd.f32 %v3020_v14, %v2649_v43 }
 0x4ce   : > { %v4726_v9 = vpop.eup %4725  ;;  %4749 = vpow2.f32 %v4065_v28  ;;  %v3424_v23 = vmul.f32 %v4724_v33, %v6551_v45  ;;  %v3030_v1 = vadd.f32 %v3029_v26, %v6482_v39  ;;  %v6620_v54 = vadd.f32 %v6425_v21, %v6430_v61 }
 0x4cf   : > { %v4728_v25 = vpop.eup %4727  ;;  %4751 = vrcp.f32 %v3377_v44  ;;  %v3268_v11 = vadd.f32 1.0, %v4726_v9  ;;  %v3031_v16 = vpop.f32.mrf.mxu1  ;;  %v3379_v45 = vadd.f32 1.0, %v4722_v13  ;;  %v3208_v51 = vadd.f32 %v3024_v34, %v2653_v8 }
 0x4d0   : > { %v6614_v2 = vpop.eup %4729  ;;  %4753 = vrcp.f32 %v3378_v31  ;;  %v3440_v17 = vadd.f32 %v3424_v23, %v2763_v38  ;;  %v2773_v28 = vadd.f32 %v6448_v19, %v6476_v55  ;;  %v2768_v18 = vadd.f32 %v6450_v37, %v6476_v55  ;;  %v4879_v38 = vld [vmem:[%s5341_s8] sm:$0xff] }
 0x4d1   : > { %v4732_v62 = vpop.eup %4731  ;;  %4755 = vrcp.f32 %v3268_v11  ;;  %v3035_v57 = vpop.f32.mrf.mxu1  ;;  %v2778_v46 = vadd.f32 %v6454_v22, %v6476_v55  ;;  %v3209_v49 = vadd.f32 %v3030_v1, %v2659_v63  ;;  %v3469_v8 = vsub.f32 1.0, %v6573_v4  ;;  %v4880_v1 = vld [vmem:[%s5341_s8 + $0x8] sm:$0xff] }
 0x4d2   : > { %v4734_v27 = vpop.eup %4733  ;;  %4757 = vpow2.f32 %v4066_v5  ;;  %v4082_v59 = vmul.f32 -1.442695, %v3319_v32  ;;  %v3026_v19 = vadd.f32 %v3025_v29, %v6487_v7  ;;  %v4067_v37 = vmul.f32 -1.442695, %v3208_v51 }
 0x4d3   : > { %v4736_v43 = vpop.eup %4735  ;;  %4759 = vpow2.f32 %v4081_v24  ;;  %v3425_v21 = vmul.f32 %v4734_v27, %v6554_v40  ;;  %v6629_v61 = vpop.f32.mrf.mxu1  ;;  %v3036_v13 = vadd.f32 %v3035_v57, %v6482_v39  ;;  %v3380_v40 = vadd.f32 1.0, %v4732_v62 }
 0x4d4   : > { %v3269_v44 = vadd.f32 1.0, %v4736_v43  ;;  %4761 = vtanh.f32 %v3440_v17  ;;  %v4738_v52 = vpop.eup %4737  ;;  %v3470_v33 = vsub.f32 1.0, %v4728_v25  ;;  %v3032_v63 = vadd.f32 %v3031_v16, %v6487_v7 }
 0x4d5   : > { %4763 = vrcp.f32 %v3379_v45  ;;  %v3441_v22 = vadd.f32 %v3425_v21, %v2768_v18  ;;  %v3041_v31 = vpop.f32.mrf.mxu1  ;;  %v4068_v26 = vmul.f32 -1.442695, %v3209_v49  ;;  %v3501_v5 = vmul.f32 %v4879_v38, %v6573_v4 }
 0x4d6   : > { %v4740_v14 = vpop.eup %4739  ;;  %4765 = vrcp.f32 %v3269_v44  ;;  %v3042_v24 = vadd.f32 %v3041_v31, %v6482_v39  ;;  %v3502_v17 = vmul.f32 %v4880_v1, %v4728_v25  ;;  %v3210_v62 = vadd.f32 %v3036_v13, %v2665_v41 }
 0x4d7   : > { %v4742_v34 = vpop.eup %4741  ;;  %4767 = vtanh.f32 %v3439_v30  ;;  %v3426_v29 = vmul.f32 %v4740_v14, %v6565_v20  ;;  %v6636_v9 = vpop.f32.mrf.mxu1  ;;  %v3320_v30 = vadd.f32 %v3026_v19, %v6594_v3  ;;  %v3381_v51 = vadd.f32 1.0, %v4738_v52 }
 0x4d8   : > { %v6640_v23 = vpop.eup %4743  ;;  %v3486_v11 = vmul.f32 %v4742_v34, %v3470_v33  ;;  %4769 = vpow2.f32 %v4082_v59  ;;  %v3321_v4 = vadd.f32 %v3032_v63, %v6607_v58  ;;  %v3211_v41 = vadd.f32 %v3042_v24, %v6620_v54  ;;  %v4881_v63 = vld [vmem:[%s5341_s8 + $0x18] sm:$0xff] }
 0x4d9   : > { %v4746_v32 = vpop.eup %4745  ;;  %4771 = vpow2.f32 %v4067_v37  ;;  %v3442_v16 = vadd.f32 %v3426_v29, %v2773_v28  ;;  %v3047_v20 = vpop.f32.mrf.mxu1  ;;  %v4069_v58 = vmul.f32 -1.442695, %v3210_v62  ;;  %v2783_v54 = vadd.f32 %v6452_v35, %v6476_v55 }
 0x4da   : > { %v4748_v45 = vpop.eup %4747  ;;  %4773 = vrcp.f32 %v3380_v40  ;;  %v3485_v57 = vmul.f32 %v4746_v32, %v3469_v8  ;;  %v3048_v25 = vadd.f32 %v3047_v20, %v6482_v39  ;;  %v3518_v49 = vadd.f32 %v3502_v17, %v3486_v11 }
 0x4db   : > { %v4750_v27 = vpop.eup %4749  ;;  %4775 = vpow2.f32 %v4068_v26  ;;  %v3427_v18 = vmul.f32 %v4748_v45, %v6571_v50  ;;  %v3049_v43 = vpop.f32.mrf.mxu1  ;;  %v2667_v50 = vadd.f32 %v6419_v60, %v6432_v56  ;;  %v4083_v52 = vmul.f32 -1.442695, %v3320_v30  ;;  %v4882_v30 = vld [vmem:[%s5341_s8 + $0x10] sm:$0xff] }
 0x4dc   : > { %v6648_v21 = vpop.eup %4751  ;;  %v3270_v3 = vadd.f32 1.0, %v4750_v27  ;;  %4777 = vtanh.f32 %v3442_v16  ;;  %v3517_v28 = vadd.f32 %v3501_v5, %v3485_v57  ;;  %v3212_v59 = vadd.f32 %v3048_v25, %v6435_v53  ;;  %3534 = vst [vmem:[%s6657_s10 + $0x8] sm:$0xff] %v3518_v49 }
 0x4dd   : > { %v6651_v44 = vpop.eup %4753  ;;  %v3443_v8 = vadd.f32 %v3427_v18, %v2778_v46  ;;  %v3050_v19 = vadd.f32 %v3049_v43, %v6487_v7  ;;  %v3038_v46 = vadd.f32 %v6629_v61, %v6487_v7  ;;  %v4070_v35 = vmul.f32 -1.442695, %v3211_v41  ;;  %v4883_v41 = vld [vmem:[%s5341_s8 + $0x28] sm:$0xff] }
 0x4de   : > { %v4756_v39 = vpop.eup %4755  ;;  %4779 = vrcp.f32 %v3270_v3  ;;  %3533 = vst [vmem:[%s6657_s10] sm:$0xff] %v3517_v28  ;;  %4570 = vmatprep.mubr.f32.mxu1 %v3517_v28  ;;  %v3472_v14 = vsub.f32 1.0, %v6640_v23  ;;  %v4084_v61 = vmul.f32 -1.442695, %v3321_v4  ;;  %v3504_v34 = vmul.f32 %v4881_v63, %v6640_v23 }
 0x4df   : > { %v4758_v53 = vpop.eup %4757  ;;  %4781 = vtanh.f32 %v3441_v22  ;;  %v3428_v37 = vmul.f32 %v4756_v39, %v6582_v48  ;;  %v6669_v13 = vadd.f32 %v3050_v19, %v6438_v6  ;;  %4571 = vmatmul.mubr.f32.vlgmr.msra.gmra.mxu1 %v3518_v49  ;;  %v3322_v48 = vadd.f32 %v3038_v46, %v2667_v50 }
 0x4e0   : > { %v4760_v60 = vpop.eup %4759  ;;  %4783 = vrcp.f32 %v3381_v51  ;;  %v3271_v31 = vadd.f32 1.0, %v4758_v53  ;;  %v3044_v6 = vadd.f32 %v6636_v9, %v6487_v7  ;;  %v2673_v38 = vadd.f32 %v6428_v47, %v6432_v56  ;;  %v6684_v7 = vpop.f32.mrf.mxu0  ;;  %v4884_v53 = vld [vmem:[%s5341_s8 + $0x20] sm:$0xff] }
 0x4e1   : > { %v4762_v40 = vpop.eup %4761  ;;  %4785 = vpow2.f32 %v4069_v58  ;;  %v3444_v33 = vadd.f32 %v3428_v37, %v2783_v54  ;;  %v3382_v5 = vadd.f32 1.0, %v4760_v60  ;;  %v3471_v11 = vsub.f32 1.0, %v6614_v2 }
 0x4e2   : > { %v6674_v22 = vpop.eup %4763  ;;  %4787 = vrcp.f32 %v3271_v31  ;;  %v3488_v26 = vmul.f32 %v4762_v40, %v3472_v14  ;;  %v2788_v23 = vadd.f32 %v6458_v36, %v6476_v55  ;;  %v3503_v47 = vmul.f32 %v4882_v30, %v6614_v2  ;;  %v3168_v2 = vpop.f32.mrf.mxu0 }
 0x4e3   : > { %v4766_v29 = vpop.eup %4765  ;;  %4789 = vpow2.f32 %v4083_v52  ;;  %v4085_v16 = vmul.f32 -1.442695, %v3322_v48  ;;  %v3323_v62 = vadd.f32 %v3044_v6, %v2673_v38  ;;  %v4071_v4 = vmul.f32 -1.442695, %v3212_v59 }
 0x4e4   : > { %v4768_v24 = vpop.eup %4767  ;;  %4791 = vpow2.f32 %v4070_v35  ;;  %v3429_v1 = vmul.f32 %v4766_v29, %v6599_v12  ;;  %v3520_v17 = vadd.f32 %v3504_v34, %v3488_v26  ;;  %v3164_v57 = vadd.f32 %v6568_v0, %v6527_v10  ;;  %v4534_v60 = vpop.f32.mrf.mxu0 }
 0x4e5   : > { %v4770_v9 = vpop.eup %4769  ;;  %4793 = vpow2.f32 %v4084_v61  ;;  %v3487_v32 = vmul.f32 %v4768_v24, %v3471_v11  ;;  %v3474_v27 = vsub.f32 1.0, %v6651_v44  ;;  %v4086_v49 = vmul.f32 -1.442695, %v3323_v62  ;;  %v6888_v62 = vld [vmem:[#allocation28_spill] sm:$0xff] }
 0x4e6   : > { %v4772_v56 = vpop.eup %4771  ;;  %4795 = vtanh.f32 %v3444_v33  ;;  %v3445_v20 = vadd.f32 %v3429_v1, %v2788_v23  ;;  %3536 = vst [vmem:[%s6657_s10 + $0x18] sm:$0xff] %v3520_v17  ;;  %v3383_v25 = vadd.f32 1.0, %v4770_v9  ;;  %v3506_v28 = vmul.f32 %v4883_v41, %v6651_v44  ;;  %v3178_v6 = vpop.f32.mrf.mxu0  ;;  %v4885_v23 = vld [vmem:[%s5341_s8 + $0x38] sm:$0xff] }
 0x4e7   : > { %v6689_v36 = vpop.eup %4773  ;;  %4797 = vrcp.f32 %v3382_v5  ;;  %v3272_v12 = vadd.f32 1.0, %v4772_v56  ;;  %v3519_v45 = vadd.f32 %v3503_v47, %v3487_v32  ;;  %v3169_v0 = vadd.f32 %v3168_v2, %v6527_v10  ;;  %v4886_v47 = vld [vmem:[%s5341_s8 + $0x30] sm:$0xff] }
 0x4e8   : > { %v4776_v51 = vpop.eup %4775  ;;  %4799 = vtanh.f32 %v3443_v8  ;;  %v3473_v8 = vsub.f32 1.0, %v6648_v21  ;;  %v2793_v19 = vadd.f32 %v6456_v15, %v6476_v55  ;;  %v3505_v44 = vmul.f32 %v4884_v53, %v6648_v21 }
 0x4e9   : > { %v4778_v18 = vpop.eup %4777  ;;  %4801 = vrcp.f32 %v3272_v12  ;;  %v3273_v43 = vadd.f32 1.0, %v4776_v51  ;;  %3535 = vst [vmem:[%s6657_s10 + $0x10] sm:$0xff] %v3519_v45  ;;  %4573 = vmatprep.mubr.f32.mxu1 %v3519_v45  ;;  %v2798_v40 = vadd.f32 %v6462_v42, %v6476_v55  ;;  %v4087_v34 = vmul.f32 -1.442695, %v6669_v13  ;;  %v6721_v12 = vpop.f32.mrf.mxu0 }
 0x4ea   : > { %4803 = vpow2.f32 %v4085_v16  ;;  %4574 = vmatmul.mubr.f32.gmra.mxu1 %v3520_v17  ;;  %v3490_v3 = vmul.f32 %v4778_v18, %v3474_v27  ;;  %v3476_v26 = vsub.f32 1.0, %v6689_v36  ;;  %v3174_v42 = vadd.f32 %v6684_v7, %v6527_v10 }
 0x4eb   : > { %v4780_v58 = vpop.eup %4779  ;;  %4805 = vrcp.f32 %v3273_v43  ;;  %v3475_v11 = vsub.f32 1.0, %v6674_v22  ;;  %v3508_v1 = vmul.f32 %v4885_v23, %v6689_v36  ;;  %v3179_v9 = vadd.f32 %v3178_v6, %v6527_v10 }
 0x4ec   : > { %v4782_v59 = vpop.eup %4781  ;;  %4807 = vpow2.f32 %v4071_v4  ;;  %v3430_v39 = vmul.f32 %v4780_v58, %v3164_v57  ;;  %v3522_v50 = vadd.f32 %v3506_v28, %v3490_v3  ;;  %v3507_v7 = vmul.f32 %v4886_v47, %v6674_v22  ;;  %v6889_v57 = vld [vmem:[#allocation30_spill] sm:$0xff]  ;;  %v3188_v28 = vpop.f32.mrf.mxu0 }
 0x4ed   : > { %v6701_v54 = vpop.eup %4783  ;;  %4809 = vrcp.f32 %v3383_v25  ;;  %v3489_v46 = vmul.f32 %v4782_v59, %v3473_v8  ;;  %v2808_v2 = vadd.f32 %v6889_v57, %v6476_v55  ;;  %v3184_v43 = vadd.f32 %v4534_v60, %v6527_v10 }
 0x4ee   : > { %v4786_v52 = vpop.eup %4785  ;;  %4811 = vpow2.f32 %v4086_v49  ;;  %v3446_v37 = vadd.f32 %v3430_v39, %v2793_v19  ;;  %3538 = vst [vmem:[%s6657_s10 + $0x28] sm:$0xff] %v3522_v50  ;;  %v3477_v58 = vsub.f32 1.0, %v6701_v54  ;;  %v4887_v39 = vld [vmem:[%s5341_s8 + $0x40] sm:$0xff] }
 0x4ef   : > { %v4788_v31 = vpop.eup %4787  ;;  %v3274_v35 = vadd.f32 1.0, %v4786_v52  ;;  %4813 = vtanh.f32 %v3445_v20  ;;  %v3521_v15 = vadd.f32 %v3505_v44, %v3489_v46  ;;  %v2803_v20 = vadd.f32 %v6888_v62, %v6476_v55 }
 0x4f0   : > { %v4790_v14 = vpop.eup %4789  ;;  %4815 = vtanh.f32 %v3446_v37  ;;  %v3431_v61 = vmul.f32 %v4788_v31, %v3169_v0  ;;  %v3189_v44 = vadd.f32 %v3188_v28, %v6527_v10  ;;  %v4888_v37 = vld [vmem:[%s5341_s8 + $0x48] sm:$0xff] }
 0x4f1   : > { %v4792_v33 = vpop.eup %4791  ;;  %4817 = vrcp.f32 %v3274_v35  ;;  %3537 = vst [vmem:[%s6657_s10 + $0x20] sm:$0xff] %v3521_v15  ;;  %4576 = vmatprep.mubr.f32.mxu1 %v3521_v15  ;;  %v3384_v38 = vadd.f32 1.0, %v4790_v14  ;;  %v6890_v31 = vld [vmem:[#allocation29_spill] sm:$0xff] }
 0x4f2   : > { %v4794_v21 = vpop.eup %4793  ;;  %v3275_v63 = vadd.f32 1.0, %v4792_v33  ;;  %v3447_v48 = vadd.f32 %v3431_v61, %v2798_v40  ;;  %4577 = vmatmul.mubr.f32.gmra.mxu1 %v3522_v50  ;;  %v3509_v50 = vmul.f32 %v4887_v39, %v6701_v54  ;;  %v2813_v35 = vadd.f32 %v6890_v31, %v6476_v55  ;;  %v4894_v39 = vld [vmem:[%s5341_s8 + $0x78] sm:$0xff] }
 0x4f3   : > { %v4796_v29 = vpop.eup %4795  ;;  %v3385_v17 = vadd.f32 1.0, %v4794_v21 }
 0x4f4   : > { %v4798_v5 = vpop.eup %4797  ;;  %4819 = vrcp.f32 %v3275_v63  ;;  %v3492_v24 = vmul.f32 %v4796_v29, %v3476_v26  ;;  %v6891_v63 = vld [vmem:[#allocation32_spill] sm:$0xff]  ;;  %v4889_v29 = vld [vmem:[%s5341_s8 + $0x50] sm:$0xff] }
 0x4f5   : > { %v4800_v13 = vpop.eup %4799  ;;  %4821 = vtanh.f32 %v3447_v48  ;;  %v3478_v8 = vsub.f32 1.0, %v4798_v5  ;;  %v3510_v60 = vmul.f32 %v4888_v37, %v4798_v5 }
 0x4f6   : > { %v4802_v32 = vpop.eup %4801  ;;  %4823 = vpow2.f32 %v4087_v34  ;;  %v3491_v30 = vmul.f32 %v4800_v13, %v3475_v11  ;;  %v3524_v56 = vadd.f32 %v3508_v1, %v3492_v24  ;;  %v2818_v34 = vadd.f32 %v6891_v63, %v6476_v55 }
 0x4f7   : > { %v4804_v16 = vpop.eup %4803  ;;  %4825 = vrcp.f32 %v3384_v38  ;;  %v3432_v36 = vmul.f32 %v4802_v32, %v3174_v42  ;;  %v3194_v13 = vadd.f32 %v6721_v12, %v6527_v10  ;;  %v4890_v32 = vld [vmem:[%s5341_s8 + $0x58] sm:$0xff] }
 0x4f8   : > { %v4806_v45 = vpop.eup %4805  ;;  %v3523_v51 = vadd.f32 %v3507_v7, %v3491_v30  ;;  %3540 = vst [vmem:[%s6657_s10 + $0x38] sm:$0xff] %v3524_v56  ;;  %4827 = vrcp.f32 %v3385_v17  ;;  %v3386_v3 = vadd.f32 1.0, %v4804_v16 }
 0x4f9   : > { %v4808_v4 = vpop.eup %4807  ;;  %v3448_v27 = vadd.f32 %v3432_v36, %v2803_v20  ;;  %v3433_v22 = vmul.f32 %v4806_v45, %v3179_v9  ;;  %v4891_v20 = vld [vmem:[%s5341_s8 + $0x60] sm:$0xff] }
 0x4fa   : > { %v4810_v18 = vpop.eup %4809  ;;  %v3276_v25 = vadd.f32 1.0, %v4808_v4  ;;  %3539 = vst [vmem:[%s6657_s10 + $0x30] sm:$0xff] %v3523_v51  ;;  %4579 = vmatprep.mubr.f32.mxu1 %v3523_v51  ;;  %v6892_v51 = vld [vmem:[#allocation31_spill] sm:$0xff] }
 0x4fb   : > { %v4812_v49 = vpop.eup %4811  ;;  %4829 = vtanh.f32 %v3448_v27  ;;  %v3449_v41 = vadd.f32 %v3433_v22, %v2808_v2  ;;  %4580 = vmatmul.mubr.f32.gmra.mxu1 %v3524_v56  ;;  %v3479_v54 = vsub.f32 1.0, %v4810_v18  ;;  %v3511_v38 = vmul.f32 %v4889_v29, %v4810_v18  ;;  %v4892_v22 = vld [vmem:[%s5341_s8 + $0x68] sm:$0xff] }
 0x4fc   : > { %v4814_v0 = vpop.eup %4813  ;;  %4831 = vrcp.f32 %v3276_v25  ;;  %v3387_v53 = vadd.f32 1.0, %v4812_v49 }
 0x4fd   : > { %v4816_v59 = vpop.eup %4815  ;;  %4833 = vtanh.f32 %v3449_v41  ;;  %v3493_v19 = vmul.f32 %v4814_v0, %v3477_v58  ;;  %v4893_v41 = vld [vmem:[%s5341_s8 + $0x70] sm:$0xff]  ;;  %s5099_s8 = smov [#allocation10]  }
 0x4fe   : > { %v4818_v46 = vpop.eup %4817  ;;  %v3494_v52 = vmul.f32 %v4816_v59, %v3478_v8  ;;  %4835 = vrcp.f32 %v3386_v3  ;;  %s4977_s15 = sshll.u32 %s5099_s8, 4  ;;  %s4978_s15 = int_to_ptr.vmem [resolvable:$false] %s4977_s15 }
 0x4ff   : > { %v3434_v15 = vmul.f32 %v4818_v46, %v3184_v43  ;;  %v3525_v14 = vadd.f32 %v3509_v50, %v3493_v19  ;;  %4837 = vrcp.f32 %v3387_v53  ;;  %s4979_s29 = scalar_lea.vmem %s4978_s15, 4096  ;;  %p4980_p9 = scmp.lt.s32.totalorder %s6761_s25, %s4978_s15 }
 0x500   : > { %v3526_v40 = vadd.f32 %v3510_v60, %v3494_v52  ;;  %p4981_p12 = scmp.lt.s32.totalorder %s4979_s29, %s4973_s28 }
 0x501   : > { %v4820_v61 = vpop.eup %4819  ;;  %v3450_v33 = vadd.f32 %v3434_v15, %v2813_v35  ;;  %3541 = vst [vmem:[%s6657_s10 + $0x40] sm:$0xff] %v3525_v14  ;;  %4582 = vmatprep.mubr.f32.mxu1 %v3525_v14 }
 0x502   : > { %v4822_v21 = vpop.eup %4821  ;;  %v3435_v48 = vmul.f32 %v4820_v61, %v3189_v44  ;;  %3542 = vst [vmem:[%s6657_s10 + $0x48] sm:$0xff] %v3526_v40  ;;  %4583 = vmatmul.mubr.f32.gmra.mxu1 %v3526_v40  ;;  %p4982_p4 = por %p4981_p12, %p4980_p9 }
 0x503   : > { %v4824_v6 = vpop.eup %4823  ;;  %4839 = vtanh.f32 %v3450_v33  ;;  %v3495_v26 = vmul.f32 %v4822_v21, %v3479_v54 }
 0x504   : > { %v4826_v42 = vpop.eup %4825  ;;  %v3451_v5 = vadd.f32 %v3435_v48, %v2818_v34  ;;  %v3388_v23 = vadd.f32 1.0, %v4824_v6  ;;  %p4983_p6 = pnand %p4982_p4, %p4976_p7 }
 0x505   : > { %v3527_v11 = vadd.f32 %v3511_v38, %v3495_v26  ;;  %v4828_v24 = vpop.eup %4827  ;;  %v3480_v55 = vsub.f32 1.0, %v4826_v42  ;;  %v3512_v30 = vmul.f32 %v4890_v32, %v4826_v42 }
 0x506   : > { %4841 = vtanh.f32 %v3451_v5  ;;  %v3481_v47 = vsub.f32 1.0, %v4828_v24  ;;  %v3513_v36 = vmul.f32 %v4891_v20, %v4828_v24 }
 0x507   : > { %3543 = vst [vmem:[%s6657_s10 + $0x50] sm:$0xff] %v3527_v11  ;;  %4585 = vmatprep.mubr.f32.mxu1 %v3527_v11  ;;  %4843 = vrcp.f32 %v3388_v23 }
 0x508   : > { %v4830_v1 = vpop.eup %4829 }
 0x509   : > { %v4832_v17 = vpop.eup %4831  ;;  %v3496_v9 = vmul.f32 %v4830_v1, %v3480_v55 }
 0x50a   : > { %v4834_v7 = vpop.eup %4833  ;;  %v3436_v56 = vmul.f32 %v4832_v17, %v3194_v13 }
 0x50b   : > { %v3528_v16 = vadd.f32 %v3512_v30, %v3496_v9  ;;  %v3497_v62 = vmul.f32 %v4834_v7, %v3481_v47  ;;  %v4836_v45 = vpop.eup %4835 }
 0x50c   : > { %v3452_v4 = vadd.f32 %v3436_v56, %v6892_v51  ;;  %v4838_v12 = vpop.eup %4837  ;;  %v3482_v57 = vsub.f32 1.0, %v4836_v45  ;;  %v3514_v18 = vmul.f32 %v4892_v22, %v4836_v45 }
 0x50d   : > { %3544 = vst [vmem:[%s6657_s10 + $0x58] sm:$0xff] %v3528_v16  ;;  %4586 = vmatmul.mubr.f32.gmra.mxu1 %v3528_v16  ;;  %v3529_v10 = vadd.f32 %v3513_v36, %v3497_v62  ;;  %v3483_v25 = vsub.f32 1.0, %v4838_v12  ;;  %v3515_v28 = vmul.f32 %v4893_v41, %v4838_v12 }
 0x50e   : > { %4845 = vtanh.f32 %v3452_v4 }
 0x50f   : > { %3545 = vst [vmem:[%s6657_s10 + $0x60] sm:$0xff] %v3529_v10  ;;  %4588 = vmatprep.mubr.f32.mxu1 %v3529_v10 }
 0x510   : > { %v4840_v2 = vpop.eup %4839 }
 0x511   : > { %v3498_v27 = vmul.f32 %v4840_v2, %v3482_v57 }
 0x513   : > { %v4842_v43 = vpop.eup %4841  ;;  %v3530_v49 = vadd.f32 %v3514_v18, %v3498_v27 }
 0x514   : > { %v3499_v3 = vmul.f32 %v4842_v43, %v3483_v25  ;;  %v4844_v0 = vpop.eup %4843 }
 0x515   : > { %3546 = vst [vmem:[%s6657_s10 + $0x68] sm:$0xff] %v3530_v49  ;;  %4589 = vmatmul.mubr.f32.gmra.mxu1 %v3530_v49  ;;  %v3484_v8 = vsub.f32 1.0, %v4844_v0  ;;  %v3516_v50 = vmul.f32 %v4894_v39, %v4844_v0 }
 0x516   : > { %v3531_v58 = vadd.f32 %v3515_v28, %v3499_v3 }
 0x518   : > { %3547 = vst [vmem:[%s6657_s10 + $0x70] sm:$0xff] %v3531_v58  ;;  %4591 = vmatprep.mubr.f32.mxu1 %v3531_v58 }
 0x51b   : > { %v4846_v59 = vpop.eup %4845 }
 0x51c   : > { %v3500_v19 = vmul.f32 %v4846_v59, %v3484_v8 }
 0x51e   : > { %v3532_v46 = vadd.f32 %v3516_v50, %v3500_v19 }
 0x520   : > { %3548 = vst [vmem:[%s6657_s10 + $0x78] sm:$0xff] %v3532_v46  ;;  %4592 = vmatmul.mubr.f32.gmra.mxu1 %v3532_v46 }
 0x521   : > { %4986 = shalt.err (!%p4983_p6)
}
 0x522   : > { %s4987_s20 = scalar_lea.hbm %s6758_s5, 2048  ;;  %s4991_s18 = scalar_lea.hbm %s6894_s27, 4096 }
 0x523   : > { %p4988_p8 = scmp.ne.s32.totalorder %s6758_s5, %s4987_s20  ;;  %p4992_p11 = scmp.lt.s32.totalorder %s6758_s5, %s6894_s27 }
 0x524   : > { %p4993_p2 = scmp.lt.s32.totalorder %s4991_s18, %s4987_s20 }
 0x525   : > { %p4989_p5 = pnand %p4988_p8, %p6895_p1 }
 0x526   : > { %p4994_p0 = por %p4993_p2, %p4992_p11 }
 0x527   : > { %p4990_p13 = pneg %p4989_p5 }
 0x529   : > { %p4995_p10 = pnand %p4994_p0, %p4990_p13 }
 0x52b   : > { %4998 = shalt.err (!%p4995_p10)
}
 0x52c   : > { %s5100_s10 = smov 128   ;;  %s5101_s19 = smov 8  }
 0x52d   : > { %4613 = dma.vmem_to_hbm [thread:$0]  (%p6895_p1), %s6761_s25, 2048, %s6758_s5, %s3756_s24, %s5100_s10, %s5100_s10, %s5101_s19  }
 0x52e   : > { %s6896_s28 = sld [smem:[#allocation37_spill]]  ;;  %s3966_s5 = sshll.u32 %s5327_s21, 3 }
 0x52f   : > { %s4093_s25 = sshll.u32 %s5199_s17, 7  ;;  %s607_s24 = scalar_lea.vmem [#allocation11], %s3966_s5 }
 0x530   : > { %s3790_s8 = sshll.u32 %s607_s24, 4  ;;  %s6897_s20 = sld [smem:[#allocation39_spill]]  ;;  %s3791_s8 = int_to_ptr.vmem [resolvable:$true] %s3790_s8 }
 0x531   : > { %s3761_s12 = scalar_lea.sflag [#allocation12], %s5327_s21  ;;  %s4999_s18 = scalar_lea.vmem %s3791_s8, 128 }
 0x532   : > { %p5000_p3 = scmp.ne.s32.totalorder %s3791_s8, %s4999_s18  ;;  %s5102_s14 = smov [#allocation11]  }
 0x533   : > { %s5003_s26 = sshll.u32 %s5102_s14, 4  ;;  %s5004_s26 = int_to_ptr.vmem [resolvable:$false] %s5003_s26 }
 0x534   : > { %v4088_v37 = vld [vmem:[%s6896_s28] ss:$0 sm:$0xff]  ;;  %p5001_p7 = pnand %p5000_p3, %p6895_p1  ;;  %s5005_s17 = scalar_lea.vmem %s5004_s26, 256 }
 0x535   : > { %p5006_p12 = scmp.lt.s32.totalorder %s3791_s8, %s5004_s26  ;;  %p5007_p4 = scmp.lt.s32.totalorder %s5005_s17, %s4999_s18 }
 0x536   : > { %s3788_s13 = scalar_lea.hbm %s6897_s20, %s4093_s25  ;;  %p5002_p9 = pneg %p5001_p7 }
 0x537   : > { %p5008_p6 = por %p5007_p4, %p5006_p12 }
 0x539   : > { %p5009_p8 = pnand %p5008_p6, %p5002_p9 }
 0x59f   : > { %v4572_v53 = vpop.f32.mrf.mxu1 }
 0x5a0   : > { %v3644_v35 = vadd.f32 %v4572_v53, %v4088_v37 }
 0x5a1   : > { %v3638_v44 = vpop.f32.mrf.mxu1 }
 0x5a2   : > { %v3639_v31 = vadd.f32 %v4088_v37, %v3638_v44 }
 0x5a4   : > { %4847 = vtanh.f32 %v3639_v31 }
 0x5a5   : > { %4849 = vtanh.f32 %v3644_v35 }
 0x5aa   : > { %v4575_v52 = vpop.f32.mrf.mxu1 }
 0x5ab   : > { %v3654_v61 = vadd.f32 %v4575_v52, %v4088_v37 }
 0x5ac   : > { %v3648_v60 = vpop.f32.mrf.mxu1 }
 0x5ad   : > { %v3649_v14 = vadd.f32 %v4088_v37, %v3648_v60 }
 0x5af   : > { %4851 = vtanh.f32 %v3649_v14 }
 0x5b0   : > { %4853 = vtanh.f32 %v3654_v61 }
 0x5b1   : > { %v4848_v6 = vpop.eup %4847 }
 0x5b2   : > { %v4578_v15 = vpop.f32.mrf.mxu1  ;;  %v4850_v29 = vpop.eup %4849 }
 0x5b3   : > { %v3664_v63 = vadd.f32 %v4578_v15, %v4088_v37  ;;  %v3733_v5 = vadd.f32 %v4850_v29, %v4848_v6 }
 0x5b4   : > { %v3658_v40 = vpop.f32.mrf.mxu1 }
 0x5b5   : > { %v3659_v54 = vadd.f32 %v4088_v37, %v3658_v40 }
 0x5b7   : > { %4855 = vtanh.f32 %v3659_v54 }
 0x5b8   : > { %4857 = vtanh.f32 %v3664_v63 }
 0x5bb   : > { %v4581_v33 = vpop.f32.mrf.mxu1 }
 0x5bc   : > { %v4852_v38 = vpop.eup %4851  ;;  %v3674_v42 = vadd.f32 %v4581_v33, %v4088_v37 }
 0x5bd   : > { %v3668_v21 = vpop.f32.mrf.mxu1  ;;  %v3734_v23 = vadd.f32 %v4852_v38, %v3733_v5  ;;  %v4854_v1 = vpop.eup %4853 }
 0x5be   : > { %v3669_v48 = vadd.f32 %v4088_v37, %v3668_v21 }
 0x5bf   : > { %v3735_v9 = vadd.f32 %v4854_v1, %v3734_v23 }
 0x5c0   : > { %4859 = vtanh.f32 %v3669_v48 }
 0x5c1   : > { %4861 = vtanh.f32 %v3674_v42 }
 0x5c2   : > { %v4584_v34 = vpop.f32.mrf.mxu1 }
 0x5c3   : > { %v3684_v17 = vadd.f32 %v4584_v34, %v4088_v37 }
 0x5c4   : > { %v3678_v26 = vpop.f32.mrf.mxu1  ;;  %v4856_v13 = vpop.eup %4855 }
 0x5c5   : > { %v3679_v11 = vadd.f32 %v4088_v37, %v3678_v26  ;;  %v3736_v30 = vadd.f32 %v4856_v13, %v3735_v9  ;;  %v4858_v7 = vpop.eup %4857 }
 0x5c7   : > { %4863 = vtanh.f32 %v3679_v11  ;;  %v3737_v20 = vadd.f32 %v4858_v7, %v3736_v30 }
 0x5c8   : > { %4865 = vtanh.f32 %v3684_v17 }
 0x5cd   : > { %v4587_v24 = vpop.f32.mrf.mxu1  ;;  %v4860_v16 = vpop.eup %4859 }
 0x5ce   : > { %v3694_v62 = vadd.f32 %v4587_v24, %v4088_v37  ;;  %v3738_v45 = vadd.f32 %v4860_v16, %v3737_v20  ;;  %v4862_v51 = vpop.eup %4861 }
 0x5cf   : > { %v3688_v55 = vpop.f32.mrf.mxu1 }
 0x5d0   : > { %v3689_v32 = vadd.f32 %v4088_v37, %v3688_v55  ;;  %v3739_v10 = vadd.f32 %v4862_v51, %v3738_v45 }
 0x5d2   : > { %4867 = vtanh.f32 %v3689_v32 }
 0x5d3   : > { %4869 = vtanh.f32 %v3694_v62 }
 0x5d4   : > { %v4864_v4 = vpop.eup %4863 }
 0x5d5   : > { %v4590_v47 = vpop.f32.mrf.mxu1  ;;  %v3740_v2 = vadd.f32 %v4864_v4, %v3739_v10  ;;  %v4866_v22 = vpop.eup %4865 }
 0x5d6   : > { %v3704_v12 = vadd.f32 %v4590_v47, %v4088_v37 }
 0x5d7   : > { %v3698_v56 = vpop.f32.mrf.mxu1  ;;  %v3741_v49 = vadd.f32 %v4866_v22, %v3740_v2 }
 0x5d8   : > { %v3699_v36 = vadd.f32 %v4088_v37, %v3698_v56 }
 0x5da   : > { %4871 = vtanh.f32 %v3699_v36 }
 0x5db   : > { %4873 = vtanh.f32 %v3704_v12 }
 0x5df   : > { %v4868_v43 = vpop.eup %4867 }
 0x5e0   : > { %v4593_v57 = vpop.f32.mrf.mxu1  ;;  %v3742_v3 = vadd.f32 %v4868_v43, %v3741_v49  ;;  %v4870_v41 = vpop.eup %4869 }
 0x5e1   : > { %v3714_v18 = vadd.f32 %v4593_v57, %v4088_v37 }
 0x5e2   : > { %v3708_v27 = vpop.f32.mrf.mxu1  ;;  %v3743_v58 = vadd.f32 %v4870_v41, %v3742_v3 }
 0x5e3   : > { %v3709_v25 = vadd.f32 %v4088_v37, %v3708_v27 }
 0x5e5   : > { %4875 = vtanh.f32 %v3709_v25 }
 0x5e6   : > { %4877 = vtanh.f32 %v3714_v18 }
 0x5e7   : > { %v4872_v28 = vpop.eup %4871 }
 0x5e8   : > { %v3744_v0 = vadd.f32 %v4872_v28, %v3743_v58  ;;  %v4874_v8 = vpop.eup %4873 }
 0x5ea   : > { %v3745_v59 = vadd.f32 %v4874_v8, %v3744_v0 }
 0x5f2   : > { %v4876_v19 = vpop.eup %4875 }
 0x5f3   : > { %v3746_v39 = vadd.f32 %v4876_v19, %v3745_v59  ;;  %v4878_v50 = vpop.eup %4877 }
 0x5f5   : > { %v3747_v46 = vadd.f32 %v4878_v50, %v3746_v39 }
 0x5f7   : > { %v3748_v53 = vrot.slane %v3747_v46, 4 }
 0x5f9   : > { %v3749_v44 = vadd.f32 %v3748_v53, %v3747_v46 }
 0x5fb   : > { %v3750_v52 = vrot.slane %v3749_v44, 2 }
 0x5fd   : > { %v3751_v37 = vadd.f32 %v3750_v52, %v3749_v44 }
 0x5ff   : > { %v3752_v60 = vrot.slane %v3751_v37, 1 }
 0x601   : > { %v3753_v31 = vadd.f32 %v3752_v60, %v3751_v37 }
 0x603   : > { %3754 = vst [vmem:[%s607_s24] sm:$0xff] %v3753_v31 }
 0x604   : > { %5012 = shalt.err (!%p5009_p8)
}
 0x605   : > { %s5013_s10 = scalar_lea.hbm %s3788_s13, 128  ;;  %s5017_s22 = scalar_lea.hbm %s6897_s20, 256 }
 0x606   : > { %p5014_p5 = scmp.ne.s32.totalorder %s3788_s13, %s5013_s10  ;;  %p5018_p2 = scmp.lt.s32.totalorder %s3788_s13, %s6897_s20 }
 0x607   : > { %p5019_p0 = scmp.lt.s32.totalorder %s5017_s22, %s5013_s10 }
 0x608   : > { %p5015_p13 = pnand %p5014_p5, %p6895_p1 }
 0x609   : > { %p5020_p10 = por %p5019_p0, %p5018_p2 }
 0x60a   : > { %p5016_p11 = pneg %p5015_p13 }
 0x60c   : > { %p5021_p3 = pnand %p5020_p10, %p5016_p11 }
 0x60e   : > { %5024 = shalt.err (!%p5021_p3)
}
 0x60f   : > { %4614 = dma.vmem_to_hbm [thread:$0]  (%p6895_p1), %s3791_s8, 128, %s3788_s13, %s3761_s12  }
 0x610 PF: > { %s6898_s5 = sld [smem:[#allocation22_spill]]  ;;  %p6901_p9 = scmp.ge.s32.totalorder %s5079_s16, 2 }
 0x611   : > { %s6899_s25 = sld [smem:[#allocation27_spill]] }
 0x616   : > { %s3802_s24 = sand.u32 1, %s6898_s5  }
 0x617   : > { %p6900_p7 = scmp.ne.s32.totalorder %s6899_s25, 0  ;;  %s3803_s15 = scalar_lea.sflag [#allocation4], %s3802_s24 }
 0x619   : > { %p4625_p12 = pnand %p6901_p9, %p6900_p7 }
 0x61b   : > { %p4626_p4 = pneg %p4625_p12 }
 0x61d   : > { %5058 = dma.done.wait (%p4626_p4), %s3803_s15, 2048  }
 0x61e   : > { %5060 = vsyncadd (%p4626_p4), %s3803_s15, 4294965248  ;;  %s3812_s29 = scalar_lea.sflag [#allocation12], %s3802_s24 }
 0x61f   : > { %5062 = dma.done.wait (%p4626_p4), %s3812_s29, 128  }
 0x620   : > { %5064 = vsyncadd (%p4626_p4), %s3812_s29, 4294967168  ;;  %s6902_s16 = sld [smem:[#allocation24_spill]]  ;;  %s6905_s29 = smov %s5071_s30 }
 0x621   : > { %s6903_s18 = sld [smem:[#allocation23_spill]] }
 0x622   : > { %s6904_s15 = sld [smem:[#allocation25_spill]] }
 0x626   : > { %p35_p1 = scmp.ge.s32.totalorder %s6902_s16, 4  }
 0x627   : > { %s6906_s30 = smov %s6903_s18 }
 0x628   :  { %37 = sbr.rel (!%p35_p1) target bundleno = 18 (0x12), region = 166 }
 0x62d   :  { %3817 = vsyncpa [#allocation3], 1 }
 0x62e   :  { %3819 = vsyncpa [#allocation3 + $0x1], 1 }
 0x62f   :  { %3820 = vsyncpa [#allocation6], 1 }
 0x630   :  { %3822 = vsyncpa [#allocation6 + $0x1], 1 }
 0x631   :  { %3823 = vsyncpa [#allocation9], 1 }
 0x632   :  { %3824 = vsyncpa [#allocation4], 1 }
 0x633   :  { %3826 = vsyncpa [#allocation4 + $0x1], 1 }
 0x634   :  { %3827 = vsyncpa [#allocation12], 1 }
 0x635   :  { %3829 = vsyncpa [#allocation12 + $0x1], 1 }

</bundles_post_ra>
